<compile_context>
chip_gen: v6e
topology: v6e:2x2x1
jax: 0.10.0
libtpu: 0.0.40
codegen_flags: <defaults>
</compile_context>

<pallas_src>
import math

import jax
import jax.numpy as jnp
from jax.experimental import pallas as pl

# ---- config (small, consistent with the module's forward) ----
EMBED = 32          # config.embed_size
WINDOW = 8          # config.window_size
NUM_HEADS = 4       # config.num_heads
NUM_BLOCKS = 2      # config.num_blocks
VOCAB = 16          # vocab_size
HEAD_SIZE = EMBED // NUM_HEADS
FFN = 4 * EMBED
LM_PAD = 128        # pad the vocab projection to 128 lanes -> unmasked (lane-dense) store
EPS = 1e-5          # nn.LayerNorm default
NEG_INF = -1e30     # additive mask constant (avoids -inf -> NaN risk for masked rows)
PARAMS_PER_BLOCK = 11


def _layernorm(x, w, b):
    # x: (N, C) f32; w, b: (1, C) f32 — elementwise math kept in f32 (v5e has no bf16 VPU)
    mu = jnp.mean(x, axis=-1, keepdims=True)
    var = jnp.mean((x - mu) ** 2, axis=-1, keepdims=True)
    return (x - mu) * jax.lax.rsqrt(var + EPS) * w + b


def gpt_kernel(*refs):
    """Entire forward pass fused into one kernel; activations stay resident in VMEM."""
    x_ref, out_ref = refs[0], refs[-1]
    prm = refs[1:-1]

    x = x_ref[...]                                   # (B*T, C) f32, batch flattened to rows
    BT, C = x.shape
    T = WINDOW
    B = BT // T

    # Causal additive mask, built once per call (shared by every block / batch / head).
    row = jax.lax.broadcasted_iota(jnp.int32, (T, T), 0)
    col = jax.lax.broadcasted_iota(jnp.int32, (T, T), 1)
    neg_mask = jnp.where(col <= row, 0.0, NEG_INF).astype(jnp.float32)
    # NOTE: the reference Head scales by embed_size**0.5 (C of the input), not head_size.
    inv_sqrt_c = 1.0 / math.sqrt(C)

    for blk in range(NUM_BLOCKS):
        (ln1w, ln1b, wqkv, wp_h, bp, ln2w, ln2b,
         w1, b1, w2, b2) = prm[blk * PARAMS_PER_BLOCK:(blk + 1) * PARAMS_PER_BLOCK]

        # --- self-attention branch (pre-LN); all heads' QKV in one MXU push ---
        h = _layernorm(x, ln1w[...], ln1b[...]).astype(jnp.bfloat16)
        qkv = jnp.dot(h, wqkv[...], preferred_element_type=jnp.float32)    # (B*T, 3C) f32

        per_batch = []
        for b in range(B):
            qkv_b = qkv[b * T:(b + 1) * T, :]          # sublane slice: (T, 3C)
            proj_b = jnp.zeros((T, C), jnp.float32)
            for hh in range(NUM_HEADS):
                lo = hh * HEAD_SIZE
                hi = lo + HEAD_SIZE
                qh = qkv_b[:, lo:hi].astype(jnp.bfloat16)
                kh = qkv_b[:, C + lo:C + hi].astype(jnp.bfloat16)
                vh = qkv_b[:, 2 * C + lo:2 * C + hi].astype(jnp.bfloat16)
                # scores = q @ k.T without materializing a transpose
                e = jax.lax.dot_general(qh, kh, (((1,), (1,)), ((), ())),
                                        preferred_element_type=jnp.float32)
                e = e * inv_sqrt_c + neg_mask
                e = e - jnp.max(e, axis=-1, keepdims=True)
                p = jnp.exp(e)
                a = p * pl.reciprocal(jnp.sum(p, axis=-1, keepdims=True), approx=True)
                oh = jnp.dot(a.astype(jnp.bfloat16), vh,
                             preferred_element_type=jnp.float32)           # (T, hs)
                # fuse head output straight into the output projection (no lane concat)
                proj_b = proj_b + jnp.dot(oh.astype(jnp.bfloat16), wp_h[hh],
                                          preferred_element_type=jnp.float32)
            per_batch.append(proj_b)
        attn = jnp.concatenate(per_batch, axis=0)       # sublane-axis concat: cheap
        x = x + attn + bp[...]                          # dropout == identity (eval mode)

        # --- feed-forward branch (pre-LN) ---
        h2 = _layernorm(x, ln2w[...], ln2b[...]).astype(jnp.bfloat16)
        f = jnp.dot(h2, w1[...], preferred_element_type=jnp.float32) + b1[...]
        f = jnp.maximum(f, 0.0)
        x = x + jnp.dot(f.astype(jnp.bfloat16), w2[...],
                        preferred_element_type=jnp.float32) + b2[...]

    # --- final LayerNorm + vocab projection (padded to 128 lanes -> lane-dense store) ---
    lnfw, lnfb, wlm, blm = prm[NUM_BLOCKS * PARAMS_PER_BLOCK:]
    hf = _layernorm(x, lnfw[...], lnfb[...]).astype(jnp.bfloat16)
    out_ref[...] = jnp.dot(hf, wlm[...], preferred_element_type=jnp.float32) + blm[...]


# ---------------- wrapper ----------------

def gpt_forward(tokens, params):
    """tokens: (B, T) int32 -> logits (B, T, VOCAB) f32."""
    B, T = tokens.shape
    # Embedding gathers are glue; kept in plain JAX outside the kernel.
    x = params["tok_emb"][tokens] + params["pos_emb"][:T][None, :, :]      # (B, T, C)
    x = x.reshape(B * T, EMBED).astype(jnp.float32)

    flat = []
    for blk in params["blocks"]:
        flat.extend(blk)
    flat.extend(params["head"])

    # No grid: the whole (tiny) problem runs in a single kernel invocation with every
    # operand resident in VMEM — removes per-grid-step overhead and the HBM round-trips
    # of x between layers.
    out = pl.pallas_call(
        gpt_kernel,
        out_shape=jax.ShapeDtypeStruct((B * T, LM_PAD), jnp.float32),
    )(x, *flat)
    return out[:, :VOCAB].reshape(B, T, VOCAB)


# ---------------- deterministic parameter init (packed for the fused kernel) ----------------

def init_params(key):
    def nrm(k, shape, scale=0.02):
        return (scale * jax.random.normal(k, shape)).astype(jnp.float32)

    keys = iter(jax.random.split(key, 64))
    bf16 = jnp.bfloat16
    params = {
        "tok_emb": nrm(next(keys), (VOCAB, EMBED)),
        "pos_emb": nrm(next(keys), (WINDOW, EMBED)),
    }

    blocks = []
    for _ in range(NUM_BLOCKS):
        wq = nrm(next(keys), (EMBED, EMBED))
        wk = nrm(next(keys), (EMBED, EMBED))
        wv = nrm(next(keys), (EMBED, EMBED))
        wqkv = jnp.concatenate([wq, wk, wv], axis=1).astype(bf16)          # (C, 3C)
        wp = nrm(next(keys), (EMBED, EMBED))
        wp_h = wp.reshape(NUM_HEADS, HEAD_SIZE, EMBED).astype(bf16)        # per-head rows of Wp
        blk = [
            jnp.ones((1, EMBED), jnp.float32),         # ln1 weight
            jnp.zeros((1, EMBED), jnp.float32),        # ln1 bias
            wqkv,                                      # merged QKV weight (bf16)
            wp_h,                                      # output projection, per-head (bf16)
            nrm(next(keys), (1, EMBED)),               # proj bias
            jnp.ones((1, EMBED), jnp.float32),         # ln2 weight
            jnp.zeros((1, EMBED), jnp.float32),        # ln2 bias
            nrm(next(keys), (EMBED, FFN)).astype(bf16),   # ffn W1
            nrm(next(keys), (1, FFN)),                    # ffn b1
            nrm(next(keys), (FFN, EMBED)).astype(bf16),   # ffn W2
            nrm(next(keys), (1, EMBED)),                  # ffn b2
        ]
        blocks.append(blk)
    params["blocks"] = blocks

    wlm = nrm(next(keys), (EMBED, VOCAB))
    wlm_pad = jnp.zeros((EMBED, LM_PAD), jnp.float32).at[:, :VOCAB].set(wlm).astype(bf16)
    blm = nrm(next(keys), (1, VOCAB))
    blm_pad = jnp.zeros((1, LM_PAD), jnp.float32).at[:, :VOCAB].set(blm)
    params["head"] = [
        jnp.ones((1, EMBED), jnp.float32),             # final ln weight
        jnp.zeros((1, EMBED), jnp.float32),            # final ln bias
        wlm_pad,                                       # vocab projection padded to 128 lanes
        blm_pad,                                       # padded bias
    ]
    return params


if __name__ == "__main__":
    key = jax.random.PRNGKey(0)
    pkey, tkey = jax.random.split(key)
    params = init_params(pkey)

    B, T = 2, WINDOW
    tokens = jax.random.randint(tkey, (B, T), 0, VOCAB, dtype=jnp.int32)

    fwd = jax.jit(gpt_forward)
    logits = fwd(tokens, params)
    jax.block_until_ready(logits)
    assert logits.shape == (B, T, VOCAB) and logits.dtype == jnp.float32
    assert bool(jnp.all(jnp.isfinite(logits)))
    print("KERNEL_OK")
</pallas_src>

<mosaic_0001>
module attributes {stable_mosaic.version = 11 : i64} {
  func.func @gpt_kernel(%arg0: memref<16x32xf32, #tpu.memory_space<vmem>>, %arg1: memref<1x32xf32, #tpu.memory_space<vmem>>, %arg2: memref<1x32xf32, #tpu.memory_space<vmem>>, %arg3: memref<32x96xbf16, #tpu.memory_space<vmem>>, %arg4: memref<4x8x32xbf16, #tpu.memory_space<vmem>>, %arg5: memref<1x32xf32, #tpu.memory_space<vmem>>, %arg6: memref<1x32xf32, #tpu.memory_space<vmem>>, %arg7: memref<1x32xf32, #tpu.memory_space<vmem>>, %arg8: memref<32x128xbf16, #tpu.memory_space<vmem>>, %arg9: memref<1x128xf32, #tpu.memory_space<vmem>>, %arg10: memref<128x32xbf16, #tpu.memory_space<vmem>>, %arg11: memref<1x32xf32, #tpu.memory_space<vmem>>, %arg12: memref<1x32xf32, #tpu.memory_space<vmem>>, %arg13: memref<1x32xf32, #tpu.memory_space<vmem>>, %arg14: memref<32x96xbf16, #tpu.memory_space<vmem>>, %arg15: memref<4x8x32xbf16, #tpu.memory_space<vmem>>, %arg16: memref<1x32xf32, #tpu.memory_space<vmem>>, %arg17: memref<1x32xf32, #tpu.memory_space<vmem>>, %arg18: memref<1x32xf32, #tpu.memory_space<vmem>>, %arg19: memref<32x128xbf16, #tpu.memory_space<vmem>>, %arg20: memref<1x128xf32, #tpu.memory_space<vmem>>, %arg21: memref<128x32xbf16, #tpu.memory_space<vmem>>, %arg22: memref<1x32xf32, #tpu.memory_space<vmem>>, %arg23: memref<1x32xf32, #tpu.memory_space<vmem>>, %arg24: memref<1x32xf32, #tpu.memory_space<vmem>>, %arg25: memref<32x128xbf16, #tpu.memory_space<vmem>>, %arg26: memref<1x128xf32, #tpu.memory_space<vmem>>, %arg27: memref<16x128xf32, #tpu.memory_space<vmem>>) attributes {dimension_semantics = [], scalar_prefetch = 0 : i64, scratch_operands = 0 : i64, tpu.core_type = #tpu.core_type<tc>} {
    %c0 = arith.constant 0 : index
    %c0_0 = arith.constant 0 : index
    %0 = vector.load %arg0[%c0, %c0_0] : memref<16x32xf32, #tpu.memory_space<vmem>>, vector<16x32xf32>
    %1 = tpu.iota {dimensions = array<i32: 0>} : vector<8x8xi32>
    %2 = tpu.iota {dimensions = array<i32: 1>} : vector<8x8xi32>
    %3 = arith.cmpi sle, %2, %1 : vector<8x8xi32>
    %cst = arith.constant 0.000000e+00 : f32
    %cst_1 = arith.constant -1.000000e+30 : f32
    %4 = vector.broadcast %cst : f32 to vector<8x8xf32>
    %5 = vector.broadcast %cst_1 : f32 to vector<8x8xf32>
    %6 = arith.select %3, %4, %5 : vector<8x8xi1>, vector<8x8xf32>
    %c0_2 = arith.constant 0 : index
    %c0_3 = arith.constant 0 : index
    %7 = vector.load %arg1[%c0_2, %c0_3] : memref<1x32xf32, #tpu.memory_space<vmem>>, vector<1x32xf32>
    %c0_4 = arith.constant 0 : index
    %c0_5 = arith.constant 0 : index
    %8 = vector.load %arg2[%c0_4, %c0_5] : memref<1x32xf32, #tpu.memory_space<vmem>>, vector<1x32xf32>
    %cst_6 = arith.constant dense<0.000000e+00> : vector<16xf32>
    %9 = vector.multi_reduction <add>, %0, %cst_6 [1] : vector<16x32xf32> to vector<16xf32>
    %10 = vector.shape_cast %9 : vector<16xf32> to vector<16x1xf32>
    %cst_7 = arith.constant 3.200000e+01 : f32
    %11 = vector.broadcast %cst_7 : f32 to vector<16x1xf32>
    %12 = arith.divf %10, %11 : vector<16x1xf32>
    %13 = vector.broadcast %12 : vector<16x1xf32> to vector<16x32xf32>
    %14 = arith.subf %0, %13 : vector<16x32xf32>
    %15 = arith.mulf %14, %14 : vector<16x32xf32>
    %cst_8 = arith.constant dense<0.000000e+00> : vector<16xf32>
    %16 = vector.multi_reduction <add>, %15, %cst_8 [1] : vector<16x32xf32> to vector<16xf32>
    %17 = vector.shape_cast %16 : vector<16xf32> to vector<16x1xf32>
    %cst_9 = arith.constant 3.200000e+01 : f32
    %18 = vector.broadcast %cst_9 : f32 to vector<16x1xf32>
    %19 = arith.divf %17, %18 : vector<16x1xf32>
    %20 = vector.broadcast %12 : vector<16x1xf32> to vector<16x32xf32>
    %21 = arith.subf %0, %20 : vector<16x32xf32>
    %cst_10 = arith.constant 9.99999974E-6 : f32
    %22 = vector.broadcast %cst_10 : f32 to vector<16x1xf32>
    %23 = arith.addf %19, %22 : vector<16x1xf32>
    %24 = math.rsqrt %23 : vector<16x1xf32>
    %25 = vector.broadcast %24 : vector<16x1xf32> to vector<16x32xf32>
    %26 = arith.mulf %21, %25 : vector<16x32xf32>
    %27 = vector.broadcast %7 : vector<1x32xf32> to vector<16x32xf32>
    %28 = arith.mulf %26, %27 : vector<16x32xf32>
    %29 = vector.broadcast %8 : vector<1x32xf32> to vector<16x32xf32>
    %30 = arith.addf %28, %29 : vector<16x32xf32>
    %31 = arith.truncf %30 : vector<16x32xf32> to vector<16x32xbf16>
    %c0_11 = arith.constant 0 : index
    %c0_12 = arith.constant 0 : index
    %32 = vector.load %arg3[%c0_11, %c0_12] : memref<32x96xbf16, #tpu.memory_space<vmem>>, vector<32x96xbf16>
    %cst_13 = arith.constant dense<0.000000e+00> : vector<16x96xf32>
    %33 = tpu.matmul %31, %32, %cst_13 {dimension_numbers = #tpu.dot_dimension_numbers<[1], [0], [0], [1], [0, 0, 1, 1], [], []>} : vector<16x32xbf16>, vector<32x96xbf16>, vector<16x96xf32> -> vector<16x96xf32>
    %34 = vector.extract_strided_slice %33 {offsets = [0, 0], sizes = [8, 96], strides = [1, 1]} : vector<16x96xf32> to vector<8x96xf32>
    %cst_14 = arith.constant 0.000000e+00 : f32
    %35 = vector.broadcast %cst_14 : f32 to vector<8x32xf32>
    %36 = vector.extract_strided_slice %34 {offsets = [0, 0], sizes = [8, 8], strides = [1, 1]} : vector<8x96xf32> to vector<8x8xf32>
    %37 = arith.truncf %36 : vector<8x8xf32> to vector<8x8xbf16>
    %38 = vector.extract_strided_slice %34 {offsets = [0, 32], sizes = [8, 8], strides = [1, 1]} : vector<8x96xf32> to vector<8x8xf32>
    %39 = arith.truncf %38 : vector<8x8xf32> to vector<8x8xbf16>
    %40 = vector.extract_strided_slice %34 {offsets = [0, 64], sizes = [8, 8], strides = [1, 1]} : vector<8x96xf32> to vector<8x8xf32>
    %41 = arith.truncf %40 : vector<8x8xf32> to vector<8x8xbf16>
    %cst_15 = arith.constant dense<0.000000e+00> : vector<8x8xf32>
    %42 = tpu.matmul %37, %39, %cst_15 {dimension_numbers = #tpu.dot_dimension_numbers<[1], [1], [0], [0], [0, 0, 1, 0], [], []>} : vector<8x8xbf16>, vector<8x8xbf16>, vector<8x8xf32> -> vector<8x8xf32>
    %cst_16 = arith.constant 0.176776692 : f32
    %43 = vector.broadcast %cst_16 : f32 to vector<8x8xf32>
    %44 = arith.mulf %42, %43 : vector<8x8xf32>
    %45 = arith.addf %44, %6 : vector<8x8xf32>
    %cst_17 = arith.constant dense<0xFF800000> : vector<8xf32>
    %46 = vector.multi_reduction <maximumf>, %45, %cst_17 [1] : vector<8x8xf32> to vector<8xf32>
    %47 = vector.shape_cast %46 : vector<8xf32> to vector<8x1xf32>
    %48 = vector.broadcast %47 : vector<8x1xf32> to vector<8x8xf32>
    %49 = arith.subf %45, %48 : vector<8x8xf32>
    %50 = math.exp %49 : vector<8x8xf32>
    %cst_18 = arith.constant dense<0.000000e+00> : vector<8xf32>
    %51 = vector.multi_reduction <add>, %50, %cst_18 [1] : vector<8x8xf32> to vector<8xf32>
    %52 = vector.shape_cast %51 : vector<8xf32> to vector<8x1xf32>
    %53 = tpu.reciprocal %52 {approx = true} : vector<8x1xf32> -> vector<8x1xf32>
    %54 = vector.broadcast %53 : vector<8x1xf32> to vector<8x8xf32>
    %55 = arith.mulf %50, %54 : vector<8x8xf32>
    %56 = arith.truncf %55 : vector<8x8xf32> to vector<8x8xbf16>
    %cst_19 = arith.constant dense<0.000000e+00> : vector<8x8xf32>
    %57 = tpu.matmul %56, %41, %cst_19 {dimension_numbers = #tpu.dot_dimension_numbers<[1], [0], [0], [1], [0, 0, 1, 1], [], []>} : vector<8x8xbf16>, vector<8x8xbf16>, vector<8x8xf32> -> vector<8x8xf32>
    %58 = arith.truncf %57 : vector<8x8xf32> to vector<8x8xbf16>
    %c0_20 = arith.constant 0 : index
    %c0_21 = arith.constant 0 : index
    %c0_22 = arith.constant 0 : index
    %59 = vector.load %arg4[%c0_20, %c0_21, %c0_22] : memref<4x8x32xbf16, #tpu.memory_space<vmem>>, vector<1x8x32xbf16>
    %60 = vector.shape_cast %59 : vector<1x8x32xbf16> to vector<8x32xbf16>
    %cst_23 = arith.constant dense<0.000000e+00> : vector<8x32xf32>
    %61 = tpu.matmul %58, %60, %cst_23 {dimension_numbers = #tpu.dot_dimension_numbers<[1], [0], [0], [1], [0, 0, 1, 1], [], []>} : vector<8x8xbf16>, vector<8x32xbf16>, vector<8x32xf32> -> vector<8x32xf32>
    %62 = arith.addf %35, %61 : vector<8x32xf32>
    %63 = vector.extract_strided_slice %34 {offsets = [0, 8], sizes = [8, 8], strides = [1, 1]} : vector<8x96xf32> to vector<8x8xf32>
    %64 = arith.truncf %63 : vector<8x8xf32> to vector<8x8xbf16>
    %65 = vector.extract_strided_slice %34 {offsets = [0, 40], sizes = [8, 8], strides = [1, 1]} : vector<8x96xf32> to vector<8x8xf32>
    %66 = arith.truncf %65 : vector<8x8xf32> to vector<8x8xbf16>
    %67 = vector.extract_strided_slice %34 {offsets = [0, 72], sizes = [8, 8], strides = [1, 1]} : vector<8x96xf32> to vector<8x8xf32>
    %68 = arith.truncf %67 : vector<8x8xf32> to vector<8x8xbf16>
    %cst_24 = arith.constant dense<0.000000e+00> : vector<8x8xf32>
    %69 = tpu.matmul %64, %66, %cst_24 {dimension_numbers = #tpu.dot_dimension_numbers<[1], [1], [0], [0], [0, 0, 1, 0], [], []>} : vector<8x8xbf16>, vector<8x8xbf16>, vector<8x8xf32> -> vector<8x8xf32>
    %cst_25 = arith.constant 0.176776692 : f32
    %70 = vector.broadcast %cst_25 : f32 to vector<8x8xf32>
    %71 = arith.mulf %69, %70 : vector<8x8xf32>
    %72 = arith.addf %71, %6 : vector<8x8xf32>
    %cst_26 = arith.constant dense<0xFF800000> : vector<8xf32>
    %73 = vector.multi_reduction <maximumf>, %72, %cst_26 [1] : vector<8x8xf32> to vector<8xf32>
    %74 = vector.shape_cast %73 : vector<8xf32> to vector<8x1xf32>
    %75 = vector.broadcast %74 : vector<8x1xf32> to vector<8x8xf32>
    %76 = arith.subf %72, %75 : vector<8x8xf32>
    %77 = math.exp %76 : vector<8x8xf32>
    %cst_27 = arith.constant dense<0.000000e+00> : vector<8xf32>
    %78 = vector.multi_reduction <add>, %77, %cst_27 [1] : vector<8x8xf32> to vector<8xf32>
    %79 = vector.shape_cast %78 : vector<8xf32> to vector<8x1xf32>
    %80 = tpu.reciprocal %79 {approx = true} : vector<8x1xf32> -> vector<8x1xf32>
    %81 = vector.broadcast %80 : vector<8x1xf32> to vector<8x8xf32>
    %82 = arith.mulf %77, %81 : vector<8x8xf32>
    %83 = arith.truncf %82 : vector<8x8xf32> to vector<8x8xbf16>
    %cst_28 = arith.constant dense<0.000000e+00> : vector<8x8xf32>
    %84 = tpu.matmul %83, %68, %cst_28 {dimension_numbers = #tpu.dot_dimension_numbers<[1], [0], [0], [1], [0, 0, 1, 1], [], []>} : vector<8x8xbf16>, vector<8x8xbf16>, vector<8x8xf32> -> vector<8x8xf32>
    %85 = arith.truncf %84 : vector<8x8xf32> to vector<8x8xbf16>
    %c1 = arith.constant 1 : index
    %c0_29 = arith.constant 0 : index
    %c0_30 = arith.constant 0 : index
    %86 = vector.load %arg4[%c1, %c0_29, %c0_30] : memref<4x8x32xbf16, #tpu.memory_space<vmem>>, vector<1x8x32xbf16>
    %87 = vector.shape_cast %86 : vector<1x8x32xbf16> to vector<8x32xbf16>
    %cst_31 = arith.constant dense<0.000000e+00> : vector<8x32xf32>
    %88 = tpu.matmul %85, %87, %cst_31 {dimension_numbers = #tpu.dot_dimension_numbers<[1], [0], [0], [1], [0, 0, 1, 1], [], []>} : vector<8x8xbf16>, vector<8x32xbf16>, vector<8x32xf32> -> vector<8x32xf32>
    %89 = arith.addf %62, %88 : vector<8x32xf32>
    %90 = vector.extract_strided_slice %34 {offsets = [0, 16], sizes = [8, 8], strides = [1, 1]} : vector<8x96xf32> to vector<8x8xf32>
    %91 = arith.truncf %90 : vector<8x8xf32> to vector<8x8xbf16>
    %92 = vector.extract_strided_slice %34 {offsets = [0, 48], sizes = [8, 8], strides = [1, 1]} : vector<8x96xf32> to vector<8x8xf32>
    %93 = arith.truncf %92 : vector<8x8xf32> to vector<8x8xbf16>
    %94 = vector.extract_strided_slice %34 {offsets = [0, 80], sizes = [8, 8], strides = [1, 1]} : vector<8x96xf32> to vector<8x8xf32>
    %95 = arith.truncf %94 : vector<8x8xf32> to vector<8x8xbf16>
    %cst_32 = arith.constant dense<0.000000e+00> : vector<8x8xf32>
    %96 = tpu.matmul %91, %93, %cst_32 {dimension_numbers = #tpu.dot_dimension_numbers<[1], [1], [0], [0], [0, 0, 1, 0], [], []>} : vector<8x8xbf16>, vector<8x8xbf16>, vector<8x8xf32> -> vector<8x8xf32>
    %cst_33 = arith.constant 0.176776692 : f32
    %97 = vector.broadcast %cst_33 : f32 to vector<8x8xf32>
    %98 = arith.mulf %96, %97 : vector<8x8xf32>
    %99 = arith.addf %98, %6 : vector<8x8xf32>
    %cst_34 = arith.constant dense<0xFF800000> : vector<8xf32>
    %100 = vector.multi_reduction <maximumf>, %99, %cst_34 [1] : vector<8x8xf32> to vector<8xf32>
    %101 = vector.shape_cast %100 : vector<8xf32> to vector<8x1xf32>
    %102 = vector.broadcast %101 : vector<8x1xf32> to vector<8x8xf32>
    %103 = arith.subf %99, %102 : vector<8x8xf32>
    %104 = math.exp %103 : vector<8x8xf32>
    %cst_35 = arith.constant dense<0.000000e+00> : vector<8xf32>
    %105 = vector.multi_reduction <add>, %104, %cst_35 [1] : vector<8x8xf32> to vector<8xf32>
    %106 = vector.shape_cast %105 : vector<8xf32> to vector<8x1xf32>
    %107 = tpu.reciprocal %106 {approx = true} : vector<8x1xf32> -> vector<8x1xf32>
    %108 = vector.broadcast %107 : vector<8x1xf32> to vector<8x8xf32>
    %109 = arith.mulf %104, %108 : vector<8x8xf32>
    %110 = arith.truncf %109 : vector<8x8xf32> to vector<8x8xbf16>
    %cst_36 = arith.constant dense<0.000000e+00> : vector<8x8xf32>
    %111 = tpu.matmul %110, %95, %cst_36 {dimension_numbers = #tpu.dot_dimension_numbers<[1], [0], [0], [1], [0, 0, 1, 1], [], []>} : vector<8x8xbf16>, vector<8x8xbf16>, vector<8x8xf32> -> vector<8x8xf32>
    %112 = arith.truncf %111 : vector<8x8xf32> to vector<8x8xbf16>
    %c2 = arith.constant 2 : index
    %c0_37 = arith.constant 0 : index
    %c0_38 = arith.constant 0 : index
    %113 = vector.load %arg4[%c2, %c0_37, %c0_38] : memref<4x8x32xbf16, #tpu.memory_space<vmem>>, vector<1x8x32xbf16>
    %114 = vector.shape_cast %113 : vector<1x8x32xbf16> to vector<8x32xbf16>
    %cst_39 = arith.constant dense<0.000000e+00> : vector<8x32xf32>
    %115 = tpu.matmul %112, %114, %cst_39 {dimension_numbers = #tpu.dot_dimension_numbers<[1], [0], [0], [1], [0, 0, 1, 1], [], []>} : vector<8x8xbf16>, vector<8x32xbf16>, vector<8x32xf32> -> vector<8x32xf32>
    %116 = arith.addf %89, %115 : vector<8x32xf32>
    %117 = vector.extract_strided_slice %34 {offsets = [0, 24], sizes = [8, 8], strides = [1, 1]} : vector<8x96xf32> to vector<8x8xf32>
    %118 = arith.truncf %117 : vector<8x8xf32> to vector<8x8xbf16>
    %119 = vector.extract_strided_slice %34 {offsets = [0, 56], sizes = [8, 8], strides = [1, 1]} : vector<8x96xf32> to vector<8x8xf32>
    %120 = arith.truncf %119 : vector<8x8xf32> to vector<8x8xbf16>
    %121 = vector.extract_strided_slice %34 {offsets = [0, 88], sizes = [8, 8], strides = [1, 1]} : vector<8x96xf32> to vector<8x8xf32>
    %122 = arith.truncf %121 : vector<8x8xf32> to vector<8x8xbf16>
    %cst_40 = arith.constant dense<0.000000e+00> : vector<8x8xf32>
    %123 = tpu.matmul %118, %120, %cst_40 {dimension_numbers = #tpu.dot_dimension_numbers<[1], [1], [0], [0], [0, 0, 1, 0], [], []>} : vector<8x8xbf16>, vector<8x8xbf16>, vector<8x8xf32> -> vector<8x8xf32>
    %cst_41 = arith.constant 0.176776692 : f32
    %124 = vector.broadcast %cst_41 : f32 to vector<8x8xf32>
    %125 = arith.mulf %123, %124 : vector<8x8xf32>
    %126 = arith.addf %125, %6 : vector<8x8xf32>
    %cst_42 = arith.constant dense<0xFF800000> : vector<8xf32>
    %127 = vector.multi_reduction <maximumf>, %126, %cst_42 [1] : vector<8x8xf32> to vector<8xf32>
    %128 = vector.shape_cast %127 : vector<8xf32> to vector<8x1xf32>
    %129 = vector.broadcast %128 : vector<8x1xf32> to vector<8x8xf32>
    %130 = arith.subf %126, %129 : vector<8x8xf32>
    %131 = math.exp %130 : vector<8x8xf32>
    %cst_43 = arith.constant dense<0.000000e+00> : vector<8xf32>
    %132 = vector.multi_reduction <add>, %131, %cst_43 [1] : vector<8x8xf32> to vector<8xf32>
    %133 = vector.shape_cast %132 : vector<8xf32> to vector<8x1xf32>
    %134 = tpu.reciprocal %133 {approx = true} : vector<8x1xf32> -> vector<8x1xf32>
    %135 = vector.broadcast %134 : vector<8x1xf32> to vector<8x8xf32>
    %136 = arith.mulf %131, %135 : vector<8x8xf32>
    %137 = arith.truncf %136 : vector<8x8xf32> to vector<8x8xbf16>
    %cst_44 = arith.constant dense<0.000000e+00> : vector<8x8xf32>
    %138 = tpu.matmul %137, %122, %cst_44 {dimension_numbers = #tpu.dot_dimension_numbers<[1], [0], [0], [1], [0, 0, 1, 1], [], []>} : vector<8x8xbf16>, vector<8x8xbf16>, vector<8x8xf32> -> vector<8x8xf32>
    %139 = arith.truncf %138 : vector<8x8xf32> to vector<8x8xbf16>
    %c3 = arith.constant 3 : index
    %c0_45 = arith.constant 0 : index
    %c0_46 = arith.constant 0 : index
    %140 = vector.load %arg4[%c3, %c0_45, %c0_46] : memref<4x8x32xbf16, #tpu.memory_space<vmem>>, vector<1x8x32xbf16>
    %141 = vector.shape_cast %140 : vector<1x8x32xbf16> to vector<8x32xbf16>
    %cst_47 = arith.constant dense<0.000000e+00> : vector<8x32xf32>
    %142 = tpu.matmul %139, %141, %cst_47 {dimension_numbers = #tpu.dot_dimension_numbers<[1], [0], [0], [1], [0, 0, 1, 1], [], []>} : vector<8x8xbf16>, vector<8x32xbf16>, vector<8x32xf32> -> vector<8x32xf32>
    %143 = arith.addf %116, %142 : vector<8x32xf32>
    %144 = vector.extract_strided_slice %33 {offsets = [8, 0], sizes = [8, 96], strides = [1, 1]} : vector<16x96xf32> to vector<8x96xf32>
    %cst_48 = arith.constant 0.000000e+00 : f32
    %145 = vector.broadcast %cst_48 : f32 to vector<8x32xf32>
    %146 = vector.extract_strided_slice %144 {offsets = [0, 0], sizes = [8, 8], strides = [1, 1]} : vector<8x96xf32> to vector<8x8xf32>
    %147 = arith.truncf %146 : vector<8x8xf32> to vector<8x8xbf16>
    %148 = vector.extract_strided_slice %144 {offsets = [0, 32], sizes = [8, 8], strides = [1, 1]} : vector<8x96xf32> to vector<8x8xf32>
    %149 = arith.truncf %148 : vector<8x8xf32> to vector<8x8xbf16>
    %150 = vector.extract_strided_slice %144 {offsets = [0, 64], sizes = [8, 8], strides = [1, 1]} : vector<8x96xf32> to vector<8x8xf32>
    %151 = arith.truncf %150 : vector<8x8xf32> to vector<8x8xbf16>
    %cst_49 = arith.constant dense<0.000000e+00> : vector<8x8xf32>
    %152 = tpu.matmul %147, %149, %cst_49 {dimension_numbers = #tpu.dot_dimension_numbers<[1], [1], [0], [0], [0, 0, 1, 0], [], []>} : vector<8x8xbf16>, vector<8x8xbf16>, vector<8x8xf32> -> vector<8x8xf32>
    %cst_50 = arith.constant 0.176776692 : f32
    %153 = vector.broadcast %cst_50 : f32 to vector<8x8xf32>
    %154 = arith.mulf %152, %153 : vector<8x8xf32>
    %155 = arith.addf %154, %6 : vector<8x8xf32>
    %cst_51 = arith.constant dense<0xFF800000> : vector<8xf32>
    %156 = vector.multi_reduction <maximumf>, %155, %cst_51 [1] : vector<8x8xf32> to vector<8xf32>
    %157 = vector.shape_cast %156 : vector<8xf32> to vector<8x1xf32>
    %158 = vector.broadcast %157 : vector<8x1xf32> to vector<8x8xf32>
    %159 = arith.subf %155, %158 : vector<8x8xf32>
    %160 = math.exp %159 : vector<8x8xf32>
    %cst_52 = arith.constant dense<0.000000e+00> : vector<8xf32>
    %161 = vector.multi_reduction <add>, %160, %cst_52 [1] : vector<8x8xf32> to vector<8xf32>
    %162 = vector.shape_cast %161 : vector<8xf32> to vector<8x1xf32>
    %163 = tpu.reciprocal %162 {approx = true} : vector<8x1xf32> -> vector<8x1xf32>
    %164 = vector.broadcast %163 : vector<8x1xf32> to vector<8x8xf32>
    %165 = arith.mulf %160, %164 : vector<8x8xf32>
    %166 = arith.truncf %165 : vector<8x8xf32> to vector<8x8xbf16>
    %cst_53 = arith.constant dense<0.000000e+00> : vector<8x8xf32>
    %167 = tpu.matmul %166, %151, %cst_53 {dimension_numbers = #tpu.dot_dimension_numbers<[1], [0], [0], [1], [0, 0, 1, 1], [], []>} : vector<8x8xbf16>, vector<8x8xbf16>, vector<8x8xf32> -> vector<8x8xf32>
    %168 = arith.truncf %167 : vector<8x8xf32> to vector<8x8xbf16>
    %c0_54 = arith.constant 0 : index
    %c0_55 = arith.constant 0 : index
    %c0_56 = arith.constant 0 : index
    %169 = vector.load %arg4[%c0_54, %c0_55, %c0_56] : memref<4x8x32xbf16, #tpu.memory_space<vmem>>, vector<1x8x32xbf16>
    %170 = vector.shape_cast %169 : vector<1x8x32xbf16> to vector<8x32xbf16>
    %cst_57 = arith.constant dense<0.000000e+00> : vector<8x32xf32>
    %171 = tpu.matmul %168, %170, %cst_57 {dimension_numbers = #tpu.dot_dimension_numbers<[1], [0], [0], [1], [0, 0, 1, 1], [], []>} : vector<8x8xbf16>, vector<8x32xbf16>, vector<8x32xf32> -> vector<8x32xf32>
    %172 = arith.addf %145, %171 : vector<8x32xf32>
    %173 = vector.extract_strided_slice %144 {offsets = [0, 8], sizes = [8, 8], strides = [1, 1]} : vector<8x96xf32> to vector<8x8xf32>
    %174 = arith.truncf %173 : vector<8x8xf32> to vector<8x8xbf16>
    %175 = vector.extract_strided_slice %144 {offsets = [0, 40], sizes = [8, 8], strides = [1, 1]} : vector<8x96xf32> to vector<8x8xf32>
    %176 = arith.truncf %175 : vector<8x8xf32> to vector<8x8xbf16>
    %177 = vector.extract_strided_slice %144 {offsets = [0, 72], sizes = [8, 8], strides = [1, 1]} : vector<8x96xf32> to vector<8x8xf32>
    %178 = arith.truncf %177 : vector<8x8xf32> to vector<8x8xbf16>
    %cst_58 = arith.constant dense<0.000000e+00> : vector<8x8xf32>
    %179 = tpu.matmul %174, %176, %cst_58 {dimension_numbers = #tpu.dot_dimension_numbers<[1], [1], [0], [0], [0, 0, 1, 0], [], []>} : vector<8x8xbf16>, vector<8x8xbf16>, vector<8x8xf32> -> vector<8x8xf32>
    %cst_59 = arith.constant 0.176776692 : f32
    %180 = vector.broadcast %cst_59 : f32 to vector<8x8xf32>
    %181 = arith.mulf %179, %180 : vector<8x8xf32>
    %182 = arith.addf %181, %6 : vector<8x8xf32>
    %cst_60 = arith.constant dense<0xFF800000> : vector<8xf32>
    %183 = vector.multi_reduction <maximumf>, %182, %cst_60 [1] : vector<8x8xf32> to vector<8xf32>
    %184 = vector.shape_cast %183 : vector<8xf32> to vector<8x1xf32>
    %185 = vector.broadcast %184 : vector<8x1xf32> to vector<8x8xf32>
    %186 = arith.subf %182, %185 : vector<8x8xf32>
    %187 = math.exp %186 : vector<8x8xf32>
    %cst_61 = arith.constant dense<0.000000e+00> : vector<8xf32>
    %188 = vector.multi_reduction <add>, %187, %cst_61 [1] : vector<8x8xf32> to vector<8xf32>
    %189 = vector.shape_cast %188 : vector<8xf32> to vector<8x1xf32>
    %190 = tpu.reciprocal %189 {approx = true} : vector<8x1xf32> -> vector<8x1xf32>
    %191 = vector.broadcast %190 : vector<8x1xf32> to vector<8x8xf32>
    %192 = arith.mulf %187, %191 : vector<8x8xf32>
    %193 = arith.truncf %192 : vector<8x8xf32> to vector<8x8xbf16>
    %cst_62 = arith.constant dense<0.000000e+00> : vector<8x8xf32>
    %194 = tpu.matmul %193, %178, %cst_62 {dimension_numbers = #tpu.dot_dimension_numbers<[1], [0], [0], [1], [0, 0, 1, 1], [], []>} : vector<8x8xbf16>, vector<8x8xbf16>, vector<8x8xf32> -> vector<8x8xf32>
    %195 = arith.truncf %194 : vector<8x8xf32> to vector<8x8xbf16>
    %c1_63 = arith.constant 1 : index
    %c0_64 = arith.constant 0 : index
    %c0_65 = arith.constant 0 : index
    %196 = vector.load %arg4[%c1_63, %c0_64, %c0_65] : memref<4x8x32xbf16, #tpu.memory_space<vmem>>, vector<1x8x32xbf16>
    %197 = vector.shape_cast %196 : vector<1x8x32xbf16> to vector<8x32xbf16>
    %cst_66 = arith.constant dense<0.000000e+00> : vector<8x32xf32>
    %198 = tpu.matmul %195, %197, %cst_66 {dimension_numbers = #tpu.dot_dimension_numbers<[1], [0], [0], [1], [0, 0, 1, 1], [], []>} : vector<8x8xbf16>, vector<8x32xbf16>, vector<8x32xf32> -> vector<8x32xf32>
    %199 = arith.addf %172, %198 : vector<8x32xf32>
    %200 = vector.extract_strided_slice %144 {offsets = [0, 16], sizes = [8, 8], strides = [1, 1]} : vector<8x96xf32> to vector<8x8xf32>
    %201 = arith.truncf %200 : vector<8x8xf32> to vector<8x8xbf16>
    %202 = vector.extract_strided_slice %144 {offsets = [0, 48], sizes = [8, 8], strides = [1, 1]} : vector<8x96xf32> to vector<8x8xf32>
    %203 = arith.truncf %202 : vector<8x8xf32> to vector<8x8xbf16>
    %204 = vector.extract_strided_slice %144 {offsets = [0, 80], sizes = [8, 8], strides = [1, 1]} : vector<8x96xf32> to vector<8x8xf32>
    %205 = arith.truncf %204 : vector<8x8xf32> to vector<8x8xbf16>
    %cst_67 = arith.constant dense<0.000000e+00> : vector<8x8xf32>
    %206 = tpu.matmul %201, %203, %cst_67 {dimension_numbers = #tpu.dot_dimension_numbers<[1], [1], [0], [0], [0, 0, 1, 0], [], []>} : vector<8x8xbf16>, vector<8x8xbf16>, vector<8x8xf32> -> vector<8x8xf32>
    %cst_68 = arith.constant 0.176776692 : f32
    %207 = vector.broadcast %cst_68 : f32 to vector<8x8xf32>
    %208 = arith.mulf %206, %207 : vector<8x8xf32>
    %209 = arith.addf %208, %6 : vector<8x8xf32>
    %cst_69 = arith.constant dense<0xFF800000> : vector<8xf32>
    %210 = vector.multi_reduction <maximumf>, %209, %cst_69 [1] : vector<8x8xf32> to vector<8xf32>
    %211 = vector.shape_cast %210 : vector<8xf32> to vector<8x1xf32>
    %212 = vector.broadcast %211 : vector<8x1xf32> to vector<8x8xf32>
    %213 = arith.subf %209, %212 : vector<8x8xf32>
    %214 = math.exp %213 : vector<8x8xf32>
    %cst_70 = arith.constant dense<0.000000e+00> : vector<8xf32>
    %215 = vector.multi_reduction <add>, %214, %cst_70 [1] : vector<8x8xf32> to vector<8xf32>
    %216 = vector.shape_cast %215 : vector<8xf32> to vector<8x1xf32>
    %217 = tpu.reciprocal %216 {approx = true} : vector<8x1xf32> -> vector<8x1xf32>
    %218 = vector.broadcast %217 : vector<8x1xf32> to vector<8x8xf32>
    %219 = arith.mulf %214, %218 : vector<8x8xf32>
    %220 = arith.truncf %219 : vector<8x8xf32> to vector<8x8xbf16>
    %cst_71 = arith.constant dense<0.000000e+00> : vector<8x8xf32>
    %221 = tpu.matmul %220, %205, %cst_71 {dimension_numbers = #tpu.dot_dimension_numbers<[1], [0], [0], [1], [0, 0, 1, 1], [], []>} : vector<8x8xbf16>, vector<8x8xbf16>, vector<8x8xf32> -> vector<8x8xf32>
    %222 = arith.truncf %221 : vector<8x8xf32> to vector<8x8xbf16>
    %c2_72 = arith.constant 2 : index
    %c0_73 = arith.constant 0 : index
    %c0_74 = arith.constant 0 : index
    %223 = vector.load %arg4[%c2_72, %c0_73, %c0_74] : memref<4x8x32xbf16, #tpu.memory_space<vmem>>, vector<1x8x32xbf16>
    %224 = vector.shape_cast %223 : vector<1x8x32xbf16> to vector<8x32xbf16>
    %cst_75 = arith.constant dense<0.000000e+00> : vector<8x32xf32>
    %225 = tpu.matmul %222, %224, %cst_75 {dimension_numbers = #tpu.dot_dimension_numbers<[1], [0], [0], [1], [0, 0, 1, 1], [], []>} : vector<8x8xbf16>, vector<8x32xbf16>, vector<8x32xf32> -> vector<8x32xf32>
    %226 = arith.addf %199, %225 : vector<8x32xf32>
    %227 = vector.extract_strided_slice %144 {offsets = [0, 24], sizes = [8, 8], strides = [1, 1]} : vector<8x96xf32> to vector<8x8xf32>
    %228 = arith.truncf %227 : vector<8x8xf32> to vector<8x8xbf16>
    %229 = vector.extract_strided_slice %144 {offsets = [0, 56], sizes = [8, 8], strides = [1, 1]} : vector<8x96xf32> to vector<8x8xf32>
    %230 = arith.truncf %229 : vector<8x8xf32> to vector<8x8xbf16>
    %231 = vector.extract_strided_slice %144 {offsets = [0, 88], sizes = [8, 8], strides = [1, 1]} : vector<8x96xf32> to vector<8x8xf32>
    %232 = arith.truncf %231 : vector<8x8xf32> to vector<8x8xbf16>
    %cst_76 = arith.constant dense<0.000000e+00> : vector<8x8xf32>
    %233 = tpu.matmul %228, %230, %cst_76 {dimension_numbers = #tpu.dot_dimension_numbers<[1], [1], [0], [0], [0, 0, 1, 0], [], []>} : vector<8x8xbf16>, vector<8x8xbf16>, vector<8x8xf32> -> vector<8x8xf32>
    %cst_77 = arith.constant 0.176776692 : f32
    %234 = vector.broadcast %cst_77 : f32 to vector<8x8xf32>
    %235 = arith.mulf %233, %234 : vector<8x8xf32>
    %236 = arith.addf %235, %6 : vector<8x8xf32>
    %cst_78 = arith.constant dense<0xFF800000> : vector<8xf32>
    %237 = vector.multi_reduction <maximumf>, %236, %cst_78 [1] : vector<8x8xf32> to vector<8xf32>
    %238 = vector.shape_cast %237 : vector<8xf32> to vector<8x1xf32>
    %239 = vector.broadcast %238 : vector<8x1xf32> to vector<8x8xf32>
    %240 = arith.subf %236, %239 : vector<8x8xf32>
    %241 = math.exp %240 : vector<8x8xf32>
    %cst_79 = arith.constant dense<0.000000e+00> : vector<8xf32>
    %242 = vector.multi_reduction <add>, %241, %cst_79 [1] : vector<8x8xf32> to vector<8xf32>
    %243 = vector.shape_cast %242 : vector<8xf32> to vector<8x1xf32>
    %244 = tpu.reciprocal %243 {approx = true} : vector<8x1xf32> -> vector<8x1xf32>
    %245 = vector.broadcast %244 : vector<8x1xf32> to vector<8x8xf32>
    %246 = arith.mulf %241, %245 : vector<8x8xf32>
    %247 = arith.truncf %246 : vector<8x8xf32> to vector<8x8xbf16>
    %cst_80 = arith.constant dense<0.000000e+00> : vector<8x8xf32>
    %248 = tpu.matmul %247, %232, %cst_80 {dimension_numbers = #tpu.dot_dimension_numbers<[1], [0], [0], [1], [0, 0, 1, 1], [], []>} : vector<8x8xbf16>, vector<8x8xbf16>, vector<8x8xf32> -> vector<8x8xf32>
    %249 = arith.truncf %248 : vector<8x8xf32> to vector<8x8xbf16>
    %c3_81 = arith.constant 3 : index
    %c0_82 = arith.constant 0 : index
    %c0_83 = arith.constant 0 : index
    %250 = vector.load %arg4[%c3_81, %c0_82, %c0_83] : memref<4x8x32xbf16, #tpu.memory_space<vmem>>, vector<1x8x32xbf16>
    %251 = vector.shape_cast %250 : vector<1x8x32xbf16> to vector<8x32xbf16>
    %cst_84 = arith.constant dense<0.000000e+00> : vector<8x32xf32>
    %252 = tpu.matmul %249, %251, %cst_84 {dimension_numbers = #tpu.dot_dimension_numbers<[1], [0], [0], [1], [0, 0, 1, 1], [], []>} : vector<8x8xbf16>, vector<8x32xbf16>, vector<8x32xf32> -> vector<8x32xf32>
    %253 = arith.addf %226, %252 : vector<8x32xf32>
    %254 = tpu.concatenate %143, %253 in 0 : vector<8x32xf32>, vector<8x32xf32> -> vector<16x32xf32>
    %255 = arith.addf %0, %254 : vector<16x32xf32>
    %c0_85 = arith.constant 0 : index
    %c0_86 = arith.constant 0 : index
    %256 = vector.load %arg5[%c0_85, %c0_86] : memref<1x32xf32, #tpu.memory_space<vmem>>, vector<1x32xf32>
    %257 = vector.broadcast %256 : vector<1x32xf32> to vector<16x32xf32>
    %258 = arith.addf %255, %257 : vector<16x32xf32>
    %c0_87 = arith.constant 0 : index
    %c0_88 = arith.constant 0 : index
    %259 = vector.load %arg6[%c0_87, %c0_88] : memref<1x32xf32, #tpu.memory_space<vmem>>, vector<1x32xf32>
    %c0_89 = arith.constant 0 : index
    %c0_90 = arith.constant 0 : index
    %260 = vector.load %arg7[%c0_89, %c0_90] : memref<1x32xf32, #tpu.memory_space<vmem>>, vector<1x32xf32>
    %cst_91 = arith.constant dense<0.000000e+00> : vector<16xf32>
    %261 = vector.multi_reduction <add>, %258, %cst_91 [1] : vector<16x32xf32> to vector<16xf32>
    %262 = vector.shape_cast %261 : vector<16xf32> to vector<16x1xf32>
    %cst_92 = arith.constant 3.200000e+01 : f32
    %263 = vector.broadcast %cst_92 : f32 to vector<16x1xf32>
    %264 = arith.divf %262, %263 : vector<16x1xf32>
    %265 = vector.broadcast %264 : vector<16x1xf32> to vector<16x32xf32>
    %266 = arith.subf %258, %265 : vector<16x32xf32>
    %267 = arith.mulf %266, %266 : vector<16x32xf32>
    %cst_93 = arith.constant dense<0.000000e+00> : vector<16xf32>
    %268 = vector.multi_reduction <add>, %267, %cst_93 [1] : vector<16x32xf32> to vector<16xf32>
    %269 = vector.shape_cast %268 : vector<16xf32> to vector<16x1xf32>
    %cst_94 = arith.constant 3.200000e+01 : f32
    %270 = vector.broadcast %cst_94 : f32 to vector<16x1xf32>
    %271 = arith.divf %269, %270 : vector<16x1xf32>
    %272 = vector.broadcast %264 : vector<16x1xf32> to vector<16x32xf32>
    %273 = arith.subf %258, %272 : vector<16x32xf32>
    %cst_95 = arith.constant 9.99999974E-6 : f32
    %274 = vector.broadcast %cst_95 : f32 to vector<16x1xf32>
    %275 = arith.addf %271, %274 : vector<16x1xf32>
    %276 = math.rsqrt %275 : vector<16x1xf32>
    %277 = vector.broadcast %276 : vector<16x1xf32> to vector<16x32xf32>
    %278 = arith.mulf %273, %277 : vector<16x32xf32>
    %279 = vector.broadcast %259 : vector<1x32xf32> to vector<16x32xf32>
    %280 = arith.mulf %278, %279 : vector<16x32xf32>
    %281 = vector.broadcast %260 : vector<1x32xf32> to vector<16x32xf32>
    %282 = arith.addf %280, %281 : vector<16x32xf32>
    %283 = arith.truncf %282 : vector<16x32xf32> to vector<16x32xbf16>
    %c0_96 = arith.constant 0 : index
    %c0_97 = arith.constant 0 : index
    %284 = vector.load %arg8[%c0_96, %c0_97] : memref<32x128xbf16, #tpu.memory_space<vmem>>, vector<32x128xbf16>
    %cst_98 = arith.constant dense<0.000000e+00> : vector<16x128xf32>
    %285 = tpu.matmul %283, %284, %cst_98 {dimension_numbers = #tpu.dot_dimension_numbers<[1], [0], [0], [1], [0, 0, 1, 1], [], []>} : vector<16x32xbf16>, vector<32x128xbf16>, vector<16x128xf32> -> vector<16x128xf32>
    %c0_99 = arith.constant 0 : index
    %c0_100 = arith.constant 0 : index
    %286 = vector.load %arg9[%c0_99, %c0_100] : memref<1x128xf32, #tpu.memory_space<vmem>>, vector<1x128xf32>
    %287 = vector.broadcast %286 : vector<1x128xf32> to vector<16x128xf32>
    %288 = arith.addf %285, %287 : vector<16x128xf32>
    %cst_101 = arith.constant 0.000000e+00 : f32
    %289 = vector.broadcast %cst_101 : f32 to vector<16x128xf32>
    %290 = arith.maximumf %288, %289 : vector<16x128xf32>
    %291 = arith.truncf %290 : vector<16x128xf32> to vector<16x128xbf16>
    %c0_102 = arith.constant 0 : index
    %c0_103 = arith.constant 0 : index
    %292 = vector.load %arg10[%c0_102, %c0_103] : memref<128x32xbf16, #tpu.memory_space<vmem>>, vector<128x32xbf16>
    %cst_104 = arith.constant dense<0.000000e+00> : vector<16x32xf32>
    %293 = tpu.matmul %291, %292, %cst_104 {dimension_numbers = #tpu.dot_dimension_numbers<[1], [0], [0], [1], [0, 0, 1, 1], [], []>} : vector<16x128xbf16>, vector<128x32xbf16>, vector<16x32xf32> -> vector<16x32xf32>
    %294 = arith.addf %258, %293 : vector<16x32xf32>
    %c0_105 = arith.constant 0 : index
    %c0_106 = arith.constant 0 : index
    %295 = vector.load %arg11[%c0_105, %c0_106] : memref<1x32xf32, #tpu.memory_space<vmem>>, vector<1x32xf32>
    %296 = vector.broadcast %295 : vector<1x32xf32> to vector<16x32xf32>
    %297 = arith.addf %294, %296 : vector<16x32xf32>
    %c0_107 = arith.constant 0 : index
    %c0_108 = arith.constant 0 : index
    %298 = vector.load %arg12[%c0_107, %c0_108] : memref<1x32xf32, #tpu.memory_space<vmem>>, vector<1x32xf32>
    %c0_109 = arith.constant 0 : index
    %c0_110 = arith.constant 0 : index
    %299 = vector.load %arg13[%c0_109, %c0_110] : memref<1x32xf32, #tpu.memory_space<vmem>>, vector<1x32xf32>
    %cst_111 = arith.constant dense<0.000000e+00> : vector<16xf32>
    %300 = vector.multi_reduction <add>, %297, %cst_111 [1] : vector<16x32xf32> to vector<16xf32>
    %301 = vector.shape_cast %300 : vector<16xf32> to vector<16x1xf32>
    %cst_112 = arith.constant 3.200000e+01 : f32
    %302 = vector.broadcast %cst_112 : f32 to vector<16x1xf32>
    %303 = arith.divf %301, %302 : vector<16x1xf32>
    %304 = vector.broadcast %303 : vector<16x1xf32> to vector<16x32xf32>
    %305 = arith.subf %297, %304 : vector<16x32xf32>
    %306 = arith.mulf %305, %305 : vector<16x32xf32>
    %cst_113 = arith.constant dense<0.000000e+00> : vector<16xf32>
    %307 = vector.multi_reduction <add>, %306, %cst_113 [1] : vector<16x32xf32> to vector<16xf32>
    %308 = vector.shape_cast %307 : vector<16xf32> to vector<16x1xf32>
    %cst_114 = arith.constant 3.200000e+01 : f32
    %309 = vector.broadcast %cst_114 : f32 to vector<16x1xf32>
    %310 = arith.divf %308, %309 : vector<16x1xf32>
    %311 = vector.broadcast %303 : vector<16x1xf32> to vector<16x32xf32>
    %312 = arith.subf %297, %311 : vector<16x32xf32>
    %cst_115 = arith.constant 9.99999974E-6 : f32
    %313 = vector.broadcast %cst_115 : f32 to vector<16x1xf32>
    %314 = arith.addf %310, %313 : vector<16x1xf32>
    %315 = math.rsqrt %314 : vector<16x1xf32>
    %316 = vector.broadcast %315 : vector<16x1xf32> to vector<16x32xf32>
    %317 = arith.mulf %312, %316 : vector<16x32xf32>
    %318 = vector.broadcast %298 : vector<1x32xf32> to vector<16x32xf32>
    %319 = arith.mulf %317, %318 : vector<16x32xf32>
    %320 = vector.broadcast %299 : vector<1x32xf32> to vector<16x32xf32>
    %321 = arith.addf %319, %320 : vector<16x32xf32>
    %322 = arith.truncf %321 : vector<16x32xf32> to vector<16x32xbf16>
    %c0_116 = arith.constant 0 : index
    %c0_117 = arith.constant 0 : index
    %323 = vector.load %arg14[%c0_116, %c0_117] : memref<32x96xbf16, #tpu.memory_space<vmem>>, vector<32x96xbf16>
    %cst_118 = arith.constant dense<0.000000e+00> : vector<16x96xf32>
    %324 = tpu.matmul %322, %323, %cst_118 {dimension_numbers = #tpu.dot_dimension_numbers<[1], [0], [0], [1], [0, 0, 1, 1], [], []>} : vector<16x32xbf16>, vector<32x96xbf16>, vector<16x96xf32> -> vector<16x96xf32>
    %325 = vector.extract_strided_slice %324 {offsets = [0, 0], sizes = [8, 96], strides = [1, 1]} : vector<16x96xf32> to vector<8x96xf32>
    %cst_119 = arith.constant 0.000000e+00 : f32
    %326 = vector.broadcast %cst_119 : f32 to vector<8x32xf32>
    %327 = vector.extract_strided_slice %325 {offsets = [0, 0], sizes = [8, 8], strides = [1, 1]} : vector<8x96xf32> to vector<8x8xf32>
    %328 = arith.truncf %327 : vector<8x8xf32> to vector<8x8xbf16>
    %329 = vector.extract_strided_slice %325 {offsets = [0, 32], sizes = [8, 8], strides = [1, 1]} : vector<8x96xf32> to vector<8x8xf32>
    %330 = arith.truncf %329 : vector<8x8xf32> to vector<8x8xbf16>
    %331 = vector.extract_strided_slice %325 {offsets = [0, 64], sizes = [8, 8], strides = [1, 1]} : vector<8x96xf32> to vector<8x8xf32>
    %332 = arith.truncf %331 : vector<8x8xf32> to vector<8x8xbf16>
    %cst_120 = arith.constant dense<0.000000e+00> : vector<8x8xf32>
    %333 = tpu.matmul %328, %330, %cst_120 {dimension_numbers = #tpu.dot_dimension_numbers<[1], [1], [0], [0], [0, 0, 1, 0], [], []>} : vector<8x8xbf16>, vector<8x8xbf16>, vector<8x8xf32> -> vector<8x8xf32>
    %cst_121 = arith.constant 0.176776692 : f32
    %334 = vector.broadcast %cst_121 : f32 to vector<8x8xf32>
    %335 = arith.mulf %333, %334 : vector<8x8xf32>
    %336 = arith.addf %335, %6 : vector<8x8xf32>
    %cst_122 = arith.constant dense<0xFF800000> : vector<8xf32>
    %337 = vector.multi_reduction <maximumf>, %336, %cst_122 [1] : vector<8x8xf32> to vector<8xf32>
    %338 = vector.shape_cast %337 : vector<8xf32> to vector<8x1xf32>
    %339 = vector.broadcast %338 : vector<8x1xf32> to vector<8x8xf32>
    %340 = arith.subf %336, %339 : vector<8x8xf32>
    %341 = math.exp %340 : vector<8x8xf32>
    %cst_123 = arith.constant dense<0.000000e+00> : vector<8xf32>
    %342 = vector.multi_reduction <add>, %341, %cst_123 [1] : vector<8x8xf32> to vector<8xf32>
    %343 = vector.shape_cast %342 : vector<8xf32> to vector<8x1xf32>
    %344 = tpu.reciprocal %343 {approx = true} : vector<8x1xf32> -> vector<8x1xf32>
    %345 = vector.broadcast %344 : vector<8x1xf32> to vector<8x8xf32>
    %346 = arith.mulf %341, %345 : vector<8x8xf32>
    %347 = arith.truncf %346 : vector<8x8xf32> to vector<8x8xbf16>
    %cst_124 = arith.constant dense<0.000000e+00> : vector<8x8xf32>
    %348 = tpu.matmul %347, %332, %cst_124 {dimension_numbers = #tpu.dot_dimension_numbers<[1], [0], [0], [1], [0, 0, 1, 1], [], []>} : vector<8x8xbf16>, vector<8x8xbf16>, vector<8x8xf32> -> vector<8x8xf32>
    %349 = arith.truncf %348 : vector<8x8xf32> to vector<8x8xbf16>
    %c0_125 = arith.constant 0 : index
    %c0_126 = arith.constant 0 : index
    %c0_127 = arith.constant 0 : index
    %350 = vector.load %arg15[%c0_125, %c0_126, %c0_127] : memref<4x8x32xbf16, #tpu.memory_space<vmem>>, vector<1x8x32xbf16>
    %351 = vector.shape_cast %350 : vector<1x8x32xbf16> to vector<8x32xbf16>
    %cst_128 = arith.constant dense<0.000000e+00> : vector<8x32xf32>
    %352 = tpu.matmul %349, %351, %cst_128 {dimension_numbers = #tpu.dot_dimension_numbers<[1], [0], [0], [1], [0, 0, 1, 1], [], []>} : vector<8x8xbf16>, vector<8x32xbf16>, vector<8x32xf32> -> vector<8x32xf32>
    %353 = arith.addf %326, %352 : vector<8x32xf32>
    %354 = vector.extract_strided_slice %325 {offsets = [0, 8], sizes = [8, 8], strides = [1, 1]} : vector<8x96xf32> to vector<8x8xf32>
    %355 = arith.truncf %354 : vector<8x8xf32> to vector<8x8xbf16>
    %356 = vector.extract_strided_slice %325 {offsets = [0, 40], sizes = [8, 8], strides = [1, 1]} : vector<8x96xf32> to vector<8x8xf32>
    %357 = arith.truncf %356 : vector<8x8xf32> to vector<8x8xbf16>
    %358 = vector.extract_strided_slice %325 {offsets = [0, 72], sizes = [8, 8], strides = [1, 1]} : vector<8x96xf32> to vector<8x8xf32>
    %359 = arith.truncf %358 : vector<8x8xf32> to vector<8x8xbf16>
    %cst_129 = arith.constant dense<0.000000e+00> : vector<8x8xf32>
    %360 = tpu.matmul %355, %357, %cst_129 {dimension_numbers = #tpu.dot_dimension_numbers<[1], [1], [0], [0], [0, 0, 1, 0], [], []>} : vector<8x8xbf16>, vector<8x8xbf16>, vector<8x8xf32> -> vector<8x8xf32>
    %cst_130 = arith.constant 0.176776692 : f32
    %361 = vector.broadcast %cst_130 : f32 to vector<8x8xf32>
    %362 = arith.mulf %360, %361 : vector<8x8xf32>
    %363 = arith.addf %362, %6 : vector<8x8xf32>
    %cst_131 = arith.constant dense<0xFF800000> : vector<8xf32>
    %364 = vector.multi_reduction <maximumf>, %363, %cst_131 [1] : vector<8x8xf32> to vector<8xf32>
    %365 = vector.shape_cast %364 : vector<8xf32> to vector<8x1xf32>
    %366 = vector.broadcast %365 : vector<8x1xf32> to vector<8x8xf32>
    %367 = arith.subf %363, %366 : vector<8x8xf32>
    %368 = math.exp %367 : vector<8x8xf32>
    %cst_132 = arith.constant dense<0.000000e+00> : vector<8xf32>
    %369 = vector.multi_reduction <add>, %368, %cst_132 [1] : vector<8x8xf32> to vector<8xf32>
    %370 = vector.shape_cast %369 : vector<8xf32> to vector<8x1xf32>
    %371 = tpu.reciprocal %370 {approx = true} : vector<8x1xf32> -> vector<8x1xf32>
    %372 = vector.broadcast %371 : vector<8x1xf32> to vector<8x8xf32>
    %373 = arith.mulf %368, %372 : vector<8x8xf32>
    %374 = arith.truncf %373 : vector<8x8xf32> to vector<8x8xbf16>
    %cst_133 = arith.constant dense<0.000000e+00> : vector<8x8xf32>
    %375 = tpu.matmul %374, %359, %cst_133 {dimension_numbers = #tpu.dot_dimension_numbers<[1], [0], [0], [1], [0, 0, 1, 1], [], []>} : vector<8x8xbf16>, vector<8x8xbf16>, vector<8x8xf32> -> vector<8x8xf32>
    %376 = arith.truncf %375 : vector<8x8xf32> to vector<8x8xbf16>
    %c1_134 = arith.constant 1 : index
    %c0_135 = arith.constant 0 : index
    %c0_136 = arith.constant 0 : index
    %377 = vector.load %arg15[%c1_134, %c0_135, %c0_136] : memref<4x8x32xbf16, #tpu.memory_space<vmem>>, vector<1x8x32xbf16>
    %378 = vector.shape_cast %377 : vector<1x8x32xbf16> to vector<8x32xbf16>
    %cst_137 = arith.constant dense<0.000000e+00> : vector<8x32xf32>
    %379 = tpu.matmul %376, %378, %cst_137 {dimension_numbers = #tpu.dot_dimension_numbers<[1], [0], [0], [1], [0, 0, 1, 1], [], []>} : vector<8x8xbf16>, vector<8x32xbf16>, vector<8x32xf32> -> vector<8x32xf32>
    %380 = arith.addf %353, %379 : vector<8x32xf32>
    %381 = vector.extract_strided_slice %325 {offsets = [0, 16], sizes = [8, 8], strides = [1, 1]} : vector<8x96xf32> to vector<8x8xf32>
    %382 = arith.truncf %381 : vector<8x8xf32> to vector<8x8xbf16>
    %383 = vector.extract_strided_slice %325 {offsets = [0, 48], sizes = [8, 8], strides = [1, 1]} : vector<8x96xf32> to vector<8x8xf32>
    %384 = arith.truncf %383 : vector<8x8xf32> to vector<8x8xbf16>
    %385 = vector.extract_strided_slice %325 {offsets = [0, 80], sizes = [8, 8], strides = [1, 1]} : vector<8x96xf32> to vector<8x8xf32>
    %386 = arith.truncf %385 : vector<8x8xf32> to vector<8x8xbf16>
    %cst_138 = arith.constant dense<0.000000e+00> : vector<8x8xf32>
    %387 = tpu.matmul %382, %384, %cst_138 {dimension_numbers = #tpu.dot_dimension_numbers<[1], [1], [0], [0], [0, 0, 1, 0], [], []>} : vector<8x8xbf16>, vector<8x8xbf16>, vector<8x8xf32> -> vector<8x8xf32>
    %cst_139 = arith.constant 0.176776692 : f32
    %388 = vector.broadcast %cst_139 : f32 to vector<8x8xf32>
    %389 = arith.mulf %387, %388 : vector<8x8xf32>
    %390 = arith.addf %389, %6 : vector<8x8xf32>
    %cst_140 = arith.constant dense<0xFF800000> : vector<8xf32>
    %391 = vector.multi_reduction <maximumf>, %390, %cst_140 [1] : vector<8x8xf32> to vector<8xf32>
    %392 = vector.shape_cast %391 : vector<8xf32> to vector<8x1xf32>
    %393 = vector.broadcast %392 : vector<8x1xf32> to vector<8x8xf32>
    %394 = arith.subf %390, %393 : vector<8x8xf32>
    %395 = math.exp %394 : vector<8x8xf32>
    %cst_141 = arith.constant dense<0.000000e+00> : vector<8xf32>
    %396 = vector.multi_reduction <add>, %395, %cst_141 [1] : vector<8x8xf32> to vector<8xf32>
    %397 = vector.shape_cast %396 : vector<8xf32> to vector<8x1xf32>
    %398 = tpu.reciprocal %397 {approx = true} : vector<8x1xf32> -> vector<8x1xf32>
    %399 = vector.broadcast %398 : vector<8x1xf32> to vector<8x8xf32>
    %400 = arith.mulf %395, %399 : vector<8x8xf32>
    %401 = arith.truncf %400 : vector<8x8xf32> to vector<8x8xbf16>
    %cst_142 = arith.constant dense<0.000000e+00> : vector<8x8xf32>
    %402 = tpu.matmul %401, %386, %cst_142 {dimension_numbers = #tpu.dot_dimension_numbers<[1], [0], [0], [1], [0, 0, 1, 1], [], []>} : vector<8x8xbf16>, vector<8x8xbf16>, vector<8x8xf32> -> vector<8x8xf32>
    %403 = arith.truncf %402 : vector<8x8xf32> to vector<8x8xbf16>
    %c2_143 = arith.constant 2 : index
    %c0_144 = arith.constant 0 : index
    %c0_145 = arith.constant 0 : index
    %404 = vector.load %arg15[%c2_143, %c0_144, %c0_145] : memref<4x8x32xbf16, #tpu.memory_space<vmem>>, vector<1x8x32xbf16>
    %405 = vector.shape_cast %404 : vector<1x8x32xbf16> to vector<8x32xbf16>
    %cst_146 = arith.constant dense<0.000000e+00> : vector<8x32xf32>
    %406 = tpu.matmul %403, %405, %cst_146 {dimension_numbers = #tpu.dot_dimension_numbers<[1], [0], [0], [1], [0, 0, 1, 1], [], []>} : vector<8x8xbf16>, vector<8x32xbf16>, vector<8x32xf32> -> vector<8x32xf32>
    %407 = arith.addf %380, %406 : vector<8x32xf32>
    %408 = vector.extract_strided_slice %325 {offsets = [0, 24], sizes = [8, 8], strides = [1, 1]} : vector<8x96xf32> to vector<8x8xf32>
    %409 = arith.truncf %408 : vector<8x8xf32> to vector<8x8xbf16>
    %410 = vector.extract_strided_slice %325 {offsets = [0, 56], sizes = [8, 8], strides = [1, 1]} : vector<8x96xf32> to vector<8x8xf32>
    %411 = arith.truncf %410 : vector<8x8xf32> to vector<8x8xbf16>
    %412 = vector.extract_strided_slice %325 {offsets = [0, 88], sizes = [8, 8], strides = [1, 1]} : vector<8x96xf32> to vector<8x8xf32>
    %413 = arith.truncf %412 : vector<8x8xf32> to vector<8x8xbf16>
    %cst_147 = arith.constant dense<0.000000e+00> : vector<8x8xf32>
    %414 = tpu.matmul %409, %411, %cst_147 {dimension_numbers = #tpu.dot_dimension_numbers<[1], [1], [0], [0], [0, 0, 1, 0], [], []>} : vector<8x8xbf16>, vector<8x8xbf16>, vector<8x8xf32> -> vector<8x8xf32>
    %cst_148 = arith.constant 0.176776692 : f32
    %415 = vector.broadcast %cst_148 : f32 to vector<8x8xf32>
    %416 = arith.mulf %414, %415 : vector<8x8xf32>
    %417 = arith.addf %416, %6 : vector<8x8xf32>
    %cst_149 = arith.constant dense<0xFF800000> : vector<8xf32>
    %418 = vector.multi_reduction <maximumf>, %417, %cst_149 [1] : vector<8x8xf32> to vector<8xf32>
    %419 = vector.shape_cast %418 : vector<8xf32> to vector<8x1xf32>
    %420 = vector.broadcast %419 : vector<8x1xf32> to vector<8x8xf32>
    %421 = arith.subf %417, %420 : vector<8x8xf32>
    %422 = math.exp %421 : vector<8x8xf32>
    %cst_150 = arith.constant dense<0.000000e+00> : vector<8xf32>
    %423 = vector.multi_reduction <add>, %422, %cst_150 [1] : vector<8x8xf32> to vector<8xf32>
    %424 = vector.shape_cast %423 : vector<8xf32> to vector<8x1xf32>
    %425 = tpu.reciprocal %424 {approx = true} : vector<8x1xf32> -> vector<8x1xf32>
    %426 = vector.broadcast %425 : vector<8x1xf32> to vector<8x8xf32>
    %427 = arith.mulf %422, %426 : vector<8x8xf32>
    %428 = arith.truncf %427 : vector<8x8xf32> to vector<8x8xbf16>
    %cst_151 = arith.constant dense<0.000000e+00> : vector<8x8xf32>
    %429 = tpu.matmul %428, %413, %cst_151 {dimension_numbers = #tpu.dot_dimension_numbers<[1], [0], [0], [1], [0, 0, 1, 1], [], []>} : vector<8x8xbf16>, vector<8x8xbf16>, vector<8x8xf32> -> vector<8x8xf32>
    %430 = arith.truncf %429 : vector<8x8xf32> to vector<8x8xbf16>
    %c3_152 = arith.constant 3 : index
    %c0_153 = arith.constant 0 : index
    %c0_154 = arith.constant 0 : index
    %431 = vector.load %arg15[%c3_152, %c0_153, %c0_154] : memref<4x8x32xbf16, #tpu.memory_space<vmem>>, vector<1x8x32xbf16>
    %432 = vector.shape_cast %431 : vector<1x8x32xbf16> to vector<8x32xbf16>
    %cst_155 = arith.constant dense<0.000000e+00> : vector<8x32xf32>
    %433 = tpu.matmul %430, %432, %cst_155 {dimension_numbers = #tpu.dot_dimension_numbers<[1], [0], [0], [1], [0, 0, 1, 1], [], []>} : vector<8x8xbf16>, vector<8x32xbf16>, vector<8x32xf32> -> vector<8x32xf32>
    %434 = arith.addf %407, %433 : vector<8x32xf32>
    %435 = vector.extract_strided_slice %324 {offsets = [8, 0], sizes = [8, 96], strides = [1, 1]} : vector<16x96xf32> to vector<8x96xf32>
    %cst_156 = arith.constant 0.000000e+00 : f32
    %436 = vector.broadcast %cst_156 : f32 to vector<8x32xf32>
    %437 = vector.extract_strided_slice %435 {offsets = [0, 0], sizes = [8, 8], strides = [1, 1]} : vector<8x96xf32> to vector<8x8xf32>
    %438 = arith.truncf %437 : vector<8x8xf32> to vector<8x8xbf16>
    %439 = vector.extract_strided_slice %435 {offsets = [0, 32], sizes = [8, 8], strides = [1, 1]} : vector<8x96xf32> to vector<8x8xf32>
    %440 = arith.truncf %439 : vector<8x8xf32> to vector<8x8xbf16>
    %441 = vector.extract_strided_slice %435 {offsets = [0, 64], sizes = [8, 8], strides = [1, 1]} : vector<8x96xf32> to vector<8x8xf32>
    %442 = arith.truncf %441 : vector<8x8xf32> to vector<8x8xbf16>
    %cst_157 = arith.constant dense<0.000000e+00> : vector<8x8xf32>
    %443 = tpu.matmul %438, %440, %cst_157 {dimension_numbers = #tpu.dot_dimension_numbers<[1], [1], [0], [0], [0, 0, 1, 0], [], []>} : vector<8x8xbf16>, vector<8x8xbf16>, vector<8x8xf32> -> vector<8x8xf32>
    %cst_158 = arith.constant 0.176776692 : f32
    %444 = vector.broadcast %cst_158 : f32 to vector<8x8xf32>
    %445 = arith.mulf %443, %444 : vector<8x8xf32>
    %446 = arith.addf %445, %6 : vector<8x8xf32>
    %cst_159 = arith.constant dense<0xFF800000> : vector<8xf32>
    %447 = vector.multi_reduction <maximumf>, %446, %cst_159 [1] : vector<8x8xf32> to vector<8xf32>
    %448 = vector.shape_cast %447 : vector<8xf32> to vector<8x1xf32>
    %449 = vector.broadcast %448 : vector<8x1xf32> to vector<8x8xf32>
    %450 = arith.subf %446, %449 : vector<8x8xf32>
    %451 = math.exp %450 : vector<8x8xf32>
    %cst_160 = arith.constant dense<0.000000e+00> : vector<8xf32>
    %452 = vector.multi_reduction <add>, %451, %cst_160 [1] : vector<8x8xf32> to vector<8xf32>
    %453 = vector.shape_cast %452 : vector<8xf32> to vector<8x1xf32>
    %454 = tpu.reciprocal %453 {approx = true} : vector<8x1xf32> -> vector<8x1xf32>
    %455 = vector.broadcast %454 : vector<8x1xf32> to vector<8x8xf32>
    %456 = arith.mulf %451, %455 : vector<8x8xf32>
    %457 = arith.truncf %456 : vector<8x8xf32> to vector<8x8xbf16>
    %cst_161 = arith.constant dense<0.000000e+00> : vector<8x8xf32>
    %458 = tpu.matmul %457, %442, %cst_161 {dimension_numbers = #tpu.dot_dimension_numbers<[1], [0], [0], [1], [0, 0, 1, 1], [], []>} : vector<8x8xbf16>, vector<8x8xbf16>, vector<8x8xf32> -> vector<8x8xf32>
    %459 = arith.truncf %458 : vector<8x8xf32> to vector<8x8xbf16>
    %c0_162 = arith.constant 0 : index
    %c0_163 = arith.constant 0 : index
    %c0_164 = arith.constant 0 : index
    %460 = vector.load %arg15[%c0_162, %c0_163, %c0_164] : memref<4x8x32xbf16, #tpu.memory_space<vmem>>, vector<1x8x32xbf16>
    %461 = vector.shape_cast %460 : vector<1x8x32xbf16> to vector<8x32xbf16>
    %cst_165 = arith.constant dense<0.000000e+00> : vector<8x32xf32>
    %462 = tpu.matmul %459, %461, %cst_165 {dimension_numbers = #tpu.dot_dimension_numbers<[1], [0], [0], [1], [0, 0, 1, 1], [], []>} : vector<8x8xbf16>, vector<8x32xbf16>, vector<8x32xf32> -> vector<8x32xf32>
    %463 = arith.addf %436, %462 : vector<8x32xf32>
    %464 = vector.extract_strided_slice %435 {offsets = [0, 8], sizes = [8, 8], strides = [1, 1]} : vector<8x96xf32> to vector<8x8xf32>
    %465 = arith.truncf %464 : vector<8x8xf32> to vector<8x8xbf16>
    %466 = vector.extract_strided_slice %435 {offsets = [0, 40], sizes = [8, 8], strides = [1, 1]} : vector<8x96xf32> to vector<8x8xf32>
    %467 = arith.truncf %466 : vector<8x8xf32> to vector<8x8xbf16>
    %468 = vector.extract_strided_slice %435 {offsets = [0, 72], sizes = [8, 8], strides = [1, 1]} : vector<8x96xf32> to vector<8x8xf32>
    %469 = arith.truncf %468 : vector<8x8xf32> to vector<8x8xbf16>
    %cst_166 = arith.constant dense<0.000000e+00> : vector<8x8xf32>
    %470 = tpu.matmul %465, %467, %cst_166 {dimension_numbers = #tpu.dot_dimension_numbers<[1], [1], [0], [0], [0, 0, 1, 0], [], []>} : vector<8x8xbf16>, vector<8x8xbf16>, vector<8x8xf32> -> vector<8x8xf32>
    %cst_167 = arith.constant 0.176776692 : f32
    %471 = vector.broadcast %cst_167 : f32 to vector<8x8xf32>
    %472 = arith.mulf %470, %471 : vector<8x8xf32>
    %473 = arith.addf %472, %6 : vector<8x8xf32>
    %cst_168 = arith.constant dense<0xFF800000> : vector<8xf32>
    %474 = vector.multi_reduction <maximumf>, %473, %cst_168 [1] : vector<8x8xf32> to vector<8xf32>
    %475 = vector.shape_cast %474 : vector<8xf32> to vector<8x1xf32>
    %476 = vector.broadcast %475 : vector<8x1xf32> to vector<8x8xf32>
    %477 = arith.subf %473, %476 : vector<8x8xf32>
    %478 = math.exp %477 : vector<8x8xf32>
    %cst_169 = arith.constant dense<0.000000e+00> : vector<8xf32>
    %479 = vector.multi_reduction <add>, %478, %cst_169 [1] : vector<8x8xf32> to vector<8xf32>
    %480 = vector.shape_cast %479 : vector<8xf32> to vector<8x1xf32>
    %481 = tpu.reciprocal %480 {approx = true} : vector<8x1xf32> -> vector<8x1xf32>
    %482 = vector.broadcast %481 : vector<8x1xf32> to vector<8x8xf32>
    %483 = arith.mulf %478, %482 : vector<8x8xf32>
    %484 = arith.truncf %483 : vector<8x8xf32> to vector<8x8xbf16>
    %cst_170 = arith.constant dense<0.000000e+00> : vector<8x8xf32>
    %485 = tpu.matmul %484, %469, %cst_170 {dimension_numbers = #tpu.dot_dimension_numbers<[1], [0], [0], [1], [0, 0, 1, 1], [], []>} : vector<8x8xbf16>, vector<8x8xbf16>, vector<8x8xf32> -> vector<8x8xf32>
    %486 = arith.truncf %485 : vector<8x8xf32> to vector<8x8xbf16>
    %c1_171 = arith.constant 1 : index
    %c0_172 = arith.constant 0 : index
    %c0_173 = arith.constant 0 : index
    %487 = vector.load %arg15[%c1_171, %c0_172, %c0_173] : memref<4x8x32xbf16, #tpu.memory_space<vmem>>, vector<1x8x32xbf16>
    %488 = vector.shape_cast %487 : vector<1x8x32xbf16> to vector<8x32xbf16>
    %cst_174 = arith.constant dense<0.000000e+00> : vector<8x32xf32>
    %489 = tpu.matmul %486, %488, %cst_174 {dimension_numbers = #tpu.dot_dimension_numbers<[1], [0], [0], [1], [0, 0, 1, 1], [], []>} : vector<8x8xbf16>, vector<8x32xbf16>, vector<8x32xf32> -> vector<8x32xf32>
    %490 = arith.addf %463, %489 : vector<8x32xf32>
    %491 = vector.extract_strided_slice %435 {offsets = [0, 16], sizes = [8, 8], strides = [1, 1]} : vector<8x96xf32> to vector<8x8xf32>
    %492 = arith.truncf %491 : vector<8x8xf32> to vector<8x8xbf16>
    %493 = vector.extract_strided_slice %435 {offsets = [0, 48], sizes = [8, 8], strides = [1, 1]} : vector<8x96xf32> to vector<8x8xf32>
    %494 = arith.truncf %493 : vector<8x8xf32> to vector<8x8xbf16>
    %495 = vector.extract_strided_slice %435 {offsets = [0, 80], sizes = [8, 8], strides = [1, 1]} : vector<8x96xf32> to vector<8x8xf32>
    %496 = arith.truncf %495 : vector<8x8xf32> to vector<8x8xbf16>
    %cst_175 = arith.constant dense<0.000000e+00> : vector<8x8xf32>
    %497 = tpu.matmul %492, %494, %cst_175 {dimension_numbers = #tpu.dot_dimension_numbers<[1], [1], [0], [0], [0, 0, 1, 0], [], []>} : vector<8x8xbf16>, vector<8x8xbf16>, vector<8x8xf32> -> vector<8x8xf32>
    %cst_176 = arith.constant 0.176776692 : f32
    %498 = vector.broadcast %cst_176 : f32 to vector<8x8xf32>
    %499 = arith.mulf %497, %498 : vector<8x8xf32>
    %500 = arith.addf %499, %6 : vector<8x8xf32>
    %cst_177 = arith.constant dense<0xFF800000> : vector<8xf32>
    %501 = vector.multi_reduction <maximumf>, %500, %cst_177 [1] : vector<8x8xf32> to vector<8xf32>
    %502 = vector.shape_cast %501 : vector<8xf32> to vector<8x1xf32>
    %503 = vector.broadcast %502 : vector<8x1xf32> to vector<8x8xf32>
    %504 = arith.subf %500, %503 : vector<8x8xf32>
    %505 = math.exp %504 : vector<8x8xf32>
    %cst_178 = arith.constant dense<0.000000e+00> : vector<8xf32>
    %506 = vector.multi_reduction <add>, %505, %cst_178 [1] : vector<8x8xf32> to vector<8xf32>
    %507 = vector.shape_cast %506 : vector<8xf32> to vector<8x1xf32>
    %508 = tpu.reciprocal %507 {approx = true} : vector<8x1xf32> -> vector<8x1xf32>
    %509 = vector.broadcast %508 : vector<8x1xf32> to vector<8x8xf32>
    %510 = arith.mulf %505, %509 : vector<8x8xf32>
    %511 = arith.truncf %510 : vector<8x8xf32> to vector<8x8xbf16>
    %cst_179 = arith.constant dense<0.000000e+00> : vector<8x8xf32>
    %512 = tpu.matmul %511, %496, %cst_179 {dimension_numbers = #tpu.dot_dimension_numbers<[1], [0], [0], [1], [0, 0, 1, 1], [], []>} : vector<8x8xbf16>, vector<8x8xbf16>, vector<8x8xf32> -> vector<8x8xf32>
    %513 = arith.truncf %512 : vector<8x8xf32> to vector<8x8xbf16>
    %c2_180 = arith.constant 2 : index
    %c0_181 = arith.constant 0 : index
    %c0_182 = arith.constant 0 : index
    %514 = vector.load %arg15[%c2_180, %c0_181, %c0_182] : memref<4x8x32xbf16, #tpu.memory_space<vmem>>, vector<1x8x32xbf16>
    %515 = vector.shape_cast %514 : vector<1x8x32xbf16> to vector<8x32xbf16>
    %cst_183 = arith.constant dense<0.000000e+00> : vector<8x32xf32>
    %516 = tpu.matmul %513, %515, %cst_183 {dimension_numbers = #tpu.dot_dimension_numbers<[1], [0], [0], [1], [0, 0, 1, 1], [], []>} : vector<8x8xbf16>, vector<8x32xbf16>, vector<8x32xf32> -> vector<8x32xf32>
    %517 = arith.addf %490, %516 : vector<8x32xf32>
    %518 = vector.extract_strided_slice %435 {offsets = [0, 24], sizes = [8, 8], strides = [1, 1]} : vector<8x96xf32> to vector<8x8xf32>
    %519 = arith.truncf %518 : vector<8x8xf32> to vector<8x8xbf16>
    %520 = vector.extract_strided_slice %435 {offsets = [0, 56], sizes = [8, 8], strides = [1, 1]} : vector<8x96xf32> to vector<8x8xf32>
    %521 = arith.truncf %520 : vector<8x8xf32> to vector<8x8xbf16>
    %522 = vector.extract_strided_slice %435 {offsets = [0, 88], sizes = [8, 8], strides = [1, 1]} : vector<8x96xf32> to vector<8x8xf32>
    %523 = arith.truncf %522 : vector<8x8xf32> to vector<8x8xbf16>
    %cst_184 = arith.constant dense<0.000000e+00> : vector<8x8xf32>
    %524 = tpu.matmul %519, %521, %cst_184 {dimension_numbers = #tpu.dot_dimension_numbers<[1], [1], [0], [0], [0, 0, 1, 0], [], []>} : vector<8x8xbf16>, vector<8x8xbf16>, vector<8x8xf32> -> vector<8x8xf32>
    %cst_185 = arith.constant 0.176776692 : f32
    %525 = vector.broadcast %cst_185 : f32 to vector<8x8xf32>
    %526 = arith.mulf %524, %525 : vector<8x8xf32>
    %527 = arith.addf %526, %6 : vector<8x8xf32>
    %cst_186 = arith.constant dense<0xFF800000> : vector<8xf32>
    %528 = vector.multi_reduction <maximumf>, %527, %cst_186 [1] : vector<8x8xf32> to vector<8xf32>
    %529 = vector.shape_cast %528 : vector<8xf32> to vector<8x1xf32>
    %530 = vector.broadcast %529 : vector<8x1xf32> to vector<8x8xf32>
    %531 = arith.subf %527, %530 : vector<8x8xf32>
    %532 = math.exp %531 : vector<8x8xf32>
    %cst_187 = arith.constant dense<0.000000e+00> : vector<8xf32>
    %533 = vector.multi_reduction <add>, %532, %cst_187 [1] : vector<8x8xf32> to vector<8xf32>
    %534 = vector.shape_cast %533 : vector<8xf32> to vector<8x1xf32>
    %535 = tpu.reciprocal %534 {approx = true} : vector<8x1xf32> -> vector<8x1xf32>
    %536 = vector.broadcast %535 : vector<8x1xf32> to vector<8x8xf32>
    %537 = arith.mulf %532, %536 : vector<8x8xf32>
    %538 = arith.truncf %537 : vector<8x8xf32> to vector<8x8xbf16>
    %cst_188 = arith.constant dense<0.000000e+00> : vector<8x8xf32>
    %539 = tpu.matmul %538, %523, %cst_188 {dimension_numbers = #tpu.dot_dimension_numbers<[1], [0], [0], [1], [0, 0, 1, 1], [], []>} : vector<8x8xbf16>, vector<8x8xbf16>, vector<8x8xf32> -> vector<8x8xf32>
    %540 = arith.truncf %539 : vector<8x8xf32> to vector<8x8xbf16>
    %c3_189 = arith.constant 3 : index
    %c0_190 = arith.constant 0 : index
    %c0_191 = arith.constant 0 : index
    %541 = vector.load %arg15[%c3_189, %c0_190, %c0_191] : memref<4x8x32xbf16, #tpu.memory_space<vmem>>, vector<1x8x32xbf16>
    %542 = vector.shape_cast %541 : vector<1x8x32xbf16> to vector<8x32xbf16>
    %cst_192 = arith.constant dense<0.000000e+00> : vector<8x32xf32>
    %543 = tpu.matmul %540, %542, %cst_192 {dimension_numbers = #tpu.dot_dimension_numbers<[1], [0], [0], [1], [0, 0, 1, 1], [], []>} : vector<8x8xbf16>, vector<8x32xbf16>, vector<8x32xf32> -> vector<8x32xf32>
    %544 = arith.addf %517, %543 : vector<8x32xf32>
    %545 = tpu.concatenate %434, %544 in 0 : vector<8x32xf32>, vector<8x32xf32> -> vector<16x32xf32>
    %546 = arith.addf %297, %545 : vector<16x32xf32>
    %c0_193 = arith.constant 0 : index
    %c0_194 = arith.constant 0 : index
    %547 = vector.load %arg16[%c0_193, %c0_194] : memref<1x32xf32, #tpu.memory_space<vmem>>, vector<1x32xf32>
    %548 = vector.broadcast %547 : vector<1x32xf32> to vector<16x32xf32>
    %549 = arith.addf %546, %548 : vector<16x32xf32>
    %c0_195 = arith.constant 0 : index
    %c0_196 = arith.constant 0 : index
    %550 = vector.load %arg17[%c0_195, %c0_196] : memref<1x32xf32, #tpu.memory_space<vmem>>, vector<1x32xf32>
    %c0_197 = arith.constant 0 : index
    %c0_198 = arith.constant 0 : index
    %551 = vector.load %arg18[%c0_197, %c0_198] : memref<1x32xf32, #tpu.memory_space<vmem>>, vector<1x32xf32>
    %cst_199 = arith.constant dense<0.000000e+00> : vector<16xf32>
    %552 = vector.multi_reduction <add>, %549, %cst_199 [1] : vector<16x32xf32> to vector<16xf32>
    %553 = vector.shape_cast %552 : vector<16xf32> to vector<16x1xf32>
    %cst_200 = arith.constant 3.200000e+01 : f32
    %554 = vector.broadcast %cst_200 : f32 to vector<16x1xf32>
    %555 = arith.divf %553, %554 : vector<16x1xf32>
    %556 = vector.broadcast %555 : vector<16x1xf32> to vector<16x32xf32>
    %557 = arith.subf %549, %556 : vector<16x32xf32>
    %558 = arith.mulf %557, %557 : vector<16x32xf32>
    %cst_201 = arith.constant dense<0.000000e+00> : vector<16xf32>
    %559 = vector.multi_reduction <add>, %558, %cst_201 [1] : vector<16x32xf32> to vector<16xf32>
    %560 = vector.shape_cast %559 : vector<16xf32> to vector<16x1xf32>
    %cst_202 = arith.constant 3.200000e+01 : f32
    %561 = vector.broadcast %cst_202 : f32 to vector<16x1xf32>
    %562 = arith.divf %560, %561 : vector<16x1xf32>
    %563 = vector.broadcast %555 : vector<16x1xf32> to vector<16x32xf32>
    %564 = arith.subf %549, %563 : vector<16x32xf32>
    %cst_203 = arith.constant 9.99999974E-6 : f32
    %565 = vector.broadcast %cst_203 : f32 to vector<16x1xf32>
    %566 = arith.addf %562, %565 : vector<16x1xf32>
    %567 = math.rsqrt %566 : vector<16x1xf32>
    %568 = vector.broadcast %567 : vector<16x1xf32> to vector<16x32xf32>
    %569 = arith.mulf %564, %568 : vector<16x32xf32>
    %570 = vector.broadcast %550 : vector<1x32xf32> to vector<16x32xf32>
    %571 = arith.mulf %569, %570 : vector<16x32xf32>
    %572 = vector.broadcast %551 : vector<1x32xf32> to vector<16x32xf32>
    %573 = arith.addf %571, %572 : vector<16x32xf32>
    %574 = arith.truncf %573 : vector<16x32xf32> to vector<16x32xbf16>
    %c0_204 = arith.constant 0 : index
    %c0_205 = arith.constant 0 : index
    %575 = vector.load %arg19[%c0_204, %c0_205] : memref<32x128xbf16, #tpu.memory_space<vmem>>, vector<32x128xbf16>
    %cst_206 = arith.constant dense<0.000000e+00> : vector<16x128xf32>
    %576 = tpu.matmul %574, %575, %cst_206 {dimension_numbers = #tpu.dot_dimension_numbers<[1], [0], [0], [1], [0, 0, 1, 1], [], []>} : vector<16x32xbf16>, vector<32x128xbf16>, vector<16x128xf32> -> vector<16x128xf32>
    %c0_207 = arith.constant 0 : index
    %c0_208 = arith.constant 0 : index
    %577 = vector.load %arg20[%c0_207, %c0_208] : memref<1x128xf32, #tpu.memory_space<vmem>>, vector<1x128xf32>
    %578 = vector.broadcast %577 : vector<1x128xf32> to vector<16x128xf32>
    %579 = arith.addf %576, %578 : vector<16x128xf32>
    %cst_209 = arith.constant 0.000000e+00 : f32
    %580 = vector.broadcast %cst_209 : f32 to vector<16x128xf32>
    %581 = arith.maximumf %579, %580 : vector<16x128xf32>
    %582 = arith.truncf %581 : vector<16x128xf32> to vector<16x128xbf16>
    %c0_210 = arith.constant 0 : index
    %c0_211 = arith.constant 0 : index
    %583 = vector.load %arg21[%c0_210, %c0_211] : memref<128x32xbf16, #tpu.memory_space<vmem>>, vector<128x32xbf16>
    %cst_212 = arith.constant dense<0.000000e+00> : vector<16x32xf32>
    %584 = tpu.matmul %582, %583, %cst_212 {dimension_numbers = #tpu.dot_dimension_numbers<[1], [0], [0], [1], [0, 0, 1, 1], [], []>} : vector<16x128xbf16>, vector<128x32xbf16>, vector<16x32xf32> -> vector<16x32xf32>
    %585 = arith.addf %549, %584 : vector<16x32xf32>
    %c0_213 = arith.constant 0 : index
    %c0_214 = arith.constant 0 : index
    %586 = vector.load %arg22[%c0_213, %c0_214] : memref<1x32xf32, #tpu.memory_space<vmem>>, vector<1x32xf32>
    %587 = vector.broadcast %586 : vector<1x32xf32> to vector<16x32xf32>
    %588 = arith.addf %585, %587 : vector<16x32xf32>
    %c0_215 = arith.constant 0 : index
    %c0_216 = arith.constant 0 : index
    %589 = vector.load %arg23[%c0_215, %c0_216] : memref<1x32xf32, #tpu.memory_space<vmem>>, vector<1x32xf32>
    %c0_217 = arith.constant 0 : index
    %c0_218 = arith.constant 0 : index
    %590 = vector.load %arg24[%c0_217, %c0_218] : memref<1x32xf32, #tpu.memory_space<vmem>>, vector<1x32xf32>
    %cst_219 = arith.constant dense<0.000000e+00> : vector<16xf32>
    %591 = vector.multi_reduction <add>, %588, %cst_219 [1] : vector<16x32xf32> to vector<16xf32>
    %592 = vector.shape_cast %591 : vector<16xf32> to vector<16x1xf32>
    %cst_220 = arith.constant 3.200000e+01 : f32
    %593 = vector.broadcast %cst_220 : f32 to vector<16x1xf32>
    %594 = arith.divf %592, %593 : vector<16x1xf32>
    %595 = vector.broadcast %594 : vector<16x1xf32> to vector<16x32xf32>
    %596 = arith.subf %588, %595 : vector<16x32xf32>
    %597 = arith.mulf %596, %596 : vector<16x32xf32>
    %cst_221 = arith.constant dense<0.000000e+00> : vector<16xf32>
    %598 = vector.multi_reduction <add>, %597, %cst_221 [1] : vector<16x32xf32> to vector<16xf32>
    %599 = vector.shape_cast %598 : vector<16xf32> to vector<16x1xf32>
    %cst_222 = arith.constant 3.200000e+01 : f32
    %600 = vector.broadcast %cst_222 : f32 to vector<16x1xf32>
    %601 = arith.divf %599, %600 : vector<16x1xf32>
    %602 = vector.broadcast %594 : vector<16x1xf32> to vector<16x32xf32>
    %603 = arith.subf %588, %602 : vector<16x32xf32>
    %cst_223 = arith.constant 9.99999974E-6 : f32
    %604 = vector.broadcast %cst_223 : f32 to vector<16x1xf32>
    %605 = arith.addf %601, %604 : vector<16x1xf32>
    %606 = math.rsqrt %605 : vector<16x1xf32>
    %607 = vector.broadcast %606 : vector<16x1xf32> to vector<16x32xf32>
    %608 = arith.mulf %603, %607 : vector<16x32xf32>
    %609 = vector.broadcast %589 : vector<1x32xf32> to vector<16x32xf32>
    %610 = arith.mulf %608, %609 : vector<16x32xf32>
    %611 = vector.broadcast %590 : vector<1x32xf32> to vector<16x32xf32>
    %612 = arith.addf %610, %611 : vector<16x32xf32>
    %613 = arith.truncf %612 : vector<16x32xf32> to vector<16x32xbf16>
    %c0_224 = arith.constant 0 : index
    %c0_225 = arith.constant 0 : index
    %614 = vector.load %arg25[%c0_224, %c0_225] : memref<32x128xbf16, #tpu.memory_space<vmem>>, vector<32x128xbf16>
    %cst_226 = arith.constant dense<0.000000e+00> : vector<16x128xf32>
    %615 = tpu.matmul %613, %614, %cst_226 {dimension_numbers = #tpu.dot_dimension_numbers<[1], [0], [0], [1], [0, 0, 1, 1], [], []>} : vector<16x32xbf16>, vector<32x128xbf16>, vector<16x128xf32> -> vector<16x128xf32>
    %c0_227 = arith.constant 0 : index
    %c0_228 = arith.constant 0 : index
    %616 = vector.load %arg26[%c0_227, %c0_228] : memref<1x128xf32, #tpu.memory_space<vmem>>, vector<1x128xf32>
    %617 = vector.broadcast %616 : vector<1x128xf32> to vector<16x128xf32>
    %618 = arith.addf %615, %617 : vector<16x128xf32>
    %c0_229 = arith.constant 0 : index
    %c0_230 = arith.constant 0 : index
    %619 = vector.load %arg27[%c0_229, %c0_230] : memref<16x128xf32, #tpu.memory_space<vmem>>, vector<16x128xf32>
    tpu.vector_store %arg27[%c0_229, %c0_230], %618 {strides = array<i32>} : memref<16x128xf32, #tpu.memory_space<vmem>>, vector<16x128xf32>,
    return
  }
}

</mosaic_0001>

<bundles_post_ra>
// kernel: gpt_forward.1
= control target key start
LH: loop header
LB: loop body
LE: loop exit
PB: predicated region body
PF: predicated region fallthrough
CT: control target
= control target key end

     0   :  { %vm97_vm0 = vcmask 261120   ;;  %v4176_v14 = vmov 0.0   ;;  %vm4177_vm1 = vmmov 0   ;;  %s4180_s30 = smov 120   ;;  %vm206_vm2 = vcmask 64512   ;;  %s5090_s28 = smov 112   ;;  %s5049_s0 = inlined_call_operand.vmem [shape: f32[16,32], index: 0, kind: input, shape index: {}]   ;;  %s5050_s3 = inlined_call_operand.vmem [shape: bf16[32,96], index: 3, kind: input, shape index: {}]   ;;  %s5051_s1 = inlined_call_operand.vmem [shape: f32[1,32], index: 1, kind: input, shape index: {}]   ;;  %s5052_s2 = inlined_call_operand.vmem [shape: f32[1,32], index: 2, kind: input, shape index: {}]   ;;  %s5053_s4 = inlined_call_operand.vmem [shape: bf16[4,8,32], index: 4, kind: input, shape index: {}]   ;;  %s5054_s5 = inlined_call_operand.vmem [shape: f32[1,32], index: 5, kind: input, shape index: {}]   ;;  %s5055_s8 = inlined_call_operand.vmem [shape: bf16[32,128], index: 8, kind: input, shape index: {}]   ;;  %s5056_s10 = inlined_call_operand.vmem [shape: bf16[128,32], index: 10, kind: input, shape index: {}]   ;;  %s5057_s6 = inlined_call_operand.vmem [shape: f32[1,32], index: 6, kind: input, shape index: {}]   ;;  %s5058_s7 = inlined_call_operand.vmem [shape: f32[1,32], index: 7, kind: input, shape index: {}]   ;;  %s5059_s9 = inlined_call_operand.vmem [shape: f32[1,128], index: 9, kind: input, shape index: {}]   ;;  %s5060_s11 = inlined_call_operand.vmem [shape: f32[1,32], index: 11, kind: input, shape index: {}]   ;;  %s5061_s14 = inlined_call_operand.vmem [shape: bf16[32,96], index: 14, kind: input, shape index: {}]   ;;  %s5062_s12 = inlined_call_operand.vmem [shape: f32[1,32], index: 12, kind: input, shape index: {}]   ;;  %s5063_s13 = inlined_call_operand.vmem [shape: f32[1,32], index: 13, kind: input, shape index: {}]   ;;  %s5064_s15 = inlined_call_operand.vmem [shape: bf16[4,8,32], index: 15, kind: input, shape index: {}]   ;;  %s5065_s16 = inlined_call_operand.vmem [shape: f32[1,32], index: 16, kind: input, shape index: {}]   ;;  %s5066_s19 = inlined_call_operand.vmem [shape: bf16[32,128], index: 19, kind: input, shape index: {}]   ;;  %s5067_s21 = inlined_call_operand.vmem [shape: bf16[128,32], index: 21, kind: input, shape index: {}]   ;;  %s5068_s17 = inlined_call_operand.vmem [shape: f32[1,32], index: 17, kind: input, shape index: {}]   ;;  %s5069_s18 = inlined_call_operand.vmem [shape: f32[1,32], index: 18, kind: input, shape index: {}]   ;;  %s5070_s20 = inlined_call_operand.vmem [shape: f32[1,128], index: 20, kind: input, shape index: {}]   ;;  %s5071_s22 = inlined_call_operand.vmem [shape: f32[1,32], index: 22, kind: input, shape index: {}]   ;;  %s5072_s25 = inlined_call_operand.vmem [shape: bf16[32,128], index: 25, kind: input, shape index: {}]   ;;  %s5073_s23 = inlined_call_operand.vmem [shape: f32[1,32], index: 23, kind: input, shape index: {}]   ;;  %s5074_s24 = inlined_call_operand.vmem [shape: f32[1,32], index: 24, kind: input, shape index: {}]   ;;  %s5075_s26 = inlined_call_operand.vmem [shape: f32[1,128], index: 26, kind: input, shape index: {}]   ;;  %s5076_s27 = inlined_call_operand.vmem [shape: f32[16,128], index: 27, kind: output, shape index: {}]  }
   0x1   :  { %5094 = sst [smem:[#allocation2_spill]] %s5049_s0  ;;  %3684 = vmatprep.subr.bf16.mxu1 %v4176_v14  ;;  %3688 = vmatprep.mubr.msk.bf16.mxu1 %vm4177_vm1, %v4176_v14  ;;  %v89_v44 = vlaneseq  ;;  %v4181_v48 = vmov -1e+30   ;;  %vm272_vm4 = vcmask 1043456  }
   0x2   :  { %5095 = sst [smem:[#allocation3_spill]] %s5050_s3  ;;  %3698 = vmatprep.subr.bf16.mxu0 %v4176_v14  ;;  %3700 = vmatprep.mubr.msk.bf16.mxu0 %vm4177_vm1, %v4176_v14  ;;  %s5084_s3 = smov 104  }
   0x3   :  { %5096 = sst [smem:[#allocation4_spill]] %s5051_s1  ;;  %v90_v45 = vshrl.u32 %v89_v44, 7  ;;  %v92_v46 = vand.u32 127, %v89_v44  ;;  %s5086_s1 = smov 72  }
   0x4   :  { %5097 = sst [smem:[#allocation5_spill]] %s5052_s2 }
   0x5   :  { %5098 = sst [smem:[#allocation6_spill]] %s5053_s4  ;;  %s4178_s4 = smov 88   ;;  %vm93_vm3 = vcmp.le.s32.totalorder %v92_v46, %v90_v45 }
   0x6   :  { %5099 = sst [smem:[#allocation7_spill]] %s5054_s5  ;;  %v4392_v49 = vsel %vm93_vm3, 0.0, %v4181_v48  ;;  %s5092_s5 = smov 80  }
   0x7   :  { %5100 = sst [smem:[#allocation8_spill]] %s5055_s8  ;;  %s5082_s8 = smov 40  }
   0x8   :  { %5101 = sst [smem:[#allocation9_spill]] %s5056_s10 }
   0x9   :  { %5102 = sst [smem:[#allocation10_spill]] %s5057_s6 }
   0xa   :  { %5103 = sst [smem:[#allocation11_spill]] %s5058_s7  ;;  %s4182_s7 = smov 64  }
   0xb   :  { %5104 = sst [smem:[#allocation12_spill]] %s5059_s9 }
   0xc   :  { %5105 = sst [smem:[#allocation13_spill]] %s5060_s11 }
   0xd   :  { %s5106_s6 = sld [smem:[#allocation2_spill]] }
   0xe   :  { %s5107_s0 = sld [smem:[#allocation3_spill]] }
   0xf   :  { %s5108_s11 = sld [smem:[#allocation4_spill]] }
  0x10   :  { %s5109_s10 = sld [smem:[#allocation5_spill]] }
  0x11   :  { %s5110_s2 = sld [smem:[#allocation6_spill]] }
  0x12   :  { %s5112_s29 = sld [smem:[#allocation8_spill]] }
  0x13   :  { %v4333_v0 = vld [vmem:[%s5106_s6] sm:$0xff]  ;;  %v4338_v1 = vld [vmem:[%s5106_s6 + $0x8] sm:$0xff]  ;;  %s4179_s6 = smov 96  }
  0x14   :  { %v98_v2 = vsel %vm97_vm0, %v4333_v0, 0.0  ;;  %v101_v3 = vsel %vm97_vm0, %v4338_v1, 0.0  ;;  %v4066_v15 = vld [vmem:[%s5107_s0 + $0x8] sm:$0xff]   ;;  %v4067_v16 = vld [vmem:[%s5107_s0] sm:$0xff]   ;;  %s4185_s0 = smov 56  }
  0x15   :  { %99 = vadd.xlane.f32.xlu0 %v98_v2  ;;  %3685 = vmatpush3.bf16.msra.mxu1 %v4066_v15  ;;  %v3453_v25 = vld [vmem:[%s5108_s11] ss:$0 sm:$0xff]  ;;  %s5111_s11 = sld [smem:[#allocation7_spill]] }
  0x16   :  { %3686 = vmatprep.subr.bf16.mxu1 %v4176_v14  ;;  %v3454_v29 = vld [vmem:[%s5109_s10] ss:$0 sm:$0xff]  ;;  %s5088_s10 = smov 48  }
  0x19   :  { %102 = vadd.xlane.f32.xlu0 %v101_v3  ;;  %3687 = vmatpush3.bf16.msra.mxu1 %v4067_v16 }
  0x1a   :  { %3692 = vmatprep.subr.bf16.mxu1 %v4176_v14 }
  0x9e   :  { %v100_v4 = vpop.xlane.xlu0 %99 }
  0x9f   :  { %v105_v5 = vmul.f32 0.03125, %v100_v4 }
  0xa1   :  { %v107_v6 = vsub.f32 %v4333_v0, %v105_v5 }
  0xa2   :  { %v103_v7 = vpop.xlane.xlu0 %102 }
  0xa3   :  { %v106_v8 = vmul.f32 0.03125, %v103_v7  ;;  %v109_v9 = vmul.f32 %v107_v6, %v107_v6 }
  0xa5   :  { %v108_v10 = vsub.f32 %v4338_v1, %v106_v8  ;;  %v111_v11 = vsel %vm97_vm0, %v109_v9, 0.0 }
  0xa6   :  { %112 = vadd.xlane.f32.xlu1 %v111_v11 }
  0xa7   :  { %v110_v12 = vmul.f32 %v108_v10, %v108_v10 }
  0xa9   :  { %v114_v13 = vsel %vm97_vm0, %v110_v12, 0.0 }
  0xaa   :  { %115 = vadd.xlane.f32.xlu1 %v114_v13 }
 0x12f   :  { %v113_v17 = vpop.xlane.xlu1 %112 }
 0x130   :  { %v117_v18 = vmul.f32 0.03125, %v113_v17 }
 0x132   :  { %v119_v19 = vadd.f32 1e-05, %v117_v18 }
 0x133   :  { %v116_v20 = vpop.xlane.xlu1 %115 }
 0x134   :  { %4092 = vrsqrt.f32 %v119_v19  ;;  %v118_v21 = vmul.f32 0.03125, %v116_v20 }
 0x136   :  { %v120_v22 = vadd.f32 1e-05, %v118_v21 }
 0x138   :  { %4094 = vrsqrt.f32 %v120_v22 }
 0x141   :  { %v4093_v23 = vpop.eup %4092 }
 0x142   :  { %v123_v24 = vmul.f32 %v4093_v23, %v107_v6 }
 0x144   :  { %v131_v28 = vmul.f32 %v3453_v25, %v123_v24  ;;  %v317_v24 = vld [vmem:[%s5110_s2] sm:$0xf] }
 0x145   :  { %v4095_v26 = vpop.eup %4094 }
 0x146   :  { %v124_v27 = vmul.f32 %v4095_v26, %v108_v10  ;;  %v139_v31 = vadd.f32 %v3454_v29, %v131_v28  ;;  %v3462_v26 = vld [vmem:[%s5110_s2 + $0x4] sm:$0xf] }
 0x148   :  { %v132_v30 = vmul.f32 %v3453_v25, %v124_v27  ;;  %v4422_v25 = vsel %vm272_vm4, %v317_v24, 0  ;;  %v4430_v27 = vsel %vm272_vm4, %v3462_v26, 0 }
 0x14a   :  { %v140_v32 = vadd.f32 %v3454_v29, %v132_v30 }
 0x14c   :  { %v141_v33 = vpack.c.bf16 %v140_v32, %v139_v31 }
 0x14e   :  { %3689 = vmatmul.mubr.msk.bf16.vlgmr.msra.gmra.mxu1 %vm97_vm0, %v141_v33 }
 0x14f   :  { %3694 = vmatprep.mubr.msk.bf16.mxu1 %vm4177_vm1, %v4176_v14 }
 0x20e   :  { %v195_v34 = vpop.f32.mrf.mxu1 }
 0x20f   :  { %v4371_v35 = vpack.c.bf16 %v195_v34, %v195_v34 }
 0x210   :  { %v3690_v36 = vpop.f32.mrf.mxu1 }
 0x211   :  { %320 = vrot.lane.b32.xlu1 %v4371_v35, %s4178_s4  ;;  %204 = vrot.lane.b32.xlu0 %v4371_v35, %s4179_s6 }
 0x212   :  { %v4377_v37 = vpop.f32.mrf.mxu1 }
 0x214   :  { %v3691_v38 = vpop.f32.mrf.mxu1 }
 0x215   :  { %318 = vrot.lane.b32.xlu1 %v4371_v35, %s4180_s30 }
 0x283   :  { %v205_v39 = vpop.permute.xlu0 %204  ;;  %v321_v41 = vpop.permute.xlu1 %320 }
 0x284   :  { %v211_v40 = vsel %vm206_vm2, %v205_v39, 0  ;;  %v326_v42 = vsel %vm206_vm2, %v321_v41, 0 }
 0x285   :  { %3693 = vmatpush3.bf16.xpose.msra.mxu1 %v211_v40 }
 0x286   :  { %3704 = vmatprep.subr.bf16.mxu1 %v4176_v14 }
 0x287   :  { %v319_v43 = vpop.permute.xlu1 %318 }
 0x28c   :  { %3695 = vmatmul.mubr.msk.bf16.vlgmr.msra.gmra.mxu1 %vm206_vm2, %v4371_v35 }
 0x28d   :  { %3705 = vmatpush3.bf16.xpose.msra.mxu1 %v326_v42  ;;  %3706 = vmatprep.mubr.msk.bf16.mxu1 %vm4177_vm1, %v4176_v14 }
 0x28e   :  { %3716 = vmatprep.subr.bf16.mxu1 %v4176_v14 }
 0x294   :  { %3707 = vmatmul.mubr.msk.bf16.vlgmr.msra.gmra.mxu1 %vm206_vm2, %v319_v43 }
 0x295   :  { %3718 = vmatprep.mubr.msk.bf16.mxu1 %vm4177_vm1, %v4176_v14  ;;  %3717 = vmatpush3.bf16.msra.mxu1 %v4430_v27 }
 0x296   :  { %3728 = vmatprep.subr.bf16.mxu1 %v4176_v14 }
 0x34c   :  { %v247_v47 = vpop.f32.mrf.mxu1 }
 0x34d   :  { %v253_v50 = vmul.f32 0.17677669, %v247_v47 }
 0x34e   :  { %v3696_v51 = vpop.f32.mrf.mxu1 }
 0x34f   :  { %v254_v52 = vadd.f32 %v253_v50, %v4392_v49 }
 0x350   :  { %v250_v53 = vpop.f32.mrf.mxu1 }
 0x351   :  { %v255_v54 = vsel %vm206_vm2, %v254_v52, -inf }
 0x352   :  { %256 = vmax.xlane.f32.xlu1 %v255_v54  ;;  %v3697_v55 = vpop.f32.mrf.mxu1 }
 0x354   :  { %v362_v56 = vpop.f32.mrf.mxu1 }
 0x355   :  { %v368_v57 = vmul.f32 0.17677669, %v362_v56 }
 0x356   :  { %v3708_v58 = vpop.f32.mrf.mxu1 }
 0x357   :  { %v369_v59 = vadd.f32 %v368_v57, %v4392_v49 }
 0x358   :  { %v365_v60 = vpop.f32.mrf.mxu1 }
 0x359   :  { %v370_v61 = vsel %vm206_vm2, %v369_v59, -inf }
 0x35a   :  { %371 = vmax.xlane.f32.xlu0 %v370_v61  ;;  %v3709_v62 = vpop.f32.mrf.mxu1 }
 0x363   :  { %267 = vrot.lane.b32.xlu1 %v4371_v35, %s4182_s7 }
 0x367   :  { %527 = vrot.lane.b32.xlu1 %v4371_v35, %s5092_s5 }
 0x36b   :  { %525 = vrot.lane.b32.xlu1 %v4371_v35, %s5090_s28 }
 0x3db   :  { %v257_v63 = vpop.xlane.xlu1 %256 }
 0x3dc   :  { %v258_v2 = vsub.f32 %v254_v52, %v257_v63 }
 0x3de   :  { %v259_v3 = vmul.f32 1.442695, %v258_v2 }
 0x3df   :  { %v268_v4 = vpop.permute.xlu1 %267 }
 0x3e0   :  { %4096 = vpow2.f32 %v259_v3  ;;  %v274_v5 = vsel %vm272_vm4, %v268_v4, 0 }
 0x3e1   :  { %3699 = vmatpush3.bf16.msra.mxu0 %v274_v5 }
 0x3e2   :  { %3710 = vmatprep.subr.bf16.mxu0 %v4176_v14 }
 0x3e3   :  { %v372_v6 = vpop.xlane.xlu0 %371  ;;  %v528_v33 = vpop.permute.xlu1 %527 }
 0x3e4   :  { %v373_v7 = vsub.f32 %v369_v59, %v372_v6  ;;  %v533_v39 = vsel %vm206_vm2, %v528_v33, 0 }
 0x3e6   :  { %v374_v8 = vmul.f32 1.442695, %v373_v7 }
 0x3e7   :  { %v526_v42 = vpop.permute.xlu1 %525 }
 0x3e8   :  { %4098 = vpow2.f32 %v374_v8 }
 0x3ed   :  { %v4097_v9 = vpop.eup %4096 }
 0x3ee   :  { %v261_v10 = vsel %vm206_vm2, %v4097_v9, 0.0 }
 0x3ef   :  { %262 = vadd.xlane.f32.xlu0 %v261_v10 }
 0x3f5   :  { %v4099_v11 = vpop.eup %4098 }
 0x3f6   :  { %v376_v12 = vsel %vm206_vm2, %v4099_v11, 0.0 }
 0x3f7   :  { %377 = vadd.xlane.f32.xlu0 %v376_v12  ;;  %v3467_v12 = vld [vmem:[%s5110_s2 + $0x8] sm:$0xf] }
 0x40d   :  { %382 = vrot.lane.b32.xlu0 %v4371_v35, %s4185_s0 }
 0x478   :  { %v263_v13 = vpop.xlane.xlu0 %262 }
 0x479   :  { %4100 = vrcp.f32 %v263_v13  ;;  %v4470_v13 = vsel %vm272_vm4, %v3467_v12, 0 }
 0x480   :  { %v378_v15 = vpop.xlane.xlu0 %377 }
 0x481   :  { %4102 = vrcp.f32 %v378_v15 }
 0x484   :  { %v383_v18 = vpop.permute.xlu0 %382 }
 0x485   :  { %v388_v20 = vsel %vm272_vm4, %v383_v18, 0 }
 0x486   :  { %v4101_v16 = vpop.eup %4100 }
 0x487   :  { %v265_v17 = vmul.f32 %v4101_v16, %v4097_v9 }
 0x489   :  { %v266_v19 = vpack.c.bf16 %v265_v17, %v265_v17 }
 0x48b   :  { %3701 = vmatmul.mubr.msk.bf16.vlgmr.msra.gmra.mxu0 %vm206_vm2, %v266_v19 }
 0x48c   :  { %3711 = vmatpush3.bf16.msra.mxu0 %v388_v20  ;;  %3712 = vmatprep.mubr.msk.bf16.mxu0 %vm4177_vm1, %v4176_v14 }
 0x48d   :  { %3722 = vmatprep.subr.bf16.mxu0 %v4176_v14 }
 0x48e   :  { %v4103_v21 = vpop.eup %4102 }
 0x48f   :  { %v380_v22 = vmul.f32 %v4103_v21, %v4099_v11 }
 0x491   :  { %v381_v23 = vpack.c.bf16 %v380_v22, %v380_v22 }
 0x493   :  { %3713 = vmatmul.mubr.msk.bf16.vlgmr.msra.gmra.mxu0 %vm206_vm2, %v381_v23 }
 0x494   :  { %3724 = vmatprep.mubr.msk.bf16.mxu0 %vm4177_vm1, %v4176_v14  ;;  %3723 = vmatpush3.bf16.msra.mxu0 %v4422_v25 }
 0x495   :  { %3734 = vmatprep.subr.bf16.mxu0 %v4176_v14 }
 0x54b   :  { %v310_v28 = vpop.f32.mrf.mxu0 }
 0x54c   :  { %v316_v29 = vpack.c.bf16 %v310_v28, %v310_v28 }
 0x54d   :  { %v3702_v30 = vpop.f32.mrf.mxu0 }
 0x54e   :  { %3725 = vmatmul.mubr.msk.bf16.vlgmr.msra.gmra.mxu0 %vm206_vm2, %v316_v29  ;;  %v4483_v29 = vpack.c.bf16 %v4377_v37, %v4377_v37 }
 0x54f   :  { %v313_v31 = vpop.f32.mrf.mxu0  ;;  %3736 = vmatprep.mubr.msk.bf16.mxu0 %vm4177_vm1, %v4176_v14 }
 0x551   :  { %v3703_v32 = vpop.f32.mrf.mxu0 }
 0x553   :  { %v424_v34 = vpop.f32.mrf.mxu0 }
 0x554   :  { %v430_v36 = vpack.c.bf16 %v424_v34, %v424_v34 }
 0x555   :  { %v3714_v38 = vpop.f32.mrf.mxu0 }
 0x556   :  { %3719 = vmatmul.mubr.msk.bf16.vlgmr.msra.gmra.mxu1 %vm206_vm2, %v430_v36 }
 0x557   :  { %3729 = vmatpush3.bf16.xpose.msra.mxu1 %v533_v39  ;;  %v427_v40 = vpop.f32.mrf.mxu0  ;;  %3730 = vmatprep.mubr.msk.bf16.mxu1 %vm4177_vm1, %v4176_v14 }
 0x558   :  { %3740 = vmatprep.subr.bf16.mxu1 %v4176_v14 }
 0x559   :  { %v3715_v41 = vpop.f32.mrf.mxu0 }
 0x55e   :  { %3731 = vmatmul.mubr.msk.bf16.vlgmr.msra.gmra.mxu1 %vm206_vm2, %v526_v42 }
 0x55f   :  { %3742 = vmatprep.mubr.msk.bf16.mxu1 %vm4177_vm1, %v4176_v14  ;;  %3741 = vmatpush3.bf16.msra.mxu1 %v4470_v13 }
 0x560   :  { %3752 = vmatprep.subr.bf16.mxu1 %v4176_v14 }
 0x60e   :  { %v519_v43 = vpop.f32.mrf.mxu0 }
 0x610   :  { %v3726_v44 = vpop.f32.mrf.mxu0 }
 0x612   :  { %v522_v45 = vpop.f32.mrf.mxu0 }
 0x614   :  { %v3727_v46 = vpop.f32.mrf.mxu0 }
 0x616   :  { %v473_v47 = vpop.f32.mrf.mxu1 }
 0x617   :  { %v4445_v48 = vadd.f32 %v519_v43, %v473_v47 }
 0x618   :  { %v3720_v50 = vpop.f32.mrf.mxu1 }
 0x61a   :  { %v476_v51 = vpop.f32.mrf.mxu1 }
 0x61c   :  { %v3721_v52 = vpop.f32.mrf.mxu1 }
 0x61d   :  { %v3471_v52 = vld [vmem:[%s5110_s2 + $0xc] sm:$0xf] }
 0x61e   :  { %v569_v53 = vpop.f32.mrf.mxu1 }
 0x61f   :  { %v575_v54 = vmul.f32 0.17677669, %v569_v53  ;;  %v4517_v53 = vsel %vm272_vm4, %v3471_v52, 0 }
 0x620   :  { %v3732_v55 = vpop.f32.mrf.mxu1 }
 0x621   :  { %v576_v56 = vadd.f32 %v575_v54, %v4392_v49 }
 0x622   :  { %v572_v57 = vpop.f32.mrf.mxu1 }
 0x623   :  { %v577_v58 = vsel %vm206_vm2, %v576_v56, -inf }
 0x624   :  { %578 = vmax.xlane.f32.xlu1 %v577_v58  ;;  %v3733_v59 = vpop.f32.mrf.mxu1 }
 0x635   :  { %689 = vrot.lane.b32.xlu1 %v4371_v35, %s5086_s1 }
 0x639   :  { %687 = vrot.lane.b32.xlu1 %v4371_v35, %s5084_s3 }
 0x6ad   :  { %v579_v60 = vpop.xlane.xlu1 %578 }
 0x6ae   :  { %v580_v61 = vsub.f32 %v576_v56, %v579_v60 }
 0x6b0   :  { %v581_v62 = vmul.f32 1.442695, %v580_v61 }
 0x6b1   :  { %v690_v8 = vpop.permute.xlu1 %689 }
 0x6b2   :  { %4104 = vpow2.f32 %v581_v62  ;;  %v695_v10 = vsel %vm206_vm2, %v690_v8, 0 }
 0x6b5   :  { %v688_v11 = vpop.permute.xlu1 %687 }
 0x6bf   :  { %v4105_v63 = vpop.eup %4104 }
 0x6c0   :  { %v583_v2 = vsel %vm206_vm2, %v4105_v63, 0.0 }
 0x6c1   :  { %584 = vadd.xlane.f32.xlu0 %v583_v2 }
 0x6d7   :  { %589 = vrot.lane.b32.xlu0 %v4371_v35, %s5088_s10 }
 0x74a   :  { %v585_v3 = vpop.xlane.xlu0 %584 }
 0x74b   :  { %4106 = vrcp.f32 %v585_v3 }
 0x74e   :  { %v590_v4 = vpop.permute.xlu0 %589 }
 0x74f   :  { %v595_v5 = vsel %vm272_vm4, %v590_v4, 0 }
 0x750   :  { %3735 = vmatpush3.bf16.msra.mxu0 %v595_v5 }
 0x751   :  { %3746 = vmatprep.subr.bf16.mxu0 %v4176_v14 }
 0x758   :  { %v4107_v6 = vpop.eup %4106 }
 0x759   :  { %v587_v7 = vmul.f32 %v4107_v6, %v4105_v63 }
 0x75b   :  { %v588_v9 = vpack.c.bf16 %v587_v7, %v587_v7 }
 0x75d   :  { %3737 = vmatmul.mubr.msk.bf16.vlgmr.msra.gmra.mxu0 %vm206_vm2, %v588_v9 }
 0x75e   :  { %3747 = vmatpush3.bf16.xpose.msra.mxu0 %v695_v10  ;;  %3748 = vmatprep.mubr.msk.bf16.mxu0 %vm4177_vm1, %v4176_v14 }
 0x75f   :  { %3758 = vmatprep.subr.bf16.mxu0 %v4176_v14 }
 0x765   :  { %3749 = vmatmul.mubr.msk.bf16.vlgmr.msra.gmra.mxu0 %vm206_vm2, %v688_v11 }
 0x766   :  { %3760 = vmatprep.mubr.msk.bf16.mxu0 %vm4177_vm1, %v4176_v14  ;;  %3759 = vmatpush3.bf16.msra.mxu0 %v4517_v53 }
 0x767   :  { %3770 = vmatprep.subr.bf16.mxu0 %v4176_v14 }
 0x81d   :  { %v631_v15 = vpop.f32.mrf.mxu0 }
 0x81e   :  { %v637_v16 = vpack.c.bf16 %v631_v15, %v631_v15 }
 0x81f   :  { %v3738_v17 = vpop.f32.mrf.mxu0 }
 0x820   :  { %3743 = vmatmul.mubr.msk.bf16.vlgmr.msra.gmra.mxu1 %vm206_vm2, %v637_v16 }
 0x821   :  { %v634_v18 = vpop.f32.mrf.mxu0  ;;  %3754 = vmatprep.mubr.msk.bf16.mxu1 %vm4177_vm1, %v4176_v14 }
 0x823   :  { %v3739_v19 = vpop.f32.mrf.mxu0 }
 0x825   :  { %v731_v20 = vpop.f32.mrf.mxu0 }
 0x826   :  { %v737_v21 = vmul.f32 0.17677669, %v731_v20 }
 0x827   :  { %v3750_v22 = vpop.f32.mrf.mxu0 }
 0x828   :  { %v738_v23 = vadd.f32 %v737_v21, %v4392_v49 }
 0x829   :  { %v734_v24 = vpop.f32.mrf.mxu0 }
 0x82a   :  { %v739_v26 = vsel %vm206_vm2, %v738_v23, -inf }
 0x82b   :  { %740 = vmax.xlane.f32.xlu0 %v739_v26  ;;  %v3751_v28 = vpop.f32.mrf.mxu0 }
 0x841   :  { %751 = vrot.lane.b32.xlu0 %v4371_v35, %s5082_s8 }
 0x845   :  { %964 = vrot.lane.b32.xlu0 %v4483_v29, %s4178_s4 }
 0x8b4   :  { %v741_v30 = vpop.xlane.xlu0 %740 }
 0x8b5   :  { %v742_v31 = vsub.f32 %v738_v23, %v741_v30 }
 0x8b7   :  { %v743_v32 = vmul.f32 1.442695, %v742_v31 }
 0x8b8   :  { %v752_v33 = vpop.permute.xlu0 %751 }
 0x8b9   :  { %4108 = vpow2.f32 %v743_v32  ;;  %v757_v34 = vsel %vm272_vm4, %v752_v33, 0 }
 0x8ba   :  { %3753 = vmatpush3.bf16.msra.mxu1 %v757_v34 }
 0x8bb   :  { %3764 = vmatprep.subr.bf16.mxu1 %v4176_v14 }
 0x8c6   :  { %v4109_v36 = vpop.eup %4108 }
 0x8c7   :  { %v745_v35 = vsel %vm206_vm2, %v4109_v36, 0.0 }
 0x8c8   :  { %746 = vadd.xlane.f32.xlu1 %v745_v35 }
 0x8d9   :  { %851 = vrot.lane.b32.xlu1 %v4483_v29, %s4179_s6 }
 0x8dd   :  { %962 = vrot.lane.b32.xlu1 %v4483_v29, %s4180_s30 }
 0x8e0   :  { %v680_v37 = vpop.f32.mrf.mxu1 }
 0x8e1   :  { %v4495_v38 = vadd.f32 %v680_v37, %v4445_v48  ;;  %v965_v48 = vpop.permute.xlu0 %964 }
 0x8e2   :  { %v3744_v39 = vpop.f32.mrf.mxu1  ;;  %v970_v50 = vsel %vm206_vm2, %v965_v48, 0 }
 0x8e4   :  { %v683_v40 = vpop.f32.mrf.mxu1 }
 0x8e6   :  { %v3745_v41 = vpop.f32.mrf.mxu1 }
 0x951   :  { %v747_v42 = vpop.xlane.xlu1 %746 }
 0x952   :  { %4110 = vrcp.f32 %v747_v42 }
 0x955   :  { %v852_v45 = vpop.permute.xlu1 %851 }
 0x956   :  { %v857_v47 = vsel %vm206_vm2, %v852_v45, 0 }
 0x959   :  { %v963_v51 = vpop.permute.xlu1 %962 }
 0x95f   :  { %v4111_v43 = vpop.eup %4110 }
 0x960   :  { %v749_v44 = vmul.f32 %v4111_v43, %v4109_v36 }
 0x962   :  { %v750_v46 = vpack.c.bf16 %v749_v44, %v749_v44 }
 0x964   :  { %3755 = vmatmul.mubr.msk.bf16.vlgmr.msra.gmra.mxu1 %vm206_vm2, %v750_v46 }
 0x965   :  { %3765 = vmatpush3.bf16.xpose.msra.mxu1 %v857_v47  ;;  %3766 = vmatprep.mubr.msk.bf16.mxu1 %vm4177_vm1, %v4176_v14 }
 0x966   :  { %3776 = vmatprep.subr.bf16.mxu1 %v4176_v14 }
 0x96c   :  { %3767 = vmatmul.mubr.msk.bf16.vlgmr.msra.gmra.mxu1 %vm206_vm2, %v4483_v29 }
 0x96d   :  { %3777 = vmatpush3.bf16.xpose.msra.mxu1 %v970_v50  ;;  %3778 = vmatprep.mubr.msk.bf16.mxu1 %vm4177_vm1, %v4176_v14 }
 0x96e   :  { %3788 = vmatprep.subr.bf16.mxu1 %v4176_v14 }
 0x974   :  { %3779 = vmatmul.mubr.msk.bf16.vlgmr.msra.gmra.mxu1 %vm206_vm2, %v963_v51 }
 0x975   :  { %3789 = vmatpush3.bf16.msra.mxu1 %v4430_v27  ;;  %3790 = vmatprep.mubr.msk.bf16.mxu1 %vm4177_vm1, %v4176_v14 }
 0x976   :  { %3800 = vmatprep.subr.bf16.mxu1 %v4176_v14 }
 0xa24   :  { %v793_v54 = vpop.f32.mrf.mxu1 }
 0xa25   :  { %v799_v55 = vpack.c.bf16 %v793_v54, %v793_v54 }
 0xa26   :  { %v3756_v56 = vpop.f32.mrf.mxu1 }
 0xa27   :  { %3761 = vmatmul.mubr.msk.bf16.vlgmr.msra.gmra.mxu0 %vm206_vm2, %v799_v55 }
 0xa28   :  { %v796_v27 = vpop.f32.mrf.mxu1  ;;  %3772 = vmatprep.mubr.msk.bf16.mxu0 %vm4177_vm1, %v4176_v14 }
 0xa2a   :  { %v3757_v57 = vpop.f32.mrf.mxu1 }
 0xa2c   :  { %v893_v58 = vpop.f32.mrf.mxu1 }
 0xa2d   :  { %v899_v59 = vmul.f32 0.17677669, %v893_v58 }
 0xa2e   :  { %v3768_v60 = vpop.f32.mrf.mxu1 }
 0xa2f   :  { %v900_v61 = vadd.f32 %v899_v59, %v4392_v49 }
 0xa30   :  { %v896_v62 = vpop.f32.mrf.mxu1 }
 0xa31   :  { %v901_v63 = vsel %vm206_vm2, %v900_v61, -inf }
 0xa32   :  { %902 = vmax.xlane.f32.xlu0 %v901_v63  ;;  %v3769_v2 = vpop.f32.mrf.mxu1 }
 0xa34   :  { %v1006_v3 = vpop.f32.mrf.mxu1 }
 0xa35   :  { %v1012_v4 = vmul.f32 0.17677669, %v1006_v3 }
 0xa36   :  { %v3780_v5 = vpop.f32.mrf.mxu1 }
 0xa37   :  { %v1013_v6 = vadd.f32 %v1012_v4, %v4392_v49 }
 0xa38   :  { %v1009_v7 = vpop.f32.mrf.mxu1 }
 0xa39   :  { %v1014_v8 = vsel %vm206_vm2, %v1013_v6, -inf }
 0xa3a   :  { %1015 = vmax.xlane.f32.xlu1 %v1014_v8  ;;  %v3781_v9 = vpop.f32.mrf.mxu1 }
 0xa4b   :  { %1026 = vrot.lane.b32.xlu1 %v4483_v29, %s4185_s0 }
 0xa4f   :  { %1163 = vrot.lane.b32.xlu1 %v4483_v29, %s5092_s5 }
 0xa53   :  { %1161 = vrot.lane.b32.xlu1 %v4483_v29, %s5090_s28 }
 0xabb   :  { %v903_v10 = vpop.xlane.xlu0 %902 }
 0xabc   :  { %v904_v11 = vsub.f32 %v900_v61, %v903_v10 }
 0xabe   :  { %v905_v12 = vmul.f32 1.442695, %v904_v11 }
 0xac0   :  { %4112 = vpow2.f32 %v905_v12 }
 0xac3   :  { %v1016_v15 = vpop.xlane.xlu1 %1015 }
 0xac4   :  { %v1017_v16 = vsub.f32 %v1013_v6, %v1016_v15 }
 0xac6   :  { %v1018_v17 = vmul.f32 1.442695, %v1017_v16 }
 0xac7   :  { %v1027_v35 = vpop.permute.xlu1 %1026 }
 0xac8   :  { %4114 = vpow2.f32 %v1018_v17 }
 0xacb   :  { %v1164_v47 = vpop.permute.xlu1 %1163 }
 0xacd   :  { %v4113_v18 = vpop.eup %4112 }
 0xace   :  { %v907_v19 = vsel %vm206_vm2, %v4113_v18, 0.0 }
 0xacf   :  { %908 = vadd.xlane.f32.xlu0 %v907_v19  ;;  %v1162_v55 = vpop.permute.xlu1 %1161 }
 0xad5   :  { %v4115_v20 = vpop.eup %4114 }
 0xad6   :  { %v1020_v21 = vsel %vm206_vm2, %v4115_v20, 0.0 }
 0xad7   :  { %1021 = vadd.xlane.f32.xlu0 %v1020_v21 }
 0xae7   :  { %v842_v22 = vpop.f32.mrf.mxu0 }
 0xae8   :  { %v4537_v23 = vadd.f32 %v842_v22, %v4495_v38  ;;  %v1032_v38 = vsel %vm272_vm4, %v1027_v35, 0 }
 0xae9   :  { %v3762_v24 = vpop.f32.mrf.mxu0 }
 0xaeb   :  { %v845_v26 = vpop.f32.mrf.mxu0 }
 0xaed   :  { %v3763_v28 = vpop.f32.mrf.mxu0  ;;  %913 = vrot.lane.b32.xlu0 %v4483_v29, %s4182_s7 }
 0xb58   :  { %v909_v30 = vpop.xlane.xlu0 %908 }
 0xb59   :  { %4116 = vrcp.f32 %v909_v30 }
 0xb60   :  { %v1022_v31 = vpop.xlane.xlu0 %1021 }
 0xb61   :  { %4118 = vrcp.f32 %v1022_v31 }
 0xb64   :  { %v914_v32 = vpop.permute.xlu0 %913 }
 0xb65   :  { %v919_v33 = vsel %vm272_vm4, %v914_v32, 0 }
 0xb66   :  { %v4117_v34 = vpop.eup %4116  ;;  %3771 = vmatpush3.bf16.msra.mxu0 %v919_v33 }
 0xb67   :  { %3782 = vmatprep.subr.bf16.mxu0 %v4176_v14  ;;  %v911_v36 = vmul.f32 %v4117_v34, %v4113_v18  ;;  %v1475_v34 = vadd.f32 %v4537_v23, %v4333_v0 }
 0xb69   :  { %v912_v37 = vpack.c.bf16 %v911_v36, %v911_v36  ;;  %v3485_v36 = vld [vmem:[%s5111_s11] ss:$0 sm:$0xff]  ;;  %s5114_s11 = sld [smem:[#allocation10_spill]] }
 0xb6b   :  { %3773 = vmatmul.mubr.msk.bf16.vlgmr.msra.gmra.mxu0 %vm206_vm2, %v912_v37 }
 0xb6c   :  { %3783 = vmatpush3.bf16.msra.mxu0 %v1032_v38  ;;  %3784 = vmatprep.mubr.msk.bf16.mxu0 %vm4177_vm1, %v4176_v14 }
 0xb6d   :  { %3794 = vmatprep.subr.bf16.mxu0 %v4176_v14 }
 0xb6e   :  { %v4119_v39 = vpop.eup %4118 }
 0xb6f   :  { %v1024_v40 = vmul.f32 %v4119_v39, %v4115_v20  ;;  %v4598_v39 = vadd.f32 %v3485_v36, %v1475_v34 }
 0xb71   :  { %v1025_v41 = vpack.c.bf16 %v1024_v40, %v1024_v40 }
 0xb73   :  { %3785 = vmatmul.mubr.msk.bf16.vlgmr.msra.gmra.mxu0 %vm206_vm2, %v1025_v41 }
 0xb74   :  { %3795 = vmatpush3.bf16.msra.mxu0 %v4422_v25  ;;  %3796 = vmatprep.mubr.msk.bf16.mxu0 %vm4177_vm1, %v4176_v14  ;;  %v1169_v25 = vsel %vm206_vm2, %v1164_v47, 0 }
 0xb75   :  { %3806 = vmatprep.subr.bf16.mxu0 %v4176_v14 }
 0xc2b   :  { %v955_v42 = vpop.f32.mrf.mxu0 }
 0xc2c   :  { %v961_v43 = vpack.c.bf16 %v955_v42, %v955_v42  ;;  %v1488_v42 = vsel %vm97_vm0, %v4598_v39, 0.0 }
 0xc2d   :  { %v3774_v44 = vpop.f32.mrf.mxu0 }
 0xc2e   :  { %3797 = vmatmul.mubr.msk.bf16.vlgmr.msra.gmra.mxu0 %vm206_vm2, %v961_v43 }
 0xc2f   :  { %v958_v45 = vpop.f32.mrf.mxu0  ;;  %3808 = vmatprep.mubr.msk.bf16.mxu0 %vm4177_vm1, %v4176_v14 }
 0xc31   :  { %v3775_v46 = vpop.f32.mrf.mxu0 }
 0xc33   :  { %v1068_v48 = vpop.f32.mrf.mxu0 }
 0xc34   :  { %v1074_v50 = vpack.c.bf16 %v1068_v48, %v1068_v48 }
 0xc35   :  { %v3786_v51 = vpop.f32.mrf.mxu0 }
 0xc36   :  { %3791 = vmatmul.mubr.msk.bf16.vlgmr.msra.gmra.mxu1 %vm206_vm2, %v1074_v50 }
 0xc37   :  { %3801 = vmatpush3.bf16.xpose.msra.mxu1 %v1169_v25  ;;  %v1071_v52 = vpop.f32.mrf.mxu0  ;;  %3802 = vmatprep.mubr.msk.bf16.mxu1 %vm4177_vm1, %v4176_v14 }
 0xc38   :  { %3812 = vmatprep.subr.bf16.mxu1 %v4176_v14 }
 0xc39   :  { %v3787_v54 = vpop.f32.mrf.mxu0 }
 0xc3e   :  { %3803 = vmatmul.mubr.msk.bf16.vlgmr.msra.gmra.mxu1 %vm206_vm2, %v1162_v55 }
 0xc3f   :  { %3813 = vmatpush3.bf16.msra.mxu1 %v4470_v13  ;;  %3814 = vmatprep.mubr.msk.bf16.mxu1 %vm4177_vm1, %v4176_v14 }
 0xc40   :  { %3824 = vmatprep.subr.bf16.mxu1 %v4176_v14 }
 0xcee   :  { %v1155_v56 = vpop.f32.mrf.mxu0 }
 0xcf0   :  { %v3798_v27 = vpop.f32.mrf.mxu0 }
 0xcf2   :  { %v1158_v57 = vpop.f32.mrf.mxu0 }
 0xcf4   :  { %v3799_v58 = vpop.f32.mrf.mxu0 }
 0xcf6   :  { %v1112_v59 = vpop.f32.mrf.mxu1 }
 0xcf7   :  { %v4566_v60 = vadd.f32 %v1155_v56, %v1112_v59 }
 0xcf8   :  { %v3792_v61 = vpop.f32.mrf.mxu1 }
 0xcfa   :  { %v1115_v62 = vpop.f32.mrf.mxu1 }
 0xcfc   :  { %v3793_v63 = vpop.f32.mrf.mxu1 }
 0xcfe   :  { %v1205_v2 = vpop.f32.mrf.mxu1 }
 0xcff   :  { %v1211_v3 = vmul.f32 0.17677669, %v1205_v2 }
 0xd00   :  { %v3804_v4 = vpop.f32.mrf.mxu1 }
 0xd01   :  { %v1212_v13 = vadd.f32 %v1211_v3, %v4392_v49 }
 0xd02   :  { %v1208_v5 = vpop.f32.mrf.mxu1 }
 0xd03   :  { %v1213_v6 = vsel %vm206_vm2, %v1212_v13, -inf }
 0xd04   :  { %1214 = vmax.xlane.f32.xlu0 %v1213_v6  ;;  %v3805_v7 = vpop.f32.mrf.mxu1 }
 0xd1a   :  { %1225 = vrot.lane.b32.xlu0 %v4483_v29, %s5088_s10  ;;  %s5113_s10 = sld [smem:[#allocation9_spill]] }
 0xd1e   :  { %1318 = vrot.lane.b32.xlu0 %v4483_v29, %s5084_s3  ;;  %s5121_s3 = smov 72  }
 0xd8d   :  { %v1215_v8 = vpop.xlane.xlu0 %1214 }
 0xd8e   :  { %v1216_v9 = vsub.f32 %v1212_v13, %v1215_v8 }
 0xd90   :  { %v1217_v10 = vmul.f32 1.442695, %v1216_v9 }
 0xd91   :  { %v1226_v11 = vpop.permute.xlu0 %1225 }
 0xd92   :  { %4120 = vpow2.f32 %v1217_v10  ;;  %v1231_v12 = vsel %vm272_vm4, %v1226_v11, 0 }
 0xd93   :  { %3807 = vmatpush3.bf16.msra.mxu0 %v1231_v12 }
 0xd94   :  { %3818 = vmatprep.subr.bf16.mxu0 %v4176_v14 }
 0xd95   :  { %v1319_v24 = vpop.permute.xlu0 %1318 }
 0xd9f   :  { %v4121_v15 = vpop.eup %4120 }
 0xda0   :  { %v1219_v16 = vsel %vm206_vm2, %v4121_v15, 0.0 }
 0xda1   :  { %1220 = vadd.xlane.f32.xlu1 %v1219_v16 }
 0xdb2   :  { %1320 = vrot.lane.b32.xlu1 %v4483_v29, %s5086_s1  ;;  %s5117_s1 = sld [smem:[#allocation13_spill]] }
 0xe2a   :  { %v1221_v17 = vpop.xlane.xlu1 %1220 }
 0xe2b   :  { %4122 = vrcp.f32 %v1221_v17 }
 0xe2e   :  { %v1321_v20 = vpop.permute.xlu1 %1320 }
 0xe2f   :  { %v1326_v22 = vsel %vm206_vm2, %v1321_v20, 0  ;;  %v4071_v20 = vld [vmem:[%s5113_s10 + $0x30] sm:$0xff]  }
 0xe38   :  { %v4123_v18 = vpop.eup %4122 }
 0xe39   :  { %v1223_v19 = vmul.f32 %v4123_v18, %v4121_v15  ;;  %v4069_v18 = vld [vmem:[%s5112_s29] sm:$0xff]  }
 0xe3b   :  { %v1224_v21 = vpack.c.bf16 %v1223_v19, %v1223_v19  ;;  %v4070_v19 = vld [vmem:[%s5113_s10 + $0x38] sm:$0xff]  }
 0xe3d   :  { %3809 = vmatmul.mubr.msk.bf16.vlgmr.msra.gmra.mxu0 %vm206_vm2, %v1224_v21  ;;  %v4072_v21 = vld [vmem:[%s5113_s10 + $0x28] sm:$0xff]  }
 0xe3e   :  { %3819 = vmatpush3.bf16.xpose.msra.mxu0 %v1326_v22  ;;  %3820 = vmatprep.mubr.msk.bf16.mxu0 %vm4177_vm1, %v4176_v14  ;;  %v4073_v22 = vld [vmem:[%s5113_s10 + $0x20] sm:$0xff]  }
 0xe3f   :  { %3830 = vmatprep.subr.bf16.mxu0 %v4176_v14 }
 0xe45   :  { %3821 = vmatmul.mubr.msk.bf16.vlgmr.msra.gmra.mxu0 %vm206_vm2, %v1319_v24  ;;  %v4074_v24 = vld [vmem:[%s5113_s10 + $0x18] sm:$0xff]  }
 0xe46   :  { %3831 = vmatpush3.bf16.msra.mxu0 %v4517_v53  ;;  %3832 = vmatprep.mubr.msk.bf16.mxu0 %vm4177_vm1, %v4176_v14 }
 0xe47   :  { %3844 = vmatprep.subr.bf16.mxu0 %v4176_v14 }
 0xefd   :  { %v1267_v26 = vpop.f32.mrf.mxu0 }
 0xefe   :  { %v1273_v28 = vpack.c.bf16 %v1267_v26, %v1267_v26 }
 0xeff   :  { %v3810_v30 = vpop.f32.mrf.mxu0 }
 0xf00   :  { %3815 = vmatmul.mubr.msk.bf16.vlgmr.msra.gmra.mxu1 %vm206_vm2, %v1273_v28 }
 0xf01   :  { %v1270_v31 = vpop.f32.mrf.mxu0  ;;  %3826 = vmatprep.mubr.msk.bf16.mxu1 %vm4177_vm1, %v4176_v14 }
 0xf03   :  { %v3811_v32 = vpop.f32.mrf.mxu0 }
 0xf05   :  { %v1362_v33 = vpop.f32.mrf.mxu0 }
 0xf06   :  { %v1368_v53 = vmul.f32 0.17677669, %v1362_v33 }
 0xf07   :  { %v3822_v35 = vpop.f32.mrf.mxu0 }
 0xf08   :  { %v1369_v37 = vadd.f32 %v1368_v53, %v4392_v49 }
 0xf09   :  { %v1365_v38 = vpop.f32.mrf.mxu0 }
 0xf0a   :  { %v1370_v40 = vsel %vm206_vm2, %v1369_v37, -inf }
 0xf0b   :  { %1371 = vmax.xlane.f32.xlu1 %v1370_v40  ;;  %v3823_v41 = vpop.f32.mrf.mxu0 }
 0xf0f   :  { %1489 = vadd.xlane.f32.xlu1 %v1488_v42 }
 0xf94   :  { %v1372_v0 = vpop.xlane.xlu1 %1371 }
 0xf95   :  { %v1373_v23 = vsub.f32 %v1369_v37, %v1372_v0 }
 0xf97   :  { %v1374_v43 = vmul.f32 1.442695, %v1373_v23 }
 0xf98   :  { %v1490_v61 = vpop.xlane.xlu1 %1489 }
 0xf99   :  { %4124 = vpow2.f32 %v1374_v43  ;;  %v1494_v62 = vmul.f32 0.03125, %v1490_v61  ;;  %v4075_v43 = vld [vmem:[%s5113_s10 + $0x10] sm:$0xff]  }
 0xf9b   :  { %v1496_v4 = vsub.f32 %v4598_v39, %v1494_v62 }
 0xf9d   :  { %v1498_v9 = vmul.f32 %v1496_v4, %v1496_v4 }
 0xf9f   :  { %v1500_v10 = vsel %vm97_vm0, %v1498_v9, 0.0 }
 0xfa6   :  { %v4125_v44 = vpop.eup %4124 }
 0xfa7   :  { %v1376_v45 = vsel %vm206_vm2, %v4125_v44, 0.0 }
 0xfa8   :  { %1377 = vadd.xlane.f32.xlu0 %v1376_v45  ;;  %v4077_v45 = vld [vmem:[%s5113_s10] sm:$0xff]  }
 0xfbe   :  { %1382 = vrot.lane.b32.xlu0 %v4483_v29, %s5082_s8  ;;  %s5115_s8 = sld [smem:[#allocation11_spill]] }
 0xfc0   :  { %v1311_v46 = vpop.f32.mrf.mxu1 }
 0xfc1   :  { %v1317_v47 = vadd.f32 %v1311_v46, %v4566_v60 }
 0xfc2   :  { %v3816_v48 = vpop.f32.mrf.mxu1 }
 0xfc4   :  { %v1314_v50 = vpop.f32.mrf.mxu1  ;;  %v3487_v40 = vld [vmem:[%s5115_s8] ss:$0 sm:$0xff]  ;;  %s5116_s8 = sld [smem:[#allocation12_spill]] }
 0xfc6   :  { %v3817_v51 = vpop.f32.mrf.mxu1 }
 0xfca   :  { %v3488_v46 = vld [vmem:[%s5116_s8] ss:$0 sm:$0xff] }
0x1031   :  { %v1378_v25 = vpop.xlane.xlu0 %1377 }
0x1032   :  { %4126 = vrcp.f32 %v1378_v25 }
0x1035   :  { %v1383_v52 = vpop.permute.xlu0 %1382 }
0x1036   :  { %v1388_v54 = vsel %vm272_vm4, %v1383_v52, 0 }
0x1037   :  { %3825 = vmatpush3.bf16.msra.mxu1 %v1388_v54 }
0x1038   :  { %3836 = vmatprep.subr.bf16.mxu1 %v4176_v14 }
0x103f   :  { %v4127_v55 = vpop.eup %4126 }
0x1040   :  { %v1380_v56 = vmul.f32 %v4127_v55, %v4125_v44  ;;  %v4076_v44 = vld [vmem:[%s5113_s10 + $0x8] sm:$0xff]   ;;  %s5120_s10 = smov 48  }
0x1042   :  { %v1381_v27 = vpack.c.bf16 %v1380_v56, %v1380_v56 }
0x1044   :  { %3827 = vmatmul.mubr.msk.bf16.vlgmr.msra.gmra.mxu1 %vm206_vm2, %v1381_v27 }
0x1045   :  { %3840 = vmatprep.mubr.msk.bf16.mxu1 %vm4177_vm1, %v4176_v14 }
0x1104   :  { %v1424_v29 = vpop.f32.mrf.mxu1 }
0x1105   :  { %v1430_v57 = vpack.c.bf16 %v1424_v29, %v1424_v29  ;;  %v3500_v29 = vld [vmem:[%s5117_s1] ss:$0 sm:$0xff] }
0x1106   :  { %v3828_v58 = vpop.f32.mrf.mxu1 }
0x1107   :  { %3833 = vmatmul.mubr.msk.bf16.vlgmr.msra.gmra.mxu0 %vm206_vm2, %v1430_v57 }
0x1108   :  { %v1427_v59 = vpop.f32.mrf.mxu1  ;;  %3860 = vmatprep.mubr.msk.bf16.mxu0 %vm4177_vm1, %v4176_v14  ;;  %3845 = vmatpush3.bf16.msra.mxu0 %v4070_v19 }
0x1109   :  { %3846 = vmatprep.subr.bf16.mxu0 %v4176_v14 }
0x110a   :  { %v3829_v60 = vpop.f32.mrf.mxu1 }
0x110c   :  { %3847 = vmatpush3.bf16.msra.mxu0 %v4071_v20 }
0x110d   :  { %3848 = vmatprep.subr.bf16.mxu0 %v4176_v14 }
0x1110   :  { %3849 = vmatpush3.bf16.msra.mxu0 %v4072_v21 }
0x1111   :  { %3850 = vmatprep.subr.bf16.mxu0 %v4176_v14 }
0x1114   :  { %3851 = vmatpush3.bf16.msra.mxu0 %v4073_v22 }
0x1115   :  { %3852 = vmatprep.subr.bf16.mxu0 %v4176_v14 }
0x1118   :  { %3853 = vmatpush3.bf16.msra.mxu0 %v4074_v24  ;;  %v3501_v24 = vld [vmem:[%s5062_s12] ss:$0 sm:$0xff]  ;;  %s5118_s12 = smov 80  }
0x1119   :  { %3854 = vmatprep.subr.bf16.mxu0 %v4176_v14 }
0x111c   :  { %3855 = vmatpush3.bf16.msra.mxu0 %v4075_v43 }
0x111d   :  { %3856 = vmatprep.subr.bf16.mxu0 %v4176_v14 }
0x1120   :  { %3857 = vmatpush3.bf16.msra.mxu0 %v4076_v44 }
0x1121   :  { %3858 = vmatprep.subr.bf16.mxu0 %v4176_v14 }
0x1124   :  { %3859 = vmatpush3.bf16.msra.mxu0 %v4077_v45 }
0x1125   :  { %3890 = vmatprep.subr.bf16.mxu0 %v4176_v14 }
0x11c7   :  { %v1468_v63 = vpop.f32.mrf.mxu0 }
0x11c8   :  { %v1474_v2 = vadd.f32 %v1468_v63, %v1317_v47 }
0x11c9   :  { %v3834_v3 = vpop.f32.mrf.mxu0 }
0x11ca   :  { %v1476_v13 = vadd.f32 %v1474_v2, %v4338_v1  ;;  %v4068_v1 = vld [vmem:[%s5112_s29 + $0x8] sm:$0xff]  }
0x11cb   :  { %v1471_v5 = vpop.f32.mrf.mxu0  ;;  %3837 = vmatpush3.bf16.msra.mxu1 %v4068_v1 }
0x11cc   :  { %v4617_v6 = vadd.f32 %v3485_v36, %v1476_v13  ;;  %3838 = vmatprep.subr.bf16.mxu1 %v4176_v14  ;;  %v3486_v36 = vld [vmem:[%s5114_s11] ss:$0 sm:$0xff]  ;;  %s5122_s11 = smov 104  }
0x11cd   :  { %v3835_v7 = vpop.f32.mrf.mxu0 }
0x11ce   :  { %v1491_v8 = vsel %vm97_vm0, %v4617_v6, 0.0 }
0x11cf   :  { %1492 = vadd.xlane.f32.xlu1 %v1491_v8  ;;  %3839 = vmatpush3.bf16.msra.mxu1 %v4069_v18 }
0x11d0   :  { %3864 = vmatprep.subr.bf16.mxu1 %v4176_v14 }
0x11d3   :  { %1501 = vadd.xlane.f32.xlu1 %v1500_v10 }
0x1258   :  { %v1493_v11 = vpop.xlane.xlu1 %1492 }
0x1259   :  { %v1495_v12 = vmul.f32 0.03125, %v1493_v11 }
0x125b   :  { %v1497_v15 = vsub.f32 %v4617_v6, %v1495_v12  ;;  %v4078_v12 = vld [vmem:[%s5061_s14 + $0x8] sm:$0xff]  }
0x125c   :  { %v1502_v26 = vpop.xlane.xlu1 %1501 }
0x125d   :  { %v1499_v16 = vmul.f32 %v1497_v15, %v1497_v15  ;;  %v1506_v28 = vmul.f32 0.03125, %v1502_v26 }
0x125f   :  { %v1503_v17 = vsel %vm97_vm0, %v1499_v16, 0.0  ;;  %v1508_v30 = vadd.f32 1e-05, %v1506_v28 }
0x1260   :  { %1504 = vadd.xlane.f32.xlu1 %v1503_v17 }
0x1261   :  { %4128 = vrsqrt.f32 %v1508_v30 }
0x126e   :  { %v4129_v34 = vpop.eup %4128 }
0x126f   :  { %v1512_v53 = vmul.f32 %v4129_v34, %v1496_v4 }
0x1271   :  { %v1520_v38 = vmul.f32 %v3486_v36, %v1512_v53 }
0x1273   :  { %v1528_v42 = vadd.f32 %v3487_v40, %v1520_v38 }
0x12e9   :  { %v1505_v31 = vpop.xlane.xlu1 %1504 }
0x12ea   :  { %v1507_v32 = vmul.f32 0.03125, %v1505_v31  ;;  %v3502_v31 = vld [vmem:[%s5063_s13] ss:$0 sm:$0xff]  ;;  %s5119_s13 = smov 112  }
0x12ec   :  { %v1509_v33 = vadd.f32 1e-05, %v1507_v32 }
0x12ee   :  { %4130 = vrsqrt.f32 %v1509_v33 }
0x12fb   :  { %v4131_v35 = vpop.eup %4130 }
0x12fc   :  { %v1513_v37 = vmul.f32 %v4131_v35, %v1497_v15  ;;  %v4079_v15 = vld [vmem:[%s5061_s14] sm:$0xff]   ;;  %s5123_s14 = smov 40  }
0x12fe   :  { %v1521_v41 = vmul.f32 %v3486_v36, %v1513_v37 }
0x1300   :  { %v1529_v0 = vadd.f32 %v3487_v40, %v1521_v41 }
0x1302   :  { %v1530_v23 = vpack.c.bf16 %v1529_v0, %v1528_v42 }
0x1304   :  { %3841 = vmatmul.mubr.msk.bf16.vlgmr.msra.gmra.mxu1 %vm97_vm0, %v1530_v23 }
0x1305   :  { %3868 = vmatprep.mubr.msk.bf16.mxu1 %vm4177_vm1, %v4176_v14  ;;  %3865 = vmatpush3.bf16.msra.mxu1 %v4078_v12 }
0x1306   :  { %3866 = vmatprep.subr.bf16.mxu1 %v4176_v14 }
0x1309   :  { %3867 = vmatpush3.bf16.msra.mxu1 %v4079_v15 }
0x130a   :  { %3872 = vmatprep.subr.bf16.mxu1 %v4176_v14 }
0x13c4   :  { %v1591_v47 = vpop.f32.mrf.mxu1 }
0x13c5   :  { %v1592_v50 = vadd.f32 %v3488_v46, %v1591_v47 }
0x13c6   :  { %v3842_v48 = vpop.f32.mrf.mxu1 }
0x13c7   :  { %v1598_v54 = vmax.f32 %v1592_v50, 0.0 }
0x13c8   :  { %v1594_v51 = vpop.f32.mrf.mxu1 }
0x13c9   :  { %v1595_v25 = vadd.f32 %v3488_v46, %v1594_v51 }
0x13ca   :  { %v3843_v52 = vpop.f32.mrf.mxu1 }
0x13cb   :  { %v1599_v55 = vmax.f32 %v1595_v25, 0.0 }
0x13cd   :  { %v1600_v56 = vpack.c.bf16 %v1599_v55, %v1598_v54 }
0x13cf   :  { %3861 = vmatmul.mubr.bf16.vlgmr.msra.gmra.mxu0 %v1600_v56 }
0x13d0   :  { %3892 = vmatprep.mubr.msk.bf16.mxu0 %vm4177_vm1, %v4176_v14 }
0x148f   :  { %v1699_v27 = vpop.f32.mrf.mxu0 }
0x1490   :  { %v1706_v57 = vadd.f32 %v1699_v27, %v4598_v39 }
0x1491   :  { %v3862_v58 = vpop.f32.mrf.mxu0 }
0x1492   :  { %v4682_v59 = vadd.f32 %v3500_v29, %v1706_v57 }
0x1493   :  { %v1702_v60 = vpop.f32.mrf.mxu0 }
0x1494   :  { %v1707_v61 = vadd.f32 %v1702_v60, %v4617_v6  ;;  %v1719_v62 = vsel %vm97_vm0, %v4682_v59, 0.0 }
0x1495   :  { %1720 = vadd.xlane.f32.xlu1 %v1719_v62  ;;  %v3863_v63 = vpop.f32.mrf.mxu0 }
0x1496   :  { %v4687_v2 = vadd.f32 %v3500_v29, %v1707_v61 }
0x1498   :  { %v1722_v3 = vsel %vm97_vm0, %v4687_v2, 0.0 }
0x1499   :  { %1723 = vadd.xlane.f32.xlu0 %v1722_v3 }
0x151e   :  { %v1721_v4 = vpop.xlane.xlu1 %1720 }
0x151f   :  { %v1725_v13 = vmul.f32 0.03125, %v1721_v4 }
0x1521   :  { %v1727_v39 = vsub.f32 %v4682_v59, %v1725_v13 }
0x1522   :  { %v1724_v5 = vpop.xlane.xlu0 %1723 }
0x1523   :  { %v1726_v7 = vmul.f32 0.03125, %v1724_v5  ;;  %v1729_v8 = vmul.f32 %v1727_v39, %v1727_v39 }
0x1525   :  { %v1728_v6 = vsub.f32 %v4687_v2, %v1726_v7  ;;  %v1731_v9 = vsel %vm97_vm0, %v1729_v8, 0.0 }
0x1526   :  { %1732 = vadd.xlane.f32.xlu1 %v1731_v9 }
0x1527   :  { %v1730_v10 = vmul.f32 %v1728_v6, %v1728_v6 }
0x1529   :  { %v1734_v11 = vsel %vm97_vm0, %v1730_v10, 0.0 }
0x152a   :  { %1735 = vadd.xlane.f32.xlu1 %v1734_v11 }
0x15af   :  { %v1733_v16 = vpop.xlane.xlu1 %1732 }
0x15b0   :  { %v1737_v17 = vmul.f32 0.03125, %v1733_v16 }
0x15b2   :  { %v1739_v1 = vadd.f32 1e-05, %v1737_v17 }
0x15b3   :  { %v1736_v18 = vpop.xlane.xlu1 %1735 }
0x15b4   :  { %4132 = vrsqrt.f32 %v1739_v1  ;;  %v1738_v19 = vmul.f32 0.03125, %v1736_v18  ;;  %v3510_v18 = vld [vmem:[%s5064_s15 + $0x4] sm:$0xf] }
0x15b6   :  { %v1740_v20 = vadd.f32 1e-05, %v1738_v19  ;;  %v4760_v19 = vsel %vm272_vm4, %v3510_v18, 0 }
0x15b8   :  { %4134 = vrsqrt.f32 %v1740_v20 }
0x15c1   :  { %v4133_v21 = vpop.eup %4132 }
0x15c2   :  { %v1743_v22 = vmul.f32 %v4133_v21, %v1727_v39 }
0x15c4   :  { %v1751_v30 = vmul.f32 %v3501_v24, %v1743_v22  ;;  %v1935_v22 = vld [vmem:[%s5064_s15] sm:$0xf] }
0x15c5   :  { %v4135_v26 = vpop.eup %4134 }
0x15c6   :  { %v1744_v28 = vmul.f32 %v4135_v26, %v1728_v6  ;;  %v1759_v33 = vadd.f32 %v3502_v31, %v1751_v30 }
0x15c8   :  { %v1752_v32 = vmul.f32 %v3501_v24, %v1744_v28  ;;  %v4768_v28 = vsel %vm272_vm4, %v1935_v22, 0 }
0x15ca   :  { %v1760_v34 = vadd.f32 %v3502_v31, %v1752_v32 }
0x15cc   :  { %v1761_v53 = vpack.c.bf16 %v1760_v34, %v1759_v33 }
0x15ce   :  { %3869 = vmatmul.mubr.msk.bf16.vlgmr.msra.gmra.mxu1 %vm97_vm0, %v1761_v53 }
0x15cf   :  { %3874 = vmatprep.mubr.msk.bf16.mxu1 %vm4177_vm1, %v4176_v14 }
0x168e   :  { %v1815_v36 = vpop.f32.mrf.mxu1 }
0x168f   :  { %v4712_v35 = vpack.c.bf16 %v1815_v36, %v1815_v36 }
0x1690   :  { %v3870_v37 = vpop.f32.mrf.mxu1 }
0x1691   :  { %1886 = vrot.lane.b32.xlu0 %v4712_v35, %s4182_s7  ;;  %1824 = vrot.lane.b32.xlu1 %v4712_v35, %s4179_s6 }
0x1692   :  { %v4718_v38 = vpop.f32.mrf.mxu1 }
0x1694   :  { %v3871_v40 = vpop.f32.mrf.mxu1 }
0x1703   :  { %v1825_v41 = vpop.permute.xlu1 %1824  ;;  %v1887_v0 = vpop.permute.xlu0 %1886 }
0x1704   :  { %v1830_v42 = vsel %vm206_vm2, %v1825_v41, 0  ;;  %v1892_v23 = vsel %vm272_vm4, %v1887_v0, 0 }
0x1705   :  { %3873 = vmatpush3.bf16.xpose.msra.mxu1 %v1830_v42 }
0x1706   :  { %3878 = vmatprep.subr.bf16.mxu1 %v4176_v14 }
0x170c   :  { %3875 = vmatmul.mubr.msk.bf16.vlgmr.msra.gmra.mxu1 %vm206_vm2, %v4712_v35 }
0x170d   :  { %3879 = vmatpush3.bf16.msra.mxu1 %v1892_v23  ;;  %3880 = vmatprep.mubr.msk.bf16.mxu1 %vm4177_vm1, %v4176_v14 }
0x170e   :  { %3884 = vmatprep.subr.bf16.mxu1 %v4176_v14 }
0x17cc   :  { %v1866_v43 = vpop.f32.mrf.mxu1 }
0x17cd   :  { %v1872_v44 = vmul.f32 0.17677669, %v1866_v43 }
0x17ce   :  { %v3876_v45 = vpop.f32.mrf.mxu1 }
0x17cf   :  { %v1873_v46 = vadd.f32 %v1872_v44, %v4392_v49 }
0x17d0   :  { %v1869_v47 = vpop.f32.mrf.mxu1 }
0x17d1   :  { %v1874_v48 = vsel %vm206_vm2, %v1873_v46, -inf }
0x17d2   :  { %1875 = vmax.xlane.f32.xlu1 %v1874_v48  ;;  %v3877_v50 = vpop.f32.mrf.mxu1 }
0x185b   :  { %v1876_v51 = vpop.xlane.xlu1 %1875 }
0x185c   :  { %v1877_v25 = vsub.f32 %v1873_v46, %v1876_v51 }
0x185e   :  { %v1878_v52 = vmul.f32 1.442695, %v1877_v25 }
0x1860   :  { %4136 = vpow2.f32 %v1878_v52 }
0x186d   :  { %v4137_v54 = vpop.eup %4136 }
0x186e   :  { %v1880_v55 = vsel %vm206_vm2, %v4137_v54, 0.0 }
0x186f   :  { %1881 = vadd.xlane.f32.xlu0 %v1880_v55 }
0x1885   :  { %1938 = vrot.lane.b32.xlu0 %v4712_v35, %s4178_s4 }
0x1889   :  { %1936 = vrot.lane.b32.xlu0 %v4712_v35, %s4180_s30 }
0x18f8   :  { %v1882_v56 = vpop.xlane.xlu0 %1881 }
0x18f9   :  { %4138 = vrcp.f32 %v1882_v56 }
0x18fc   :  { %v1939_v57 = vpop.permute.xlu0 %1938 }
0x18fd   :  { %v1944_v60 = vsel %vm206_vm2, %v1939_v57, 0 }
0x1900   :  { %v1937_v61 = vpop.permute.xlu0 %1936 }
0x1906   :  { %v4139_v27 = vpop.eup %4138 }
0x1907   :  { %v1884_v29 = vmul.f32 %v4139_v27, %v4137_v54 }
0x1909   :  { %v1885_v58 = vpack.c.bf16 %v1884_v29, %v1884_v29 }
0x190b   :  { %3881 = vmatmul.mubr.msk.bf16.vlgmr.msra.gmra.mxu1 %vm206_vm2, %v1885_v58 }
0x190c   :  { %3885 = vmatpush3.bf16.xpose.msra.mxu1 %v1944_v60  ;;  %3886 = vmatprep.mubr.msk.bf16.mxu1 %vm4177_vm1, %v4176_v14 }
0x190d   :  { %3896 = vmatprep.subr.bf16.mxu1 %v4176_v14 }
0x1913   :  { %3887 = vmatmul.mubr.msk.bf16.vlgmr.msra.gmra.mxu1 %vm206_vm2, %v1937_v61 }
0x1914   :  { %3898 = vmatprep.mubr.msk.bf16.mxu1 %vm4177_vm1, %v4176_v14  ;;  %3897 = vmatpush3.bf16.msra.mxu1 %v4760_v19 }
0x1915   :  { %3908 = vmatprep.subr.bf16.mxu1 %v4176_v14 }
0x19cb   :  { %v1928_v62 = vpop.f32.mrf.mxu1 }
0x19cc   :  { %v1934_v31 = vpack.c.bf16 %v1928_v62, %v1928_v62 }
0x19cd   :  { %v3882_v63 = vpop.f32.mrf.mxu1 }
0x19cf   :  { %v1931_v3 = vpop.f32.mrf.mxu1 }
0x19d1   :  { %v3883_v4 = vpop.f32.mrf.mxu1 }
0x19d3   :  { %v1980_v13 = vpop.f32.mrf.mxu1 }
0x19d4   :  { %v1986_v39 = vmul.f32 0.17677669, %v1980_v13 }
0x19d5   :  { %v3888_v5 = vpop.f32.mrf.mxu1 }
0x19d6   :  { %v1987_v7 = vadd.f32 %v1986_v39, %v4392_v49  ;;  %v3515_v5 = vld [vmem:[%s5064_s15 + $0x8] sm:$0xf] }
0x19d7   :  { %v1983_v8 = vpop.f32.mrf.mxu1 }
0x19d8   :  { %v1988_v6 = vsel %vm206_vm2, %v1987_v7, -inf }
0x19d9   :  { %1989 = vmax.xlane.f32.xlu1 %v1988_v6  ;;  %v3889_v9 = vpop.f32.mrf.mxu1 }
0x19ea   :  { %2000 = vrot.lane.b32.xlu1 %v4712_v35, %s4185_s0 }
0x19ee   :  { %2145 = vrot.lane.b32.xlu1 %v4712_v35, %s5118_s12 }
0x19f2   :  { %2143 = vrot.lane.b32.xlu1 %v4712_v35, %s5119_s13 }
0x1a62   :  { %v1990_v10 = vpop.xlane.xlu1 %1989 }
0x1a63   :  { %v1991_v11 = vsub.f32 %v1987_v7, %v1990_v10  ;;  %v4811_v7 = vsel %vm272_vm4, %v3515_v5, 0 }
0x1a65   :  { %v1992_v12 = vmul.f32 1.442695, %v1991_v11 }
0x1a66   :  { %v2001_v15 = vpop.permute.xlu1 %2000 }
0x1a67   :  { %4140 = vpow2.f32 %v1992_v12  ;;  %v2006_v16 = vsel %vm272_vm4, %v2001_v15, 0 }
0x1a68   :  { %3891 = vmatpush3.bf16.msra.mxu0 %v2006_v16 }
0x1a69   :  { %3902 = vmatprep.subr.bf16.mxu0 %v4176_v14 }
0x1a6a   :  { %v2146_v33 = vpop.permute.xlu1 %2145 }
0x1a6b   :  { %v2151_v37 = vsel %vm206_vm2, %v2146_v33, 0 }
0x1a6e   :  { %v2144_v0 = vpop.permute.xlu1 %2143 }
0x1a74   :  { %v4141_v17 = vpop.eup %4140 }
0x1a75   :  { %v1994_v1 = vsel %vm206_vm2, %v4141_v17, 0.0 }
0x1a76   :  { %1995 = vadd.xlane.f32.xlu0 %v1994_v1 }
0x1a8c   :  { %2207 = vrot.lane.b32.xlu0 %v4712_v35, %s5120_s10 }
0x1aff   :  { %v1996_v20 = vpop.xlane.xlu0 %1995 }
0x1b00   :  { %4142 = vrcp.f32 %v1996_v20 }
0x1b03   :  { %v2208_v30 = vpop.permute.xlu0 %2207 }
0x1b04   :  { %v2213_v32 = vsel %vm272_vm4, %v2208_v30, 0 }
0x1b0d   :  { %v4143_v21 = vpop.eup %4142 }
0x1b0e   :  { %v1998_v24 = vmul.f32 %v4143_v21, %v4141_v17  ;;  %v4824_v21 = vpack.c.bf16 %v4718_v38, %v4718_v38 }
0x1b10   :  { %v1999_v26 = vpack.c.bf16 %v1998_v24, %v1998_v24 }
0x1b12   :  { %3893 = vmatmul.mubr.msk.bf16.vlgmr.msra.gmra.mxu0 %vm206_vm2, %v1999_v26 }
0x1b13   :  { %3903 = vmatpush3.bf16.msra.mxu0 %v4768_v28  ;;  %3904 = vmatprep.mubr.msk.bf16.mxu0 %vm4177_vm1, %v4176_v14 }
0x1b14   :  { %3914 = vmatprep.subr.bf16.mxu0 %v4176_v14 }
0x1b1a   :  { %3905 = vmatmul.mubr.msk.bf16.vlgmr.msra.gmra.mxu0 %vm206_vm2, %v1934_v31 }
0x1b1b   :  { %3915 = vmatpush3.bf16.msra.mxu0 %v2213_v32  ;;  %3916 = vmatprep.mubr.msk.bf16.mxu0 %vm4177_vm1, %v4176_v14 }
0x1b1c   :  { %3926 = vmatprep.subr.bf16.mxu0 %v4176_v14 }
0x1bd2   :  { %v2042_v34 = vpop.f32.mrf.mxu0 }
0x1bd3   :  { %v2048_v53 = vpack.c.bf16 %v2042_v34, %v2042_v34 }
0x1bd4   :  { %v3894_v36 = vpop.f32.mrf.mxu0 }
0x1bd5   :  { %3899 = vmatmul.mubr.msk.bf16.vlgmr.msra.gmra.mxu1 %vm206_vm2, %v2048_v53 }
0x1bd6   :  { %3909 = vmatpush3.bf16.xpose.msra.mxu1 %v2151_v37  ;;  %v2045_v40 = vpop.f32.mrf.mxu0  ;;  %3910 = vmatprep.mubr.msk.bf16.mxu1 %vm4177_vm1, %v4176_v14 }
0x1bd7   :  { %3920 = vmatprep.subr.bf16.mxu1 %v4176_v14 }
0x1bd8   :  { %v3895_v41 = vpop.f32.mrf.mxu0 }
0x1bda   :  { %v4785_v42 = vpop.f32.mrf.mxu0 }
0x1bdc   :  { %v3906_v23 = vpop.f32.mrf.mxu0 }
0x1bdd   :  { %3911 = vmatmul.mubr.msk.bf16.vlgmr.msra.gmra.mxu1 %vm206_vm2, %v2144_v0 }
0x1bde   :  { %v2140_v43 = vpop.f32.mrf.mxu0  ;;  %3922 = vmatprep.mubr.msk.bf16.mxu1 %vm4177_vm1, %v4176_v14  ;;  %3921 = vmatpush3.bf16.msra.mxu1 %v4811_v7 }
0x1bdf   :  { %3932 = vmatprep.subr.bf16.mxu1 %v4176_v14 }
0x1be0   :  { %v3907_v44 = vpop.f32.mrf.mxu0 }
0x1c95   :  { %v4790_v45 = vpop.f32.mrf.mxu1 }
0x1c96   :  { %v2138_v32 = vadd.f32 %v4785_v42, %v4790_v45 }
0x1c97   :  { %v3900_v46 = vpop.f32.mrf.mxu1 }
0x1c99   :  { %v2094_v47 = vpop.f32.mrf.mxu1 }
0x1c9a   :  { %v3519_v47 = vld [vmem:[%s5064_s15 + $0xc] sm:$0xf] }
0x1c9b   :  { %v3901_v48 = vpop.f32.mrf.mxu1 }
0x1c9c   :  { %v4859_v48 = vsel %vm272_vm4, %v3519_v47, 0 }
0x1c9d   :  { %v2187_v50 = vpop.f32.mrf.mxu1 }
0x1c9e   :  { %v2193_v51 = vmul.f32 0.17677669, %v2187_v50 }
0x1c9f   :  { %v3912_v25 = vpop.f32.mrf.mxu1 }
0x1ca0   :  { %v2194_v52 = vadd.f32 %v2193_v51, %v4392_v49 }
0x1ca1   :  { %v2190_v54 = vpop.f32.mrf.mxu1 }
0x1ca2   :  { %v2195_v55 = vsel %vm206_vm2, %v2194_v52, -inf }
0x1ca3   :  { %2196 = vmax.xlane.f32.xlu1 %v2195_v55  ;;  %v3913_v56 = vpop.f32.mrf.mxu1 }
0x1d2c   :  { %v2197_v27 = vpop.xlane.xlu1 %2196 }
0x1d2d   :  { %v2198_v29 = vsub.f32 %v2194_v52, %v2197_v27 }
0x1d2f   :  { %v2199_v57 = vmul.f32 1.442695, %v2198_v29 }
0x1d31   :  { %4144 = vpow2.f32 %v2199_v57 }
0x1d3e   :  { %v4145_v58 = vpop.eup %4144 }
0x1d3f   :  { %v2201_v60 = vsel %vm206_vm2, %v4145_v58, 0.0 }
0x1d40   :  { %2202 = vadd.xlane.f32.xlu0 %v2201_v60 }
0x1d56   :  { %2307 = vrot.lane.b32.xlu0 %v4712_v35, %s5121_s3 }
0x1d5a   :  { %2305 = vrot.lane.b32.xlu0 %v4712_v35, %s5122_s11 }
0x1dc9   :  { %v2203_v61 = vpop.xlane.xlu0 %2202 }
0x1dca   :  { %4146 = vrcp.f32 %v2203_v61 }
0x1dcd   :  { %v2308_v3 = vpop.permute.xlu0 %2307 }
0x1dce   :  { %v2313_v13 = vsel %vm206_vm2, %v2308_v3, 0 }
0x1dd1   :  { %v2306_v39 = vpop.permute.xlu0 %2305 }
0x1dd7   :  { %v4147_v62 = vpop.eup %4146 }
0x1dd8   :  { %v2205_v63 = vmul.f32 %v4147_v62, %v4145_v58 }
0x1dda   :  { %v2206_v4 = vpack.c.bf16 %v2205_v63, %v2205_v63 }
0x1ddc   :  { %3917 = vmatmul.mubr.msk.bf16.vlgmr.msra.gmra.mxu0 %vm206_vm2, %v2206_v4 }
0x1ddd   :  { %3927 = vmatpush3.bf16.xpose.msra.mxu0 %v2313_v13  ;;  %3928 = vmatprep.mubr.msk.bf16.mxu0 %vm4177_vm1, %v4176_v14 }
0x1dde   :  { %3938 = vmatprep.subr.bf16.mxu0 %v4176_v14 }
0x1de4   :  { %3929 = vmatmul.mubr.msk.bf16.vlgmr.msra.gmra.mxu0 %vm206_vm2, %v2306_v39 }
0x1de5   :  { %3940 = vmatprep.mubr.msk.bf16.mxu0 %vm4177_vm1, %v4176_v14  ;;  %3939 = vmatpush3.bf16.msra.mxu0 %v4859_v48 }
0x1de6   :  { %3950 = vmatprep.subr.bf16.mxu0 %v4176_v14 }
0x1e9c   :  { %v2249_v8 = vpop.f32.mrf.mxu0 }
0x1e9d   :  { %v2255_v6 = vpack.c.bf16 %v2249_v8, %v2249_v8 }
0x1e9e   :  { %v3918_v9 = vpop.f32.mrf.mxu0 }
0x1e9f   :  { %3923 = vmatmul.mubr.msk.bf16.vlgmr.msra.gmra.mxu1 %vm206_vm2, %v2255_v6 }
0x1ea0   :  { %v2252_v10 = vpop.f32.mrf.mxu0  ;;  %3934 = vmatprep.mubr.msk.bf16.mxu1 %vm4177_vm1, %v4176_v14 }
0x1ea2   :  { %v3919_v11 = vpop.f32.mrf.mxu0 }
0x1ea4   :  { %v2349_v12 = vpop.f32.mrf.mxu0 }
0x1ea5   :  { %v2355_v15 = vmul.f32 0.17677669, %v2349_v12 }
0x1ea6   :  { %v3930_v16 = vpop.f32.mrf.mxu0 }
0x1ea7   :  { %v2356_v17 = vadd.f32 %v2355_v15, %v4392_v49 }
0x1ea8   :  { %v2352_v1 = vpop.f32.mrf.mxu0 }
0x1ea9   :  { %v2357_v18 = vsel %vm206_vm2, %v2356_v17, -inf }
0x1eaa   :  { %2358 = vmax.xlane.f32.xlu1 %v2357_v18  ;;  %v3931_v20 = vpop.f32.mrf.mxu0 }
0x1ebb   :  { %2369 = vrot.lane.b32.xlu1 %v4712_v35, %s5123_s14 }
0x1ebf   :  { %2469 = vrot.lane.b32.xlu1 %v4824_v21, %s4179_s6 }
0x1ec3   :  { %2582 = vrot.lane.b32.xlu1 %v4824_v21, %s4178_s4 }
0x1ec7   :  { %2580 = vrot.lane.b32.xlu1 %v4824_v21, %s4180_s30 }
0x1f33   :  { %v2359_v22 = vpop.xlane.xlu1 %2358 }
0x1f34   :  { %v2360_v24 = vsub.f32 %v2356_v17, %v2359_v22 }
0x1f36   :  { %v2361_v26 = vmul.f32 1.442695, %v2360_v24 }
0x1f37   :  { %v2370_v30 = vpop.permute.xlu1 %2369 }
0x1f38   :  { %4148 = vpow2.f32 %v2361_v26  ;;  %v2375_v35 = vsel %vm272_vm4, %v2370_v30, 0 }
0x1f39   :  { %3933 = vmatpush3.bf16.msra.mxu1 %v2375_v35 }
0x1f3a   :  { %3944 = vmatprep.subr.bf16.mxu1 %v4176_v14 }
0x1f3b   :  { %v2470_v23 = vpop.permute.xlu1 %2469 }
0x1f3c   :  { %v2475_v44 = vsel %vm206_vm2, %v2470_v23, 0 }
0x1f3f   :  { %v2583_v42 = vpop.permute.xlu1 %2582 }
0x1f40   :  { %v2588_v45 = vsel %vm206_vm2, %v2583_v42, 0 }
0x1f43   :  { %v2581_v46 = vpop.permute.xlu1 %2580 }
0x1f45   :  { %v4149_v38 = vpop.eup %4148 }
0x1f46   :  { %v2363_v31 = vsel %vm206_vm2, %v4149_v38, 0.0 }
0x1f47   :  { %2364 = vadd.xlane.f32.xlu0 %v2363_v31 }
0x1f5f   :  { %v2298_v33 = vpop.f32.mrf.mxu1 }
0x1f60   :  { %v4837_v34 = vadd.f32 %v2298_v33, %v2138_v32 }
0x1f61   :  { %v3924_v53 = vpop.f32.mrf.mxu1 }
0x1f63   :  { %v2301_v36 = vpop.f32.mrf.mxu1 }
0x1f65   :  { %v3925_v37 = vpop.f32.mrf.mxu1 }
0x1fd0   :  { %v2365_v40 = vpop.xlane.xlu0 %2364 }
0x1fd1   :  { %4150 = vrcp.f32 %v2365_v40 }
0x1fde   :  { %v4151_v41 = vpop.eup %4150 }
0x1fdf   :  { %v2367_v0 = vmul.f32 %v4151_v41, %v4149_v38 }
0x1fe1   :  { %v2368_v43 = vpack.c.bf16 %v2367_v0, %v2367_v0 }
0x1fe3   :  { %3935 = vmatmul.mubr.msk.bf16.vlgmr.msra.gmra.mxu1 %vm206_vm2, %v2368_v43 }
0x1fe4   :  { %3945 = vmatpush3.bf16.xpose.msra.mxu1 %v2475_v44  ;;  %3946 = vmatprep.mubr.msk.bf16.mxu1 %vm4177_vm1, %v4176_v14 }
0x1fe5   :  { %3956 = vmatprep.subr.bf16.mxu1 %v4176_v14 }
0x1feb   :  { %3947 = vmatmul.mubr.msk.bf16.vlgmr.msra.gmra.mxu1 %vm206_vm2, %v4824_v21 }
0x1fec   :  { %3957 = vmatpush3.bf16.xpose.msra.mxu1 %v2588_v45  ;;  %3958 = vmatprep.mubr.msk.bf16.mxu1 %vm4177_vm1, %v4176_v14 }
0x1fed   :  { %3968 = vmatprep.subr.bf16.mxu1 %v4176_v14 }
0x1ff3   :  { %3959 = vmatmul.mubr.msk.bf16.vlgmr.msra.gmra.mxu1 %vm206_vm2, %v2581_v46 }
0x1ff4   :  { %3969 = vmatpush3.bf16.msra.mxu1 %v4760_v19  ;;  %3970 = vmatprep.mubr.msk.bf16.mxu1 %vm4177_vm1, %v4176_v14 }
0x1ff5   :  { %3980 = vmatprep.subr.bf16.mxu1 %v4176_v14 }
0x20a3   :  { %v2411_v50 = vpop.f32.mrf.mxu1 }
0x20a4   :  { %v2417_v51 = vpack.c.bf16 %v2411_v50, %v2411_v50 }
0x20a5   :  { %v3936_v25 = vpop.f32.mrf.mxu1 }
0x20a6   :  { %3941 = vmatmul.mubr.msk.bf16.vlgmr.msra.gmra.mxu0 %vm206_vm2, %v2417_v51 }
0x20a7   :  { %v2414_v19 = vpop.f32.mrf.mxu1  ;;  %3952 = vmatprep.mubr.msk.bf16.mxu0 %vm4177_vm1, %v4176_v14 }
0x20a9   :  { %v3937_v52 = vpop.f32.mrf.mxu1 }
0x20ab   :  { %v2511_v54 = vpop.f32.mrf.mxu1 }
0x20ac   :  { %v2517_v55 = vmul.f32 0.17677669, %v2511_v54 }
0x20ad   :  { %v3948_v56 = vpop.f32.mrf.mxu1 }
0x20ae   :  { %v2518_v27 = vadd.f32 %v2517_v55, %v4392_v49 }
0x20af   :  { %v2514_v29 = vpop.f32.mrf.mxu1 }
0x20b0   :  { %v2519_v57 = vsel %vm206_vm2, %v2518_v27, -inf }
0x20b1   :  { %2520 = vmax.xlane.f32.xlu0 %v2519_v57  ;;  %v3949_v58 = vpop.f32.mrf.mxu1 }
0x20b3   :  { %v2624_v60 = vpop.f32.mrf.mxu1 }
0x20b4   :  { %v2630_v61 = vmul.f32 0.17677669, %v2624_v60 }
0x20b5   :  { %v3960_v62 = vpop.f32.mrf.mxu1 }
0x20b6   :  { %v2631_v63 = vadd.f32 %v2630_v61, %v4392_v49 }
0x20b7   :  { %v2627_v3 = vpop.f32.mrf.mxu1 }
0x20b8   :  { %v2632_v4 = vsel %vm206_vm2, %v2631_v63, -inf }
0x20b9   :  { %2633 = vmax.xlane.f32.xlu1 %v2632_v4  ;;  %v3961_v13 = vpop.f32.mrf.mxu1 }
0x20c7   :  { %2531 = vrot.lane.b32.xlu0 %v4824_v21, %s4182_s7 }
0x20ca   :  { %2781 = vrot.lane.b32.xlu1 %v4824_v21, %s5118_s12 }
0x213a   :  { %v2521_v39 = vpop.xlane.xlu0 %2520 }
0x213b   :  { %v2522_v5 = vsub.f32 %v2518_v27, %v2521_v39 }
0x213d   :  { %v2523_v8 = vmul.f32 1.442695, %v2522_v5 }
0x213e   :  { %v2532_v6 = vpop.permute.xlu0 %2531 }
0x213f   :  { %4152 = vpow2.f32 %v2523_v8  ;;  %v2537_v9 = vsel %vm272_vm4, %v2532_v6, 0 }
0x2140   :  { %3951 = vmatpush3.bf16.msra.mxu0 %v2537_v9 }
0x2141   :  { %3962 = vmatprep.subr.bf16.mxu0 %v4176_v14 }
0x2142   :  { %v2634_v10 = vpop.xlane.xlu1 %2633 }
0x2143   :  { %v2635_v11 = vsub.f32 %v2631_v63, %v2634_v10 }
0x2145   :  { %v2636_v12 = vmul.f32 1.442695, %v2635_v11 }
0x2146   :  { %v2782_v44 = vpop.permute.xlu1 %2781 }
0x2147   :  { %4154 = vpow2.f32 %v2636_v12 }
0x214c   :  { %v4153_v15 = vpop.eup %4152 }
0x214d   :  { %v2525_v16 = vsel %vm206_vm2, %v4153_v15, 0.0 }
0x214e   :  { %2526 = vadd.xlane.f32.xlu0 %v2525_v16 }
0x2154   :  { %v4155_v17 = vpop.eup %4154 }
0x2155   :  { %v2638_v1 = vsel %vm206_vm2, %v4155_v17, 0.0 }
0x2156   :  { %2639 = vadd.xlane.f32.xlu0 %v2638_v1 }
0x2166   :  { %v2460_v18 = vpop.f32.mrf.mxu0 }
0x2167   :  { %v4879_v20 = vadd.f32 %v2460_v18, %v4837_v34 }
0x2168   :  { %v3942_v22 = vpop.f32.mrf.mxu0 }
0x216a   :  { %v2463_v24 = vpop.f32.mrf.mxu0 }
0x216c   :  { %v3943_v26 = vpop.f32.mrf.mxu0  ;;  %2644 = vrot.lane.b32.xlu0 %v4824_v21, %s4185_s0 }
0x2170   :  { %2779 = vrot.lane.b32.xlu0 %v4824_v21, %s5119_s13 }
0x21d7   :  { %v2527_v30 = vpop.xlane.xlu0 %2526 }
0x21d8   :  { %4156 = vrcp.f32 %v2527_v30 }
0x21df   :  { %v2640_v35 = vpop.xlane.xlu0 %2639 }
0x21e0   :  { %4158 = vrcp.f32 %v2640_v35 }
0x21e3   :  { %v2645_v32 = vpop.permute.xlu0 %2644 }
0x21e4   :  { %v2650_v34 = vsel %vm272_vm4, %v2645_v32, 0 }
0x21e5   :  { %v4157_v38 = vpop.eup %4156 }
0x21e6   :  { %v2529_v31 = vmul.f32 %v4157_v38, %v4153_v15 }
0x21e7   :  { %v2780_v51 = vpop.permute.xlu0 %2779 }
0x21e8   :  { %v2530_v33 = vpack.c.bf16 %v2529_v31, %v2529_v31 }
0x21ea   :  { %3953 = vmatmul.mubr.msk.bf16.vlgmr.msra.gmra.mxu0 %vm206_vm2, %v2530_v33 }
0x21eb   :  { %3963 = vmatpush3.bf16.msra.mxu0 %v2650_v34  ;;  %3964 = vmatprep.mubr.msk.bf16.mxu0 %vm4177_vm1, %v4176_v14 }
0x21ec   :  { %3974 = vmatprep.subr.bf16.mxu0 %v4176_v14 }
0x21ed   :  { %v4159_v53 = vpop.eup %4158 }
0x21ee   :  { %v2642_v36 = vmul.f32 %v4159_v53, %v4155_v17 }
0x21f0   :  { %v2643_v37 = vpack.c.bf16 %v2642_v36, %v2642_v36 }
0x21f2   :  { %3965 = vmatmul.mubr.msk.bf16.vlgmr.msra.gmra.mxu0 %vm206_vm2, %v2643_v37 }
0x21f3   :  { %3975 = vmatpush3.bf16.msra.mxu0 %v4768_v28  ;;  %3976 = vmatprep.mubr.msk.bf16.mxu0 %vm4177_vm1, %v4176_v14  ;;  %v2787_v28 = vsel %vm206_vm2, %v2782_v44, 0 }
0x21f4   :  { %3986 = vmatprep.subr.bf16.mxu0 %v4176_v14 }
0x22aa   :  { %v2573_v40 = vpop.f32.mrf.mxu0 }
0x22ab   :  { %v2579_v41 = vpack.c.bf16 %v2573_v40, %v2573_v40 }
0x22ac   :  { %v3954_v0 = vpop.f32.mrf.mxu0 }
0x22ad   :  { %3977 = vmatmul.mubr.msk.bf16.vlgmr.msra.gmra.mxu0 %vm206_vm2, %v2579_v41  ;;  %v3533_v0 = vld [vmem:[%s5065_s16] ss:$0 sm:$0xff] }
0x22ae   :  { %v2576_v23 = vpop.f32.mrf.mxu0  ;;  %3988 = vmatprep.mubr.msk.bf16.mxu0 %vm4177_vm1, %v4176_v14 }
0x22b0   :  { %v3955_v43 = vpop.f32.mrf.mxu0 }
0x22b2   :  { %v2686_v42 = vpop.f32.mrf.mxu0 }
0x22b3   :  { %v2692_v45 = vpack.c.bf16 %v2686_v42, %v2686_v42 }
0x22b4   :  { %v3966_v46 = vpop.f32.mrf.mxu0 }
0x22b5   :  { %3971 = vmatmul.mubr.msk.bf16.vlgmr.msra.gmra.mxu1 %vm206_vm2, %v2692_v45 }
0x22b6   :  { %3981 = vmatpush3.bf16.xpose.msra.mxu1 %v2787_v28  ;;  %v2689_v47 = vpop.f32.mrf.mxu0  ;;  %3982 = vmatprep.mubr.msk.bf16.mxu1 %vm4177_vm1, %v4176_v14 }
0x22b7   :  { %3992 = vmatprep.subr.bf16.mxu1 %v4176_v14 }
0x22b8   :  { %v3967_v50 = vpop.f32.mrf.mxu0 }
0x22bd   :  { %3983 = vmatmul.mubr.msk.bf16.vlgmr.msra.gmra.mxu1 %vm206_vm2, %v2780_v51 }
0x22be   :  { %3993 = vmatpush3.bf16.msra.mxu1 %v4811_v7  ;;  %3994 = vmatprep.mubr.msk.bf16.mxu1 %vm4177_vm1, %v4176_v14 }
0x22bf   :  { %4004 = vmatprep.subr.bf16.mxu1 %v4176_v14 }
0x236d   :  { %v2773_v25 = vpop.f32.mrf.mxu0 }
0x236f   :  { %v3978_v19 = vpop.f32.mrf.mxu0 }
0x2371   :  { %v2776_v52 = vpop.f32.mrf.mxu0 }
0x2373   :  { %v3979_v54 = vpop.f32.mrf.mxu0 }
0x2375   :  { %v2730_v55 = vpop.f32.mrf.mxu1 }
0x2376   :  { %v4908_v56 = vadd.f32 %v2773_v25, %v2730_v55 }
0x2377   :  { %v3972_v27 = vpop.f32.mrf.mxu1 }
0x2379   :  { %v2733_v29 = vpop.f32.mrf.mxu1 }
0x237b   :  { %v3973_v57 = vpop.f32.mrf.mxu1 }
0x237d   :  { %v2823_v58 = vpop.f32.mrf.mxu1 }
0x237e   :  { %v2829_v60 = vmul.f32 0.17677669, %v2823_v58 }
0x237f   :  { %v3984_v61 = vpop.f32.mrf.mxu1 }
0x2380   :  { %v2830_v7 = vadd.f32 %v2829_v60, %v4392_v49 }
0x2381   :  { %v2826_v62 = vpop.f32.mrf.mxu1 }
0x2382   :  { %v2831_v63 = vsel %vm206_vm2, %v2830_v7, -inf }
0x2383   :  { %2832 = vmax.xlane.f32.xlu0 %v2831_v63  ;;  %v3985_v3 = vpop.f32.mrf.mxu1 }
0x2399   :  { %2843 = vrot.lane.b32.xlu0 %v4824_v21, %s5120_s10 }
0x239d   :  { %2936 = vrot.lane.b32.xlu0 %v4824_v21, %s5122_s11 }
0x240c   :  { %v2833_v4 = vpop.xlane.xlu0 %2832 }
0x240d   :  { %v2834_v13 = vsub.f32 %v2830_v7, %v2833_v4 }
0x240f   :  { %v2835_v39 = vmul.f32 1.442695, %v2834_v13 }
0x2410   :  { %v2844_v5 = vpop.permute.xlu0 %2843 }
0x2411   :  { %4160 = vpow2.f32 %v2835_v39  ;;  %v2849_v8 = vsel %vm272_vm4, %v2844_v5, 0 }
0x2412   :  { %3987 = vmatpush3.bf16.msra.mxu0 %v2849_v8 }
0x2413   :  { %3998 = vmatprep.subr.bf16.mxu0 %v4176_v14 }
0x2414   :  { %v2937_v1 = vpop.permute.xlu0 %2936 }
0x241e   :  { %v4161_v6 = vpop.eup %4160 }
0x241f   :  { %v2837_v9 = vsel %vm206_vm2, %v4161_v6, 0.0 }
0x2420   :  { %2838 = vadd.xlane.f32.xlu1 %v2837_v9 }
0x2431   :  { %2938 = vrot.lane.b32.xlu1 %v4824_v21, %s5121_s3 }
0x24a9   :  { %v2839_v10 = vpop.xlane.xlu1 %2838 }
0x24aa   :  { %4162 = vrcp.f32 %v2839_v10  ;;  %v4081_v10 = vld [vmem:[%s5066_s19] sm:$0xff]  }
0x24ad   :  { %v2939_v15 = vpop.permute.xlu1 %2938 }
0x24ae   :  { %v2944_v17 = vsel %vm206_vm2, %v2939_v15, 0  ;;  %v4084_v15 = vld [vmem:[%s5067_s21 + $0x28] sm:$0xff]  }
0x24b7   :  { %v4163_v11 = vpop.eup %4162 }
0x24b8   :  { %v2841_v12 = vmul.f32 %v4163_v11, %v4161_v6  ;;  %v4082_v11 = vld [vmem:[%s5067_s21 + $0x38] sm:$0xff]  }
0x24ba   :  { %v2842_v16 = vpack.c.bf16 %v2841_v12, %v2841_v12  ;;  %v4083_v12 = vld [vmem:[%s5067_s21 + $0x30] sm:$0xff]  }
0x24bc   :  { %3989 = vmatmul.mubr.msk.bf16.vlgmr.msra.gmra.mxu0 %vm206_vm2, %v2842_v16  ;;  %v4085_v16 = vld [vmem:[%s5067_s21 + $0x20] sm:$0xff]  }
0x24bd   :  { %3999 = vmatpush3.bf16.xpose.msra.mxu0 %v2944_v17  ;;  %4000 = vmatprep.mubr.msk.bf16.mxu0 %vm4177_vm1, %v4176_v14  ;;  %v4086_v17 = vld [vmem:[%s5067_s21 + $0x18] sm:$0xff]  }
0x24be   :  { %4010 = vmatprep.subr.bf16.mxu0 %v4176_v14 }
0x24c4   :  { %4001 = vmatmul.mubr.msk.bf16.vlgmr.msra.gmra.mxu0 %vm206_vm2, %v2937_v1 }
0x24c5   :  { %4011 = vmatpush3.bf16.msra.mxu0 %v4859_v48  ;;  %4012 = vmatprep.mubr.msk.bf16.mxu0 %vm4177_vm1, %v4176_v14 }
0x24c6   :  { %4024 = vmatprep.subr.bf16.mxu0 %v4176_v14 }
0x257c   :  { %v2885_v18 = vpop.f32.mrf.mxu0 }
0x257d   :  { %v2891_v22 = vpack.c.bf16 %v2885_v18, %v2885_v18 }
0x257e   :  { %v3990_v24 = vpop.f32.mrf.mxu0 }
0x257f   :  { %3995 = vmatmul.mubr.msk.bf16.vlgmr.msra.gmra.mxu1 %vm206_vm2, %v2891_v22 }
0x2580   :  { %v2888_v26 = vpop.f32.mrf.mxu0  ;;  %4006 = vmatprep.mubr.msk.bf16.mxu1 %vm4177_vm1, %v4176_v14 }
0x2582   :  { %v3991_v30 = vpop.f32.mrf.mxu0 }
0x2584   :  { %v2980_v35 = vpop.f32.mrf.mxu0 }
0x2585   :  { %v2986_v38 = vmul.f32 0.17677669, %v2980_v35 }
0x2586   :  { %v4002_v31 = vpop.f32.mrf.mxu0 }
0x2587   :  { %v2987_v48 = vadd.f32 %v2986_v38, %v4392_v49  ;;  %v3093_v49 = vadd.f32 %v4879_v20, %v4682_v59  ;;  %v3534_v31 = vld [vmem:[%s5068_s17] ss:$0 sm:$0xff] }
0x2588   :  { %v2983_v32 = vpop.f32.mrf.mxu0 }
0x2589   :  { %v2988_v33 = vsel %vm206_vm2, %v2987_v48, -inf  ;;  %v4945_v43 = vadd.f32 %v3533_v0, %v3093_v49  ;;  %v4088_v49 = vld [vmem:[%s5067_s21 + $0x8] sm:$0xff]  }
0x258a   :  { %2989 = vmax.xlane.f32.xlu0 %v2988_v33  ;;  %v4003_v34 = vpop.f32.mrf.mxu0 }
0x258b   :  { %v3106_v44 = vsel %vm97_vm0, %v4945_v43, 0.0  ;;  %v3535_v34 = vld [vmem:[%s5069_s18] ss:$0 sm:$0xff] }
0x25a0   :  { %3000 = vrot.lane.b32.xlu0 %v4824_v21, %s5123_s14 }
0x2613   :  { %v2990_v53 = vpop.xlane.xlu0 %2989 }
0x2614   :  { %v2991_v36 = vsub.f32 %v2987_v48, %v2990_v53 }
0x2616   :  { %v2992_v37 = vmul.f32 1.442695, %v2991_v36 }
0x2617   :  { %v3001_v40 = vpop.permute.xlu0 %3000 }
0x2618   :  { %4164 = vpow2.f32 %v2992_v37  ;;  %v3006_v41 = vsel %vm272_vm4, %v3001_v40, 0 }
0x2619   :  { %4005 = vmatpush3.bf16.msra.mxu1 %v3006_v41  ;;  %v4087_v41 = vld [vmem:[%s5067_s21 + $0x10] sm:$0xff]  }
0x261a   :  { %4016 = vmatprep.subr.bf16.mxu1 %v4176_v14 }
0x2625   :  { %v4165_v23 = vpop.eup %4164 }
0x2626   :  { %v2994_v21 = vsel %vm206_vm2, %v4165_v23, 0.0 }
0x2627   :  { %2995 = vadd.xlane.f32.xlu1 %v2994_v21 }
0x262b   :  { %3107 = vadd.xlane.f32.xlu1 %v3106_v44 }
0x263f   :  { %v2929_v42 = vpop.f32.mrf.mxu1 }
0x2640   :  { %v2935_v45 = vadd.f32 %v2929_v42, %v4908_v56 }
0x2641   :  { %v3996_v46 = vpop.f32.mrf.mxu1 }
0x2643   :  { %v2932_v28 = vpop.f32.mrf.mxu1 }
0x2645   :  { %v3997_v59 = vpop.f32.mrf.mxu1 }
0x26b0   :  { %v2996_v20 = vpop.xlane.xlu1 %2995 }
0x26b1   :  { %4166 = vrcp.f32 %v2996_v20 }
0x26b4   :  { %v3108_v56 = vpop.xlane.xlu1 %3107 }
0x26b5   :  { %v3112_v27 = vmul.f32 0.03125, %v3108_v56 }
0x26b7   :  { %v3114_v60 = vsub.f32 %v4945_v43, %v3112_v27 }
0x26b9   :  { %v3116_v4 = vmul.f32 %v3114_v60, %v3114_v60 }
0x26bb   :  { %v3118_v13 = vsel %vm97_vm0, %v3116_v4, 0.0 }
0x26be   :  { %v4167_v47 = vpop.eup %4166 }
0x26bf   :  { %v2998_v50 = vmul.f32 %v4167_v47, %v4165_v23  ;;  %v3536_v23 = vld [vmem:[%s5070_s20] ss:$0 sm:$0xff] }
0x26c1   :  { %v2999_v51 = vpack.c.bf16 %v2998_v50, %v2998_v50 }
0x26c3   :  { %4007 = vmatmul.mubr.msk.bf16.vlgmr.msra.gmra.mxu1 %vm206_vm2, %v2999_v51  ;;  %v3548_v51 = vld [vmem:[%s5071_s22] ss:$0 sm:$0xff] }
0x26c4   :  { %4020 = vmatprep.mubr.msk.bf16.mxu1 %vm4177_vm1, %v4176_v14 }
0x2783   :  { %v3042_v25 = vpop.f32.mrf.mxu1 }
0x2784   :  { %v3048_v19 = vpack.c.bf16 %v3042_v25, %v3042_v25 }
0x2785   :  { %v4008_v52 = vpop.f32.mrf.mxu1 }
0x2786   :  { %4013 = vmatmul.mubr.msk.bf16.vlgmr.msra.gmra.mxu0 %vm206_vm2, %v3048_v19 }
0x2787   :  { %v3045_v54 = vpop.f32.mrf.mxu1  ;;  %4040 = vmatprep.mubr.msk.bf16.mxu0 %vm4177_vm1, %v4176_v14  ;;  %4025 = vmatpush3.bf16.msra.mxu0 %v4082_v11 }
0x2788   :  { %4026 = vmatprep.subr.bf16.mxu0 %v4176_v14 }
0x2789   :  { %v4009_v55 = vpop.f32.mrf.mxu1 }
0x278b   :  { %4027 = vmatpush3.bf16.msra.mxu0 %v4083_v12 }
0x278c   :  { %4028 = vmatprep.subr.bf16.mxu0 %v4176_v14 }
0x278f   :  { %4029 = vmatpush3.bf16.msra.mxu0 %v4084_v15 }
0x2790   :  { %4030 = vmatprep.subr.bf16.mxu0 %v4176_v14 }
0x2793   :  { %4031 = vmatpush3.bf16.msra.mxu0 %v4085_v16  ;;  %v3549_v16 = vld [vmem:[%s5073_s23] ss:$0 sm:$0xff] }
0x2794   :  { %4032 = vmatprep.subr.bf16.mxu0 %v4176_v14 }
0x2797   :  { %4033 = vmatpush3.bf16.msra.mxu0 %v4086_v17 }
0x2798   :  { %4034 = vmatprep.subr.bf16.mxu0 %v4176_v14 }
0x279b   :  { %4035 = vmatpush3.bf16.msra.mxu0 %v4087_v41 }
0x279c   :  { %4036 = vmatprep.subr.bf16.mxu0 %v4176_v14 }
0x279f   :  { %4037 = vmatpush3.bf16.msra.mxu0 %v4088_v49 }
0x27a0   :  { %4038 = vmatprep.subr.bf16.mxu0 %v4176_v14 }
0x2846   :  { %v3086_v29 = vpop.f32.mrf.mxu0 }
0x2847   :  { %v3092_v57 = vadd.f32 %v3086_v29, %v2935_v45 }
0x2848   :  { %v4014_v58 = vpop.f32.mrf.mxu0 }
0x2849   :  { %v3094_v61 = vadd.f32 %v3092_v57, %v4687_v2  ;;  %v4080_v2 = vld [vmem:[%s5066_s19 + $0x8] sm:$0xff]  }
0x284a   :  { %v3089_v7 = vpop.f32.mrf.mxu0  ;;  %4017 = vmatpush3.bf16.msra.mxu1 %v4080_v2 }
0x284b   :  { %v4959_v62 = vadd.f32 %v3533_v0, %v3094_v61  ;;  %4018 = vmatprep.subr.bf16.mxu1 %v4176_v14  ;;  %v4089_v0 = vld [vmem:[%s5067_s21] sm:$0xff]  }
0x284c   :  { %v4015_v63 = vpop.f32.mrf.mxu0  ;;  %4039 = vmatpush3.bf16.msra.mxu0 %v4089_v0 }
0x284d   :  { %v3109_v3 = vsel %vm97_vm0, %v4959_v62, 0.0 }
0x284e   :  { %3110 = vadd.xlane.f32.xlu1 %v3109_v3  ;;  %4019 = vmatpush3.bf16.msra.mxu1 %v4081_v10 }
0x284f   :  { %4044 = vmatprep.subr.bf16.mxu1 %v4176_v14 }
0x2852   :  { %3119 = vadd.xlane.f32.xlu1 %v3118_v13 }
0x28d7   :  { %v3111_v39 = vpop.xlane.xlu1 %3110 }
0x28d8   :  { %v3113_v5 = vmul.f32 0.03125, %v3111_v39  ;;  %v4090_v39 = vld [vmem:[%s5072_s25 + $0x8] sm:$0xff]  }
0x28da   :  { %v3115_v8 = vsub.f32 %v4959_v62, %v3113_v5  ;;  %v4091_v5 = vld [vmem:[%s5072_s25] sm:$0xff]  }
0x28db   :  { %v3120_v1 = vpop.xlane.xlu1 %3119 }
0x28dc   :  { %v3117_v6 = vmul.f32 %v3115_v8, %v3115_v8  ;;  %v3124_v18 = vmul.f32 0.03125, %v3120_v1 }
0x28de   :  { %v3121_v9 = vsel %vm97_vm0, %v3117_v6, 0.0  ;;  %v3126_v22 = vadd.f32 1e-05, %v3124_v18  ;;  %v3550_v18 = vld [vmem:[%s5074_s24] ss:$0 sm:$0xff] }
0x28df   :  { %3122 = vadd.xlane.f32.xlu0 %v3121_v9 }
0x28e0   :  { %4168 = vrsqrt.f32 %v3126_v22 }
0x28ed   :  { %v4169_v35 = vpop.eup %4168 }
0x28ee   :  { %v3130_v38 = vmul.f32 %v4169_v35, %v3114_v60  ;;  %v3551_v35 = vld [vmem:[%s5075_s26] ss:$0 sm:$0xff] }
0x28f0   :  { %v3138_v32 = vmul.f32 %v3534_v31, %v3130_v38 }
0x28f2   :  { %v3146_v37 = vadd.f32 %v3535_v34, %v3138_v32 }
0x2968   :  { %v3123_v24 = vpop.xlane.xlu0 %3122 }
0x2969   :  { %v3125_v26 = vmul.f32 0.03125, %v3123_v24 }
0x296b   :  { %v3127_v30 = vadd.f32 1e-05, %v3125_v26 }
0x296d   :  { %4170 = vrsqrt.f32 %v3127_v30 }
0x297a   :  { %v4171_v48 = vpop.eup %4170 }
0x297b   :  { %v3131_v33 = vmul.f32 %v4171_v48, %v3115_v8 }
0x297d   :  { %v3139_v53 = vmul.f32 %v3534_v31, %v3131_v33 }
0x297f   :  { %v3147_v36 = vadd.f32 %v3535_v34, %v3139_v53 }
0x2981   :  { %v3148_v40 = vpack.c.bf16 %v3147_v36, %v3146_v37 }
0x2983   :  { %4021 = vmatmul.mubr.msk.bf16.vlgmr.msra.gmra.mxu1 %vm97_vm0, %v3148_v40 }
0x2984   :  { %4048 = vmatprep.mubr.msk.bf16.mxu1 %vm4177_vm1, %v4176_v14  ;;  %4045 = vmatpush3.bf16.msra.mxu1 %v4090_v39 }
0x2985   :  { %4046 = vmatprep.subr.bf16.mxu1 %v4176_v14 }
0x2988   :  { %4047 = vmatpush3.bf16.msra.mxu1 %v4091_v5 }
0x2a43   :  { %v3209_v21 = vpop.f32.mrf.mxu1 }
0x2a44   :  { %v3210_v42 = vadd.f32 %v3536_v23, %v3209_v21 }
0x2a45   :  { %v4022_v44 = vpop.f32.mrf.mxu1 }
0x2a46   :  { %v3216_v59 = vmax.f32 %v3210_v42, 0.0 }
0x2a47   :  { %v3212_v45 = vpop.f32.mrf.mxu1 }
0x2a48   :  { %v3213_v46 = vadd.f32 %v3536_v23, %v3212_v45 }
0x2a49   :  { %v4023_v28 = vpop.f32.mrf.mxu1 }
0x2a4a   :  { %v3217_v20 = vmax.f32 %v3213_v46, 0.0 }
0x2a4c   :  { %v3218_v47 = vpack.c.bf16 %v3217_v20, %v3216_v59 }
0x2a4e   :  { %4041 = vmatmul.mubr.bf16.vlgmr.msra.gmra.mxu0 %v3218_v47 }
0x2b0e   :  { %v3317_v50 = vpop.f32.mrf.mxu0 }
0x2b0f   :  { %v3324_v25 = vadd.f32 %v3317_v50, %v4945_v43 }
0x2b10   :  { %v4042_v19 = vpop.f32.mrf.mxu0 }
0x2b11   :  { %v3333_v52 = vadd.f32 %v3548_v51, %v3324_v25 }
0x2b12   :  { %v3320_v54 = vpop.f32.mrf.mxu0 }
0x2b13   :  { %v3325_v55 = vadd.f32 %v3320_v54, %v4959_v62  ;;  %v3337_v56 = vsel %vm97_vm0, %v3333_v52, 0.0 }
0x2b14   :  { %3338 = vadd.xlane.f32.xlu1 %v3337_v56  ;;  %v4043_v27 = vpop.f32.mrf.mxu0 }
0x2b15   :  { %v3334_v29 = vadd.f32 %v3548_v51, %v3325_v55 }
0x2b17   :  { %v3340_v57 = vsel %vm97_vm0, %v3334_v29, 0.0 }
0x2b18   :  { %3341 = vadd.xlane.f32.xlu1 %v3340_v57 }
0x2b9d   :  { %v3339_v58 = vpop.xlane.xlu1 %3338 }
0x2b9e   :  { %v3343_v60 = vmul.f32 0.03125, %v3339_v58 }
0x2ba0   :  { %v3345_v61 = vsub.f32 %v3333_v52, %v3343_v60 }
0x2ba1   :  { %v3342_v7 = vpop.xlane.xlu1 %3341 }
0x2ba2   :  { %v3344_v63 = vmul.f32 0.03125, %v3342_v7  ;;  %v3347_v3 = vmul.f32 %v3345_v61, %v3345_v61 }
0x2ba4   :  { %v3346_v43 = vsub.f32 %v3334_v29, %v3344_v63  ;;  %v3349_v4 = vsel %vm97_vm0, %v3347_v3, 0.0 }
0x2ba5   :  { %3350 = vadd.xlane.f32.xlu1 %v3349_v4 }
0x2ba6   :  { %v3348_v13 = vmul.f32 %v3346_v43, %v3346_v43 }
0x2ba8   :  { %v3352_v62 = vsel %vm97_vm0, %v3348_v13, 0.0 }
0x2ba9   :  { %3353 = vadd.xlane.f32.xlu1 %v3352_v62 }
0x2c2e   :  { %v3351_v8 = vpop.xlane.xlu1 %3350 }
0x2c2f   :  { %v3355_v6 = vmul.f32 0.03125, %v3351_v8 }
0x2c31   :  { %v3357_v9 = vadd.f32 1e-05, %v3355_v6 }
0x2c32   :  { %v3354_v2 = vpop.xlane.xlu1 %3353 }
0x2c33   :  { %4172 = vrsqrt.f32 %v3357_v9  ;;  %v3356_v10 = vmul.f32 0.03125, %v3354_v2 }
0x2c35   :  { %v3358_v11 = vadd.f32 1e-05, %v3356_v10 }
0x2c37   :  { %4174 = vrsqrt.f32 %v3358_v11 }
0x2c40   :  { %v4173_v12 = vpop.eup %4172 }
0x2c41   :  { %v3361_v15 = vmul.f32 %v4173_v12, %v3345_v61 }
0x2c43   :  { %v3369_v17 = vmul.f32 %v3549_v16, %v3361_v15 }
0x2c44   :  { %v4175_v14 = vpop.eup %4174 }
0x2c45   :  { %v3362_v1 = vmul.f32 %v4175_v14, %v3346_v43  ;;  %v3377_v26 = vadd.f32 %v3550_v18, %v3369_v17 }
0x2c47   :  { %v3370_v22 = vmul.f32 %v3549_v16, %v3362_v1 }
0x2c49   :  { %v3378_v24 = vadd.f32 %v3550_v18, %v3370_v22 }
0x2c4b   :  { %v3379_v30 = vpack.c.bf16 %v3378_v24, %v3377_v26 }
0x2c4d   :  { %4049 = vmatmul.mubr.msk.bf16.vlgmr.msra.gmra.mxu1 %vm97_vm0, %v3379_v30 }
0x2d0d   :  { %v3440_v38 = vpop.f32.mrf.mxu1 }
0x2d0e   :  { %v3441_v31 = vadd.f32 %v3551_v35, %v3440_v38 }
0x2d0f   :  { %v4050_v48 = vpop.f32.mrf.mxu1 }
0x2d10   :  { %3447 = vst [vmem:[%s5076_s27] sm:$0xff] %v3441_v31 }
0x2d11   :  { %v3443_v32 = vpop.f32.mrf.mxu1 }
0x2d12   :  { %v3444_v33 = vadd.f32 %v3551_v35, %v3443_v32 }
0x2d13   :  { %v4051_v34 = vpop.f32.mrf.mxu1 }
0x2d14   :  { %3448 = vst [vmem:[%s5076_s27 + $0x8] sm:$0xff] %v3444_v33 }

</bundles_post_ra>
